<compile_context>
chip_gen: v7x
topology: tpu7x:2x2x1
jax: 0.10.0
libtpu: 0.0.40
codegen_flags: <defaults>
</compile_context>

<pallas_src>
import math

import jax
import jax.numpy as jnp
from jax.experimental import pallas as pl
from jax.experimental.pallas import tpu as pltpu


def _round_up(x, m):
    return (x + m - 1) // m * m


# --------------------------------------------------------------------------- kernel
def _make_plstm_kernel(tc, bp, dp, true_d, unroll):
    """Pyramid-LSTM layer kernel over a block of `tc` time steps.

    gx_ref   : (tc, bp, 4*dp) precomputed input projection x@W_ih^T + b (f32)
    x_ref    : (tc, bp, dp)   time block of the layer input (residual path)
    whh_ref  : (dp, 4*dp)     hidden->gates weights, transposed, gate-blocked, bf16
    gamma_ref/beta_ref : (1, dp)  LayerNorm affine (zero in padded lanes)
    lens_ref : (bp, 1) int32  valid length per (padded) batch row
    y_ref    : (tc, bp, dp)   y_t = LN(h_t + x_t) * (t < len)
    h_scr/c_scr : (bp, dp)    recurrent state, persists across grid steps
    """
    inv_d = 1.0 / float(true_d)          # LayerNorm normalizes by the TRUE feature dim
    n_pad = float(dp - true_d)           # zero-padded lanes (for exact variance corr.)

    def kernel(gx_ref, x_ref, whh_ref, gamma_ref, beta_ref, lens_ref, y_ref,
               h_scr, c_scr):
        @pl.when(pl.program_id(0) == 0)
        def _init():
            h_scr[...] = jnp.zeros_like(h_scr)
            c_scr[...] = jnp.zeros_like(c_scr)

        whh = whh_ref[...]               # bf16, single-buffered, loop-invariant
        gamma = gamma_ref[...]
        beta = beta_ref[...]
        lens = lens_ref[...]             # (bp, 1) int32
        t_base = pl.program_id(0) * tc

        def step(t, carry):
            h_prev, c_prev = carry
            # Serial critical path: only the bf16 hidden->gates matmul per step.
            gates = gx_ref[t] + jnp.dot(h_prev.astype(jnp.bfloat16), whh,
                                        preferred_element_type=jnp.float32)
            # dp is a multiple of 128 -> gate slices are lane-aligned views.
            i_g = jax.nn.sigmoid(gates[:, 0 * dp:1 * dp])
            f_g = jax.nn.sigmoid(gates[:, 1 * dp:2 * dp])
            g_g = jnp.tanh(gates[:, 2 * dp:3 * dp])
            o_g = jax.nn.sigmoid(gates[:, 3 * dp:4 * dp])
            c_new = f_g * c_prev + i_g * g_g
            h_new = o_g * jnp.tanh(c_new)

            # Residual + LayerNorm, two-pass variance with exact zero-pad correction.
            z = h_new + x_ref[t]
            mu = jnp.sum(z, axis=-1, keepdims=True) * inv_d
            zc = z - mu
            var = (jnp.sum(zc * zc, axis=-1, keepdims=True) - n_pad * mu * mu) * inv_d
            scale = jax.lax.rsqrt(var + 1e-5) * gamma        # gamma folded into scale
            # In-kernel length mask (matches pad_packed_sequence: padded steps -> 0).
            valid = ((t_base + t) < lens).astype(jnp.float32)  # (bp, 1)
            y_ref[t] = (zc * scale + beta) * valid
            return (h_new, c_new)

        h_fin, c_fin = jax.lax.fori_loop(0, tc, step, (h_scr[...], c_scr[...]),
                                         unroll=unroll)
        h_scr[...] = h_fin
        c_scr[...] = c_fin

    return kernel


def _choose_tc_and_vmem(T, bp, dp):
    """Derive time-block size and VMEM limit from the actual TPU generation."""
    try:
        cap = int(pltpu.get_tpu_info().vmem_capacity_bytes)
    except Exception:
        cap = 64 * 1024 * 1024
    # ~96 MiB on 128-MiB parts (v5e/v6e), ~48 MiB on 64-MiB parts (v7x).
    vmem_limit = max(32 << 20, min(int(cap * 0.75), cap - (16 << 20)))
    budget = vmem_limit - (6 << 20)
    fixed = (dp * 4 * dp * 2            # W_hh bf16, single-buffered
             + 2 * dp * 4 + bp * 4      # gamma, beta, lens
             + 2 * bp * dp * 4)         # h / c scratch
    tc = max(8, min(64, _round_up(T, 8)))
    # gx + x + y blocks (f32) are double-buffered by the pipeline.
    while tc > 8 and fixed + 2 * tc * bp * 6 * dp * 4 > budget:
        tc -= 8
    return tc, vmem_limit


def _const_spec(shape):
    """Loop-invariant operand: constant index_map, single-buffered if supported."""
    idx = lambda i, _s=shape: (0,) * len(_s)
    try:
        return pl.BlockSpec(shape, idx, pipeline_mode=pl.Buffered(1))
    except TypeError:   # older BlockSpec signature without pipeline_mode
        return pl.BlockSpec(shape, idx)


def plstm_layer(x, lens, params):
    """One pyramid-LSTM layer on a time-major padded batch: (T, B, D) -> (T, B, D)."""
    T, B, D = x.shape
    wih, whh, bias, gamma, beta = params
    dp = whh.shape[0]
    assert whh.shape == (dp, 4 * dp) and dp % 128 == 0 and D <= dp

    bp = _round_up(B, 8)                       # f32 sublane alignment
    tc, vmem_limit = _choose_tc_and_vmem(T, bp, dp)
    tp = _round_up(T, tc)
    unroll = min(8, tc)

    xp = jnp.pad(x, ((0, tp - T), (0, bp - B), (0, dp - D)))

    # Hoisted input projection: one big bf16 MXU matmul over all (tp*bp) rows, done by
    # XLA outside the kernel so it never sits on the serial recurrence path.
    gx = jnp.dot(xp.reshape(tp * bp, dp).astype(jnp.bfloat16), wih,
                 preferred_element_type=jnp.float32).reshape(tp, bp, 4 * dp) + bias

    lens_v = jnp.zeros((bp, 1), jnp.int32).at[:B, 0].set(lens.astype(jnp.int32))

    yp = pl.pallas_call(
        _make_plstm_kernel(tc, bp, dp, D, unroll),
        out_shape=jax.ShapeDtypeStruct((tp, bp, dp), jnp.float32),
        grid_spec=pltpu.PrefetchScalarGridSpec(
            num_scalar_prefetch=0,
            grid=(tp // tc,),
            in_specs=[
                pl.BlockSpec((tc, bp, 4 * dp), lambda i: (i, 0, 0)),  # gx time block
                pl.BlockSpec((tc, bp, dp), lambda i: (i, 0, 0)),      # x time block
                _const_spec((dp, 4 * dp)),                            # W_hh^T (bf16)
                _const_spec((1, dp)),                                 # LN gamma
                _const_spec((1, dp)),                                 # LN beta
                _const_spec((bp, 1)),                                 # lens
            ],
            out_specs=pl.BlockSpec((tc, bp, dp), lambda i: (i, 0, 0)),
            scratch_shapes=[
                pltpu.VMEM((bp, dp), jnp.float32),                    # h state
                pltpu.VMEM((bp, dp), jnp.float32),                    # c state
            ],
        ),
        compiler_params=pltpu.CompilerParams(
            dimension_semantics=("arbitrary",),       # sequential time recurrence
            vmem_limit_bytes=vmem_limit,
        ),
    )(gx, xp, whh, gamma, beta, lens_v)

    return yp[:T, :B, :D]


# --------------------------------------------------------------------------- params
def _pad_gate_mat(w, d, dp):
    """(4d, d) PyTorch LSTM weight -> (dp, 4*dp) transposed, gate-blocked, zero-padded, bf16."""
    w4 = w.reshape(4, d, d)                                       # (gate, out, in)
    wp = jnp.zeros((4, dp, dp), w.dtype).at[:, :d, :d].set(w4)
    return jnp.transpose(wp, (2, 0, 1)).reshape(dp, 4 * dp).astype(jnp.bfloat16)


def _pad_gate_vec(b, d, dp):
    """(4d,) bias -> (1, 4*dp) gate-blocked, zero-padded, f32."""
    bpd = jnp.zeros((4, dp), jnp.float32).at[:, :d].set(b.reshape(4, d))
    return bpd.reshape(1, 4 * dp)


def init_layer_params(key, dim):
    """PyTorch LSTM init U(-1/sqrt(H), 1/sqrt(H)); LN gamma=1, beta=0.
    Weights stored pre-transposed, zero-padded to 128-multiple lanes, bf16."""
    k = 1.0 / math.sqrt(dim)
    k1, k2, k3, k4 = jax.random.split(key, 4)
    w_ih = jax.random.uniform(k1, (4 * dim, dim), jnp.float32, -k, k)
    w_hh = jax.random.uniform(k2, (4 * dim, dim), jnp.float32, -k, k)
    b_ih = jax.random.uniform(k3, (4 * dim,), jnp.float32, -k, k)
    b_hh = jax.random.uniform(k4, (4 * dim,), jnp.float32, -k, k)
    dp = _round_up(dim, 128)
    wih_t = _pad_gate_mat(w_ih, dim, dp)
    whh_t = _pad_gate_mat(w_hh, dim, dp)
    bias = _pad_gate_vec(b_ih + b_hh, dim, dp)
    gamma = jnp.zeros((1, dp), jnp.float32).at[0, :dim].set(1.0)
    beta = jnp.zeros((1, dp), jnp.float32)
    return (wih_t, whh_t, bias, gamma, beta)


def init_listener_params(key, input_dim, listener_layer):
    params = []
    dim = 2 * input_dim
    keys = jax.random.split(key, listener_layer)
    for i in range(listener_layer):
        params.append(init_layer_params(keys[i], dim))
        if i + 1 < listener_layer:
            dim = 2 * dim
    return params


# --------------------------------------------------------------------------- glue
@jax.jit
def _listener_forward_padded(x, lens, params):
    """x: (T0, B, D_in) time-major zero-padded batch; lens: (B,) int32."""
    out = x
    for layer_params in params:                         # unrolled at trace time
        T, B, F = out.shape
        # Pyramidal time reduction, time-major: (T, B, F) -> (T//2, B, 2F).
        red = jnp.transpose(out.reshape(T // 2, 2, B, F), (0, 2, 1, 3))
        red = red.reshape(T // 2, B, 2 * F)
        lens = lens // 2
        out = plstm_layer(red, lens, layer_params)      # Pallas hot path (masks in-kernel)
    Tf, B, _ = out.shape
    t_idx = jax.lax.broadcasted_iota(jnp.int32, (B, Tf), 1)
    mask = (t_idx >= lens[:, None]).astype(jnp.float32)  # 0 = valid, 1 = padding
    return out, mask


def listener_forward(seqs, params):
    """seqs: list of (T_i, input_dim) float32, each T_i divisible by 2**num_layers.

    Returns (output_padded [T_final, B, D_final], mask [B, T_final]) matching
    Listener.forward in eval mode (dropout == identity)."""
    t_max = max(int(s.shape[0]) for s in seqs)
    x = jnp.stack([jnp.pad(s, ((0, t_max - s.shape[0]), (0, 0))) for s in seqs],
                  axis=1).astype(jnp.float32)             # (T_max, B, D_in) time-major
    lens = jnp.array([s.shape[0] for s in seqs], jnp.int32)
    return _listener_forward_padded(x, lens, params)


# --------------------------------------------------------------------------- pure-JAX reference
def _ref_layer(x, params):
    wih, whh, bias, gamma, beta = params
    dp = whh.shape[0]
    T, B, D = x.shape
    wi = wih.reshape(dp, 4, dp)[:D, :, :D].reshape(D, 4 * D)   # bf16
    wh = whh.reshape(dp, 4, dp)[:D, :, :D].reshape(D, 4 * D)   # bf16
    b = bias.reshape(4, dp)[:, :D].reshape(4 * D)
    g, be = gamma[0, :D], beta[0, :D]

    def step(carry, x_t):
        h, c = carry
        gates = (jnp.dot(x_t.astype(jnp.bfloat16), wi, preferred_element_type=jnp.float32)
                 + jnp.dot(h.astype(jnp.bfloat16), wh, preferred_element_type=jnp.float32)
                 + b)
        i_g = jax.nn.sigmoid(gates[:, :D])
        f_g = jax.nn.sigmoid(gates[:, D:2 * D])
        g_g = jnp.tanh(gates[:, 2 * D:3 * D])
        o_g = jax.nn.sigmoid(gates[:, 3 * D:])
        c = f_g * c + i_g * g_g
        h = o_g * jnp.tanh(c)
        z = h + x_t
        mu = jnp.mean(z, axis=-1, keepdims=True)
        var = jnp.mean((z - mu) ** 2, axis=-1, keepdims=True)
        y = (z - mu) * jax.lax.rsqrt(var + 1e-5) * g + be
        return (h, c), y

    init = (jnp.zeros((B, D), jnp.float32), jnp.zeros((B, D), jnp.float32))
    _, ys = jax.lax.scan(step, init, x)
    return ys


def _ref_forward(seqs, params):
    t_max = max(int(s.shape[0]) for s in seqs)
    x = jnp.stack([jnp.pad(s, ((0, t_max - s.shape[0]), (0, 0))) for s in seqs],
                  axis=1).astype(jnp.float32)
    lens = jnp.array([s.shape[0] for s in seqs], jnp.int32)
    out = x
    for layer_params in params:
        T, B, F = out.shape
        red = jnp.transpose(out.reshape(T // 2, 2, B, F), (0, 2, 1, 3)).reshape(T // 2, B, 2 * F)
        lens = lens // 2
        y = _ref_layer(red, layer_params)
        t_idx = jax.lax.broadcasted_iota(jnp.int32, (T // 2, B), 0)
        out = y * (t_idx < lens[None, :]).astype(y.dtype)[:, :, None]
    Tf, B, _ = out.shape
    t_idx = jax.lax.broadcasted_iota(jnp.int32, (B, Tf), 1)
    mask = (t_idx >= lens[:, None]).astype(jnp.float32)
    return out, mask


# --------------------------------------------------------------------------- main
if __name__ == "__main__":
    key = jax.random.PRNGKey(0)
    input_dim = 8
    listener_layer = 2

    # variable-length batch of 2 sequences; lengths divisible by 2**listener_layer
    k_in0, k_in1, k_par = jax.random.split(key, 3)
    seqs = [
        jax.random.normal(k_in0, (16, input_dim), jnp.float32),
        jax.random.normal(k_in1, (12, input_dim), jnp.float32),
    ]
    params = init_listener_params(k_par, input_dim, listener_layer)

    output_padded, mask = listener_forward(seqs, params)
    output_padded = jax.block_until_ready(output_padded)
    mask = jax.block_until_ready(mask)

    # layer0 dim = 16, layer1 dim = 32; final T = 16 / 4 = 4
    assert output_padded.shape == (4, 2, 4 * input_dim), output_padded.shape
    assert mask.shape == (2, 4), mask.shape

    # pure-JAX reference check (same bf16-operand / f32-accumulate matmul numerics)
    ref_out, ref_mask = _ref_forward(seqs, params)
    assert bool(jnp.allclose(mask, ref_mask)), "mask mismatch"
    assert bool(jnp.allclose(output_padded, ref_out, atol=5e-3, rtol=5e-3)), (
        "max abs err = %e" % float(jnp.max(jnp.abs(output_padded - ref_out))))

    print("KERNEL_OK")
</pallas_src>

<mosaic_0001>
module attributes {stable_mosaic.version = 11 : i64} {
  func.func @kernel(%arg0: i32, %arg1: memref<8x8x512xf32, #tpu.memory_space<vmem>>, %arg2: memref<8x8x128xf32, #tpu.memory_space<vmem>>, %arg3: memref<128x512xbf16, #tpu.memory_space<vmem>>, %arg4: memref<1x128xf32, #tpu.memory_space<vmem>>, %arg5: memref<1x128xf32, #tpu.memory_space<vmem>>, %arg6: memref<8x1xi32, #tpu.memory_space<vmem>>, %arg7: memref<8x8x128xf32, #tpu.memory_space<vmem>>, %arg8: memref<8x128xf32, #tpu.memory_space<vmem>>, %arg9: memref<8x128xf32, #tpu.memory_space<vmem>>) attributes {dimension_semantics = [#tpu.dimension_semantics<arbitrary>], iteration_bounds = array<i64: 1>, scalar_prefetch = 0 : i64, scratch_operands = 2 : i64, tpu.core_type = #tpu.core_type<tc>, window_params = [{transform_indices = @transform_0, window_bounds = array<i64: 8, 8, 512>}, {transform_indices = @transform_1, window_bounds = array<i64: 8, 8, 128>}, {pipeline_mode = #tpu.pipeline_mode<synchronous>, transform_indices = @transform_2, window_bounds = array<i64: 128, 512>}, {pipeline_mode = #tpu.pipeline_mode<synchronous>, transform_indices = @transform_3, window_bounds = array<i64: 1, 128>}, {pipeline_mode = #tpu.pipeline_mode<synchronous>, transform_indices = @transform_4, window_bounds = array<i64: 1, 128>}, {pipeline_mode = #tpu.pipeline_mode<synchronous>, transform_indices = @transform_5, window_bounds = array<i64: 8, 1>}, {transform_indices = @transform_6, window_bounds = array<i64: 8, 8, 128>}]} {
    %c0_i32 = arith.constant 0 : i32
    %0 = arith.cmpi eq, %arg0, %c0_i32 : i32
    %1 = arith.extui %0 : i1 to i32
    %c0_i32_0 = arith.constant 0 : i32
    %2 = arith.cmpi ne, %1, %c0_i32_0 : i32
    scf.if %2 {
      %cst_145 = arith.constant 0.000000e+00 : f32
      %572 = vector.broadcast %cst_145 : f32 to vector<8x128xf32>
      %c0_146 = arith.constant 0 : index
      %c0_147 = arith.constant 0 : index
      %573 = vector.load %arg8[%c0_146, %c0_147] : memref<8x128xf32, #tpu.memory_space<vmem>>, vector<8x128xf32>
      tpu.vector_store %arg8[%c0_146, %c0_147], %572 {strides = array<i32>} : memref<8x128xf32, #tpu.memory_space<vmem>>, vector<8x128xf32>,
      %cst_148 = arith.constant 0.000000e+00 : f32
      %574 = vector.broadcast %cst_148 : f32 to vector<8x128xf32>
      %c0_149 = arith.constant 0 : index
      %c0_150 = arith.constant 0 : index
      %575 = vector.load %arg9[%c0_149, %c0_150] : memref<8x128xf32, #tpu.memory_space<vmem>>, vector<8x128xf32>
      tpu.vector_store %arg9[%c0_149, %c0_150], %574 {strides = array<i32>} : memref<8x128xf32, #tpu.memory_space<vmem>>, vector<8x128xf32>,
    } else {
    }
    %c0 = arith.constant 0 : index
    %c0_1 = arith.constant 0 : index
    %3 = vector.load %arg3[%c0, %c0_1] : memref<128x512xbf16, #tpu.memory_space<vmem>>, vector<128x512xbf16>
    %c0_2 = arith.constant 0 : index
    %c0_3 = arith.constant 0 : index
    %4 = vector.load %arg4[%c0_2, %c0_3] : memref<1x128xf32, #tpu.memory_space<vmem>>, vector<1x128xf32>
    %c0_4 = arith.constant 0 : index
    %c0_5 = arith.constant 0 : index
    %5 = vector.load %arg5[%c0_4, %c0_5] : memref<1x128xf32, #tpu.memory_space<vmem>>, vector<1x128xf32>
    %c0_6 = arith.constant 0 : index
    %c0_7 = arith.constant 0 : index
    %6 = vector.load %arg6[%c0_6, %c0_7] : memref<8x1xi32, #tpu.memory_space<vmem>>, vector<8x1xi32>
    %c8_i32 = arith.constant 8 : i32
    %7 = arith.muli %arg0, %c8_i32 : i32
    %c0_8 = arith.constant 0 : index
    %c0_9 = arith.constant 0 : index
    %8 = vector.load %arg8[%c0_8, %c0_9] : memref<8x128xf32, #tpu.memory_space<vmem>>, vector<8x128xf32>
    %c0_10 = arith.constant 0 : index
    %c0_11 = arith.constant 0 : index
    %9 = vector.load %arg9[%c0_10, %c0_11] : memref<8x128xf32, #tpu.memory_space<vmem>>, vector<8x128xf32>
    %c0_i32_12 = arith.constant 0 : i32
    %10 = arith.index_cast %c0_i32_12 : i32 to index
    %c0_13 = arith.constant 0 : index
    %c0_14 = arith.constant 0 : index
    %11 = vector.load %arg1[%10, %c0_13, %c0_14] : memref<8x8x512xf32, #tpu.memory_space<vmem>>, vector<1x8x512xf32>
    %12 = vector.shape_cast %11 : vector<1x8x512xf32> to vector<8x512xf32>
    %13 = arith.truncf %8 : vector<8x128xf32> to vector<8x128xbf16>
    %cst = arith.constant dense<0.000000e+00> : vector<8x512xf32>
    %14 = tpu.matmul %13, %3, %cst {dimension_numbers = #tpu.dot_dimension_numbers<[1], [0], [0], [1], [0, 0, 1, 1], [], []>} : vector<8x128xbf16>, vector<128x512xbf16>, vector<8x512xf32> -> vector<8x512xf32>
    %15 = arith.addf %12, %14 : vector<8x512xf32>
    %16 = vector.extract_strided_slice %15 {offsets = [0, 0], sizes = [8, 128], strides = [1, 1]} : vector<8x512xf32> to vector<8x128xf32>
    %17 = arith.negf %16 : vector<8x128xf32>
    %18 = math.exp %17 : vector<8x128xf32>
    %cst_15 = arith.constant 1.000000e+00 : f32
    %19 = vector.broadcast %cst_15 : f32 to vector<8x128xf32>
    %20 = arith.addf %19, %18 : vector<8x128xf32>
    %21 = arith.divf %19, %20 : vector<8x128xf32>
    %22 = vector.extract_strided_slice %15 {offsets = [0, 128], sizes = [8, 128], strides = [1, 1]} : vector<8x512xf32> to vector<8x128xf32>
    %23 = arith.negf %22 : vector<8x128xf32>
    %24 = math.exp %23 : vector<8x128xf32>
    %cst_16 = arith.constant 1.000000e+00 : f32
    %25 = vector.broadcast %cst_16 : f32 to vector<8x128xf32>
    %26 = arith.addf %25, %24 : vector<8x128xf32>
    %27 = arith.divf %25, %26 : vector<8x128xf32>
    %28 = vector.extract_strided_slice %15 {offsets = [0, 256], sizes = [8, 128], strides = [1, 1]} : vector<8x512xf32> to vector<8x128xf32>
    %29 = math.tanh %28 : vector<8x128xf32>
    %30 = vector.extract_strided_slice %15 {offsets = [0, 384], sizes = [8, 128], strides = [1, 1]} : vector<8x512xf32> to vector<8x128xf32>
    %31 = arith.negf %30 : vector<8x128xf32>
    %32 = math.exp %31 : vector<8x128xf32>
    %cst_17 = arith.constant 1.000000e+00 : f32
    %33 = vector.broadcast %cst_17 : f32 to vector<8x128xf32>
    %34 = arith.addf %33, %32 : vector<8x128xf32>
    %35 = arith.divf %33, %34 : vector<8x128xf32>
    %36 = arith.mulf %27, %9 : vector<8x128xf32>
    %37 = arith.mulf %21, %29 : vector<8x128xf32>
    %38 = arith.addf %36, %37 : vector<8x128xf32>
    %39 = math.tanh %38 : vector<8x128xf32>
    %40 = arith.mulf %35, %39 : vector<8x128xf32>
    %41 = arith.index_cast %c0_i32_12 : i32 to index
    %c0_18 = arith.constant 0 : index
    %c0_19 = arith.constant 0 : index
    %42 = vector.load %arg2[%41, %c0_18, %c0_19] : memref<8x8x128xf32, #tpu.memory_space<vmem>>, vector<1x8x128xf32>
    %43 = vector.shape_cast %42 : vector<1x8x128xf32> to vector<8x128xf32>
    %44 = arith.addf %40, %43 : vector<8x128xf32>
    %cst_20 = arith.constant dense<0.000000e+00> : vector<8xf32>
    %45 = vector.multi_reduction <add>, %44, %cst_20 [1] : vector<8x128xf32> to vector<8xf32>
    %46 = vector.shape_cast %45 : vector<8xf32> to vector<8x1xf32>
    %cst_21 = arith.constant 6.250000e-02 : f32
    %47 = vector.broadcast %cst_21 : f32 to vector<8x1xf32>
    %48 = arith.mulf %46, %47 : vector<8x1xf32>
    %49 = vector.broadcast %48 : vector<8x1xf32> to vector<8x128xf32>
    %50 = arith.subf %44, %49 : vector<8x128xf32>
    %51 = arith.mulf %50, %50 : vector<8x128xf32>
    %cst_22 = arith.constant dense<0.000000e+00> : vector<8xf32>
    %52 = vector.multi_reduction <add>, %51, %cst_22 [1] : vector<8x128xf32> to vector<8xf32>
    %53 = vector.shape_cast %52 : vector<8xf32> to vector<8x1xf32>
    %cst_23 = arith.constant 1.120000e+02 : f32
    %54 = vector.broadcast %cst_23 : f32 to vector<8x1xf32>
    %55 = arith.mulf %54, %48 : vector<8x1xf32>
    %56 = arith.mulf %55, %48 : vector<8x1xf32>
    %57 = arith.subf %53, %56 : vector<8x1xf32>
    %cst_24 = arith.constant 6.250000e-02 : f32
    %58 = vector.broadcast %cst_24 : f32 to vector<8x1xf32>
    %59 = arith.mulf %57, %58 : vector<8x1xf32>
    %cst_25 = arith.constant 9.99999974E-6 : f32
    %60 = vector.broadcast %cst_25 : f32 to vector<8x1xf32>
    %61 = arith.addf %59, %60 : vector<8x1xf32>
    %62 = math.rsqrt %61 : vector<8x1xf32>
    %63 = vector.broadcast %62 : vector<8x1xf32> to vector<8x128xf32>
    %64 = vector.broadcast %4 : vector<1x128xf32> to vector<8x128xf32>
    %65 = arith.mulf %63, %64 : vector<8x128xf32>
    %66 = arith.addi %7, %c0_i32_12 : i32
    %67 = vector.broadcast %66 : i32 to vector<8x1xi32>
    %68 = arith.cmpi slt, %67, %6 : vector<8x1xi32>
    %69 = arith.extui %68 : vector<8x1xi1> to vector<8x1xi32>
    %70 = arith.sitofp %69 : vector<8x1xi32> to vector<8x1xf32>
    %71 = arith.mulf %50, %65 : vector<8x128xf32>
    %72 = vector.broadcast %5 : vector<1x128xf32> to vector<8x128xf32>
    %73 = arith.addf %71, %72 : vector<8x128xf32>
    %74 = vector.broadcast %70 : vector<8x1xf32> to vector<8x128xf32>
    %75 = arith.mulf %73, %74 : vector<8x128xf32>
    %76 = arith.index_cast %c0_i32_12 : i32 to index
    %c0_26 = arith.constant 0 : index
    %c0_27 = arith.constant 0 : index
    %77 = vector.load %arg7[%76, %c0_26, %c0_27] : memref<8x8x128xf32, #tpu.memory_space<vmem>>, vector<1x8x128xf32>
    %78 = vector.shape_cast %77 : vector<1x8x128xf32> to vector<8x128xf32>
    %79 = vector.shape_cast %75 : vector<8x128xf32> to vector<1x8x128xf32>
    tpu.vector_store %arg7[%76, %c0_26, %c0_27], %79 {strides = array<i32>} : memref<8x8x128xf32, #tpu.memory_space<vmem>>, vector<1x8x128xf32>,
    %c1_i32 = arith.constant 1 : i32
    %80 = arith.index_cast %c1_i32 : i32 to index
    %c0_28 = arith.constant 0 : index
    %c0_29 = arith.constant 0 : index
    %81 = vector.load %arg1[%80, %c0_28, %c0_29] : memref<8x8x512xf32, #tpu.memory_space<vmem>>, vector<1x8x512xf32>
    %82 = vector.shape_cast %81 : vector<1x8x512xf32> to vector<8x512xf32>
    %83 = arith.truncf %40 : vector<8x128xf32> to vector<8x128xbf16>
    %cst_30 = arith.constant dense<0.000000e+00> : vector<8x512xf32>
    %84 = tpu.matmul %83, %3, %cst_30 {dimension_numbers = #tpu.dot_dimension_numbers<[1], [0], [0], [1], [0, 0, 1, 1], [], []>} : vector<8x128xbf16>, vector<128x512xbf16>, vector<8x512xf32> -> vector<8x512xf32>
    %85 = arith.addf %82, %84 : vector<8x512xf32>
    %86 = vector.extract_strided_slice %85 {offsets = [0, 0], sizes = [8, 128], strides = [1, 1]} : vector<8x512xf32> to vector<8x128xf32>
    %87 = arith.negf %86 : vector<8x128xf32>
    %88 = math.exp %87 : vector<8x128xf32>
    %cst_31 = arith.constant 1.000000e+00 : f32
    %89 = vector.broadcast %cst_31 : f32 to vector<8x128xf32>
    %90 = arith.addf %89, %88 : vector<8x128xf32>
    %91 = arith.divf %89, %90 : vector<8x128xf32>
    %92 = vector.extract_strided_slice %85 {offsets = [0, 128], sizes = [8, 128], strides = [1, 1]} : vector<8x512xf32> to vector<8x128xf32>
    %93 = arith.negf %92 : vector<8x128xf32>
    %94 = math.exp %93 : vector<8x128xf32>
    %cst_32 = arith.constant 1.000000e+00 : f32
    %95 = vector.broadcast %cst_32 : f32 to vector<8x128xf32>
    %96 = arith.addf %95, %94 : vector<8x128xf32>
    %97 = arith.divf %95, %96 : vector<8x128xf32>
    %98 = vector.extract_strided_slice %85 {offsets = [0, 256], sizes = [8, 128], strides = [1, 1]} : vector<8x512xf32> to vector<8x128xf32>
    %99 = math.tanh %98 : vector<8x128xf32>
    %100 = vector.extract_strided_slice %85 {offsets = [0, 384], sizes = [8, 128], strides = [1, 1]} : vector<8x512xf32> to vector<8x128xf32>
    %101 = arith.negf %100 : vector<8x128xf32>
    %102 = math.exp %101 : vector<8x128xf32>
    %cst_33 = arith.constant 1.000000e+00 : f32
    %103 = vector.broadcast %cst_33 : f32 to vector<8x128xf32>
    %104 = arith.addf %103, %102 : vector<8x128xf32>
    %105 = arith.divf %103, %104 : vector<8x128xf32>
    %106 = arith.mulf %97, %38 : vector<8x128xf32>
    %107 = arith.mulf %91, %99 : vector<8x128xf32>
    %108 = arith.addf %106, %107 : vector<8x128xf32>
    %109 = math.tanh %108 : vector<8x128xf32>
    %110 = arith.mulf %105, %109 : vector<8x128xf32>
    %111 = arith.index_cast %c1_i32 : i32 to index
    %c0_34 = arith.constant 0 : index
    %c0_35 = arith.constant 0 : index
    %112 = vector.load %arg2[%111, %c0_34, %c0_35] : memref<8x8x128xf32, #tpu.memory_space<vmem>>, vector<1x8x128xf32>
    %113 = vector.shape_cast %112 : vector<1x8x128xf32> to vector<8x128xf32>
    %114 = arith.addf %110, %113 : vector<8x128xf32>
    %cst_36 = arith.constant dense<0.000000e+00> : vector<8xf32>
    %115 = vector.multi_reduction <add>, %114, %cst_36 [1] : vector<8x128xf32> to vector<8xf32>
    %116 = vector.shape_cast %115 : vector<8xf32> to vector<8x1xf32>
    %cst_37 = arith.constant 6.250000e-02 : f32
    %117 = vector.broadcast %cst_37 : f32 to vector<8x1xf32>
    %118 = arith.mulf %116, %117 : vector<8x1xf32>
    %119 = vector.broadcast %118 : vector<8x1xf32> to vector<8x128xf32>
    %120 = arith.subf %114, %119 : vector<8x128xf32>
    %121 = arith.mulf %120, %120 : vector<8x128xf32>
    %cst_38 = arith.constant dense<0.000000e+00> : vector<8xf32>
    %122 = vector.multi_reduction <add>, %121, %cst_38 [1] : vector<8x128xf32> to vector<8xf32>
    %123 = vector.shape_cast %122 : vector<8xf32> to vector<8x1xf32>
    %cst_39 = arith.constant 1.120000e+02 : f32
    %124 = vector.broadcast %cst_39 : f32 to vector<8x1xf32>
    %125 = arith.mulf %124, %118 : vector<8x1xf32>
    %126 = arith.mulf %125, %118 : vector<8x1xf32>
    %127 = arith.subf %123, %126 : vector<8x1xf32>
    %cst_40 = arith.constant 6.250000e-02 : f32
    %128 = vector.broadcast %cst_40 : f32 to vector<8x1xf32>
    %129 = arith.mulf %127, %128 : vector<8x1xf32>
    %cst_41 = arith.constant 9.99999974E-6 : f32
    %130 = vector.broadcast %cst_41 : f32 to vector<8x1xf32>
    %131 = arith.addf %129, %130 : vector<8x1xf32>
    %132 = math.rsqrt %131 : vector<8x1xf32>
    %133 = vector.broadcast %132 : vector<8x1xf32> to vector<8x128xf32>
    %134 = vector.broadcast %4 : vector<1x128xf32> to vector<8x128xf32>
    %135 = arith.mulf %133, %134 : vector<8x128xf32>
    %136 = arith.addi %7, %c1_i32 : i32
    %137 = vector.broadcast %136 : i32 to vector<8x1xi32>
    %138 = arith.cmpi slt, %137, %6 : vector<8x1xi32>
    %139 = arith.extui %138 : vector<8x1xi1> to vector<8x1xi32>
    %140 = arith.sitofp %139 : vector<8x1xi32> to vector<8x1xf32>
    %141 = arith.mulf %120, %135 : vector<8x128xf32>
    %142 = vector.broadcast %5 : vector<1x128xf32> to vector<8x128xf32>
    %143 = arith.addf %141, %142 : vector<8x128xf32>
    %144 = vector.broadcast %140 : vector<8x1xf32> to vector<8x128xf32>
    %145 = arith.mulf %143, %144 : vector<8x128xf32>
    %146 = arith.index_cast %c1_i32 : i32 to index
    %c0_42 = arith.constant 0 : index
    %c0_43 = arith.constant 0 : index
    %147 = vector.load %arg7[%146, %c0_42, %c0_43] : memref<8x8x128xf32, #tpu.memory_space<vmem>>, vector<1x8x128xf32>
    %148 = vector.shape_cast %147 : vector<1x8x128xf32> to vector<8x128xf32>
    %149 = vector.shape_cast %145 : vector<8x128xf32> to vector<1x8x128xf32>
    tpu.vector_store %arg7[%146, %c0_42, %c0_43], %149 {strides = array<i32>} : memref<8x8x128xf32, #tpu.memory_space<vmem>>, vector<1x8x128xf32>,
    %c2_i32 = arith.constant 2 : i32
    %150 = arith.index_cast %c2_i32 : i32 to index
    %c0_44 = arith.constant 0 : index
    %c0_45 = arith.constant 0 : index
    %151 = vector.load %arg1[%150, %c0_44, %c0_45] : memref<8x8x512xf32, #tpu.memory_space<vmem>>, vector<1x8x512xf32>
    %152 = vector.shape_cast %151 : vector<1x8x512xf32> to vector<8x512xf32>
    %153 = arith.truncf %110 : vector<8x128xf32> to vector<8x128xbf16>
    %cst_46 = arith.constant dense<0.000000e+00> : vector<8x512xf32>
    %154 = tpu.matmul %153, %3, %cst_46 {dimension_numbers = #tpu.dot_dimension_numbers<[1], [0], [0], [1], [0, 0, 1, 1], [], []>} : vector<8x128xbf16>, vector<128x512xbf16>, vector<8x512xf32> -> vector<8x512xf32>
    %155 = arith.addf %152, %154 : vector<8x512xf32>
    %156 = vector.extract_strided_slice %155 {offsets = [0, 0], sizes = [8, 128], strides = [1, 1]} : vector<8x512xf32> to vector<8x128xf32>
    %157 = arith.negf %156 : vector<8x128xf32>
    %158 = math.exp %157 : vector<8x128xf32>
    %cst_47 = arith.constant 1.000000e+00 : f32
    %159 = vector.broadcast %cst_47 : f32 to vector<8x128xf32>
    %160 = arith.addf %159, %158 : vector<8x128xf32>
    %161 = arith.divf %159, %160 : vector<8x128xf32>
    %162 = vector.extract_strided_slice %155 {offsets = [0, 128], sizes = [8, 128], strides = [1, 1]} : vector<8x512xf32> to vector<8x128xf32>
    %163 = arith.negf %162 : vector<8x128xf32>
    %164 = math.exp %163 : vector<8x128xf32>
    %cst_48 = arith.constant 1.000000e+00 : f32
    %165 = vector.broadcast %cst_48 : f32 to vector<8x128xf32>
    %166 = arith.addf %165, %164 : vector<8x128xf32>
    %167 = arith.divf %165, %166 : vector<8x128xf32>
    %168 = vector.extract_strided_slice %155 {offsets = [0, 256], sizes = [8, 128], strides = [1, 1]} : vector<8x512xf32> to vector<8x128xf32>
    %169 = math.tanh %168 : vector<8x128xf32>
    %170 = vector.extract_strided_slice %155 {offsets = [0, 384], sizes = [8, 128], strides = [1, 1]} : vector<8x512xf32> to vector<8x128xf32>
    %171 = arith.negf %170 : vector<8x128xf32>
    %172 = math.exp %171 : vector<8x128xf32>
    %cst_49 = arith.constant 1.000000e+00 : f32
    %173 = vector.broadcast %cst_49 : f32 to vector<8x128xf32>
    %174 = arith.addf %173, %172 : vector<8x128xf32>
    %175 = arith.divf %173, %174 : vector<8x128xf32>
    %176 = arith.mulf %167, %108 : vector<8x128xf32>
    %177 = arith.mulf %161, %169 : vector<8x128xf32>
    %178 = arith.addf %176, %177 : vector<8x128xf32>
    %179 = math.tanh %178 : vector<8x128xf32>
    %180 = arith.mulf %175, %179 : vector<8x128xf32>
    %181 = arith.index_cast %c2_i32 : i32 to index
    %c0_50 = arith.constant 0 : index
    %c0_51 = arith.constant 0 : index
    %182 = vector.load %arg2[%181, %c0_50, %c0_51] : memref<8x8x128xf32, #tpu.memory_space<vmem>>, vector<1x8x128xf32>
    %183 = vector.shape_cast %182 : vector<1x8x128xf32> to vector<8x128xf32>
    %184 = arith.addf %180, %183 : vector<8x128xf32>
    %cst_52 = arith.constant dense<0.000000e+00> : vector<8xf32>
    %185 = vector.multi_reduction <add>, %184, %cst_52 [1] : vector<8x128xf32> to vector<8xf32>
    %186 = vector.shape_cast %185 : vector<8xf32> to vector<8x1xf32>
    %cst_53 = arith.constant 6.250000e-02 : f32
    %187 = vector.broadcast %cst_53 : f32 to vector<8x1xf32>
    %188 = arith.mulf %186, %187 : vector<8x1xf32>
    %189 = vector.broadcast %188 : vector<8x1xf32> to vector<8x128xf32>
    %190 = arith.subf %184, %189 : vector<8x128xf32>
    %191 = arith.mulf %190, %190 : vector<8x128xf32>
    %cst_54 = arith.constant dense<0.000000e+00> : vector<8xf32>
    %192 = vector.multi_reduction <add>, %191, %cst_54 [1] : vector<8x128xf32> to vector<8xf32>
    %193 = vector.shape_cast %192 : vector<8xf32> to vector<8x1xf32>
    %cst_55 = arith.constant 1.120000e+02 : f32
    %194 = vector.broadcast %cst_55 : f32 to vector<8x1xf32>
    %195 = arith.mulf %194, %188 : vector<8x1xf32>
    %196 = arith.mulf %195, %188 : vector<8x1xf32>
    %197 = arith.subf %193, %196 : vector<8x1xf32>
    %cst_56 = arith.constant 6.250000e-02 : f32
    %198 = vector.broadcast %cst_56 : f32 to vector<8x1xf32>
    %199 = arith.mulf %197, %198 : vector<8x1xf32>
    %cst_57 = arith.constant 9.99999974E-6 : f32
    %200 = vector.broadcast %cst_57 : f32 to vector<8x1xf32>
    %201 = arith.addf %199, %200 : vector<8x1xf32>
    %202 = math.rsqrt %201 : vector<8x1xf32>
    %203 = vector.broadcast %202 : vector<8x1xf32> to vector<8x128xf32>
    %204 = vector.broadcast %4 : vector<1x128xf32> to vector<8x128xf32>
    %205 = arith.mulf %203, %204 : vector<8x128xf32>
    %206 = arith.addi %7, %c2_i32 : i32
    %207 = vector.broadcast %206 : i32 to vector<8x1xi32>
    %208 = arith.cmpi slt, %207, %6 : vector<8x1xi32>
    %209 = arith.extui %208 : vector<8x1xi1> to vector<8x1xi32>
    %210 = arith.sitofp %209 : vector<8x1xi32> to vector<8x1xf32>
    %211 = arith.mulf %190, %205 : vector<8x128xf32>
    %212 = vector.broadcast %5 : vector<1x128xf32> to vector<8x128xf32>
    %213 = arith.addf %211, %212 : vector<8x128xf32>
    %214 = vector.broadcast %210 : vector<8x1xf32> to vector<8x128xf32>
    %215 = arith.mulf %213, %214 : vector<8x128xf32>
    %216 = arith.index_cast %c2_i32 : i32 to index
    %c0_58 = arith.constant 0 : index
    %c0_59 = arith.constant 0 : index
    %217 = vector.load %arg7[%216, %c0_58, %c0_59] : memref<8x8x128xf32, #tpu.memory_space<vmem>>, vector<1x8x128xf32>
    %218 = vector.shape_cast %217 : vector<1x8x128xf32> to vector<8x128xf32>
    %219 = vector.shape_cast %215 : vector<8x128xf32> to vector<1x8x128xf32>
    tpu.vector_store %arg7[%216, %c0_58, %c0_59], %219 {strides = array<i32>} : memref<8x8x128xf32, #tpu.memory_space<vmem>>, vector<1x8x128xf32>,
    %c3_i32 = arith.constant 3 : i32
    %220 = arith.index_cast %c3_i32 : i32 to index
    %c0_60 = arith.constant 0 : index
    %c0_61 = arith.constant 0 : index
    %221 = vector.load %arg1[%220, %c0_60, %c0_61] : memref<8x8x512xf32, #tpu.memory_space<vmem>>, vector<1x8x512xf32>
    %222 = vector.shape_cast %221 : vector<1x8x512xf32> to vector<8x512xf32>
    %223 = arith.truncf %180 : vector<8x128xf32> to vector<8x128xbf16>
    %cst_62 = arith.constant dense<0.000000e+00> : vector<8x512xf32>
    %224 = tpu.matmul %223, %3, %cst_62 {dimension_numbers = #tpu.dot_dimension_numbers<[1], [0], [0], [1], [0, 0, 1, 1], [], []>} : vector<8x128xbf16>, vector<128x512xbf16>, vector<8x512xf32> -> vector<8x512xf32>
    %225 = arith.addf %222, %224 : vector<8x512xf32>
    %226 = vector.extract_strided_slice %225 {offsets = [0, 0], sizes = [8, 128], strides = [1, 1]} : vector<8x512xf32> to vector<8x128xf32>
    %227 = arith.negf %226 : vector<8x128xf32>
    %228 = math.exp %227 : vector<8x128xf32>
    %cst_63 = arith.constant 1.000000e+00 : f32
    %229 = vector.broadcast %cst_63 : f32 to vector<8x128xf32>
    %230 = arith.addf %229, %228 : vector<8x128xf32>
    %231 = arith.divf %229, %230 : vector<8x128xf32>
    %232 = vector.extract_strided_slice %225 {offsets = [0, 128], sizes = [8, 128], strides = [1, 1]} : vector<8x512xf32> to vector<8x128xf32>
    %233 = arith.negf %232 : vector<8x128xf32>
    %234 = math.exp %233 : vector<8x128xf32>
    %cst_64 = arith.constant 1.000000e+00 : f32
    %235 = vector.broadcast %cst_64 : f32 to vector<8x128xf32>
    %236 = arith.addf %235, %234 : vector<8x128xf32>
    %237 = arith.divf %235, %236 : vector<8x128xf32>
    %238 = vector.extract_strided_slice %225 {offsets = [0, 256], sizes = [8, 128], strides = [1, 1]} : vector<8x512xf32> to vector<8x128xf32>
    %239 = math.tanh %238 : vector<8x128xf32>
    %240 = vector.extract_strided_slice %225 {offsets = [0, 384], sizes = [8, 128], strides = [1, 1]} : vector<8x512xf32> to vector<8x128xf32>
    %241 = arith.negf %240 : vector<8x128xf32>
    %242 = math.exp %241 : vector<8x128xf32>
    %cst_65 = arith.constant 1.000000e+00 : f32
    %243 = vector.broadcast %cst_65 : f32 to vector<8x128xf32>
    %244 = arith.addf %243, %242 : vector<8x128xf32>
    %245 = arith.divf %243, %244 : vector<8x128xf32>
    %246 = arith.mulf %237, %178 : vector<8x128xf32>
    %247 = arith.mulf %231, %239 : vector<8x128xf32>
    %248 = arith.addf %246, %247 : vector<8x128xf32>
    %249 = math.tanh %248 : vector<8x128xf32>
    %250 = arith.mulf %245, %249 : vector<8x128xf32>
    %251 = arith.index_cast %c3_i32 : i32 to index
    %c0_66 = arith.constant 0 : index
    %c0_67 = arith.constant 0 : index
    %252 = vector.load %arg2[%251, %c0_66, %c0_67] : memref<8x8x128xf32, #tpu.memory_space<vmem>>, vector<1x8x128xf32>
    %253 = vector.shape_cast %252 : vector<1x8x128xf32> to vector<8x128xf32>
    %254 = arith.addf %250, %253 : vector<8x128xf32>
    %cst_68 = arith.constant dense<0.000000e+00> : vector<8xf32>
    %255 = vector.multi_reduction <add>, %254, %cst_68 [1] : vector<8x128xf32> to vector<8xf32>
    %256 = vector.shape_cast %255 : vector<8xf32> to vector<8x1xf32>
    %cst_69 = arith.constant 6.250000e-02 : f32
    %257 = vector.broadcast %cst_69 : f32 to vector<8x1xf32>
    %258 = arith.mulf %256, %257 : vector<8x1xf32>
    %259 = vector.broadcast %258 : vector<8x1xf32> to vector<8x128xf32>
    %260 = arith.subf %254, %259 : vector<8x128xf32>
    %261 = arith.mulf %260, %260 : vector<8x128xf32>
    %cst_70 = arith.constant dense<0.000000e+00> : vector<8xf32>
    %262 = vector.multi_reduction <add>, %261, %cst_70 [1] : vector<8x128xf32> to vector<8xf32>
    %263 = vector.shape_cast %262 : vector<8xf32> to vector<8x1xf32>
    %cst_71 = arith.constant 1.120000e+02 : f32
    %264 = vector.broadcast %cst_71 : f32 to vector<8x1xf32>
    %265 = arith.mulf %264, %258 : vector<8x1xf32>
    %266 = arith.mulf %265, %258 : vector<8x1xf32>
    %267 = arith.subf %263, %266 : vector<8x1xf32>
    %cst_72 = arith.constant 6.250000e-02 : f32
    %268 = vector.broadcast %cst_72 : f32 to vector<8x1xf32>
    %269 = arith.mulf %267, %268 : vector<8x1xf32>
    %cst_73 = arith.constant 9.99999974E-6 : f32
    %270 = vector.broadcast %cst_73 : f32 to vector<8x1xf32>
    %271 = arith.addf %269, %270 : vector<8x1xf32>
    %272 = math.rsqrt %271 : vector<8x1xf32>
    %273 = vector.broadcast %272 : vector<8x1xf32> to vector<8x128xf32>
    %274 = vector.broadcast %4 : vector<1x128xf32> to vector<8x128xf32>
    %275 = arith.mulf %273, %274 : vector<8x128xf32>
    %276 = arith.addi %7, %c3_i32 : i32
    %277 = vector.broadcast %276 : i32 to vector<8x1xi32>
    %278 = arith.cmpi slt, %277, %6 : vector<8x1xi32>
    %279 = arith.extui %278 : vector<8x1xi1> to vector<8x1xi32>
    %280 = arith.sitofp %279 : vector<8x1xi32> to vector<8x1xf32>
    %281 = arith.mulf %260, %275 : vector<8x128xf32>
    %282 = vector.broadcast %5 : vector<1x128xf32> to vector<8x128xf32>
    %283 = arith.addf %281, %282 : vector<8x128xf32>
    %284 = vector.broadcast %280 : vector<8x1xf32> to vector<8x128xf32>
    %285 = arith.mulf %283, %284 : vector<8x128xf32>
    %286 = arith.index_cast %c3_i32 : i32 to index
    %c0_74 = arith.constant 0 : index
    %c0_75 = arith.constant 0 : index
    %287 = vector.load %arg7[%286, %c0_74, %c0_75] : memref<8x8x128xf32, #tpu.memory_space<vmem>>, vector<1x8x128xf32>
    %288 = vector.shape_cast %287 : vector<1x8x128xf32> to vector<8x128xf32>
    %289 = vector.shape_cast %285 : vector<8x128xf32> to vector<1x8x128xf32>
    tpu.vector_store %arg7[%286, %c0_74, %c0_75], %289 {strides = array<i32>} : memref<8x8x128xf32, #tpu.memory_space<vmem>>, vector<1x8x128xf32>,
    %c4_i32 = arith.constant 4 : i32
    %290 = arith.index_cast %c4_i32 : i32 to index
    %c0_76 = arith.constant 0 : index
    %c0_77 = arith.constant 0 : index
    %291 = vector.load %arg1[%290, %c0_76, %c0_77] : memref<8x8x512xf32, #tpu.memory_space<vmem>>, vector<1x8x512xf32>
    %292 = vector.shape_cast %291 : vector<1x8x512xf32> to vector<8x512xf32>
    %293 = arith.truncf %250 : vector<8x128xf32> to vector<8x128xbf16>
    %cst_78 = arith.constant dense<0.000000e+00> : vector<8x512xf32>
    %294 = tpu.matmul %293, %3, %cst_78 {dimension_numbers = #tpu.dot_dimension_numbers<[1], [0], [0], [1], [0, 0, 1, 1], [], []>} : vector<8x128xbf16>, vector<128x512xbf16>, vector<8x512xf32> -> vector<8x512xf32>
    %295 = arith.addf %292, %294 : vector<8x512xf32>
    %296 = vector.extract_strided_slice %295 {offsets = [0, 0], sizes = [8, 128], strides = [1, 1]} : vector<8x512xf32> to vector<8x128xf32>
    %297 = arith.negf %296 : vector<8x128xf32>
    %298 = math.exp %297 : vector<8x128xf32>
    %cst_79 = arith.constant 1.000000e+00 : f32
    %299 = vector.broadcast %cst_79 : f32 to vector<8x128xf32>
    %300 = arith.addf %299, %298 : vector<8x128xf32>
    %301 = arith.divf %299, %300 : vector<8x128xf32>
    %302 = vector.extract_strided_slice %295 {offsets = [0, 128], sizes = [8, 128], strides = [1, 1]} : vector<8x512xf32> to vector<8x128xf32>
    %303 = arith.negf %302 : vector<8x128xf32>
    %304 = math.exp %303 : vector<8x128xf32>
    %cst_80 = arith.constant 1.000000e+00 : f32
    %305 = vector.broadcast %cst_80 : f32 to vector<8x128xf32>
    %306 = arith.addf %305, %304 : vector<8x128xf32>
    %307 = arith.divf %305, %306 : vector<8x128xf32>
    %308 = vector.extract_strided_slice %295 {offsets = [0, 256], sizes = [8, 128], strides = [1, 1]} : vector<8x512xf32> to vector<8x128xf32>
    %309 = math.tanh %308 : vector<8x128xf32>
    %310 = vector.extract_strided_slice %295 {offsets = [0, 384], sizes = [8, 128], strides = [1, 1]} : vector<8x512xf32> to vector<8x128xf32>
    %311 = arith.negf %310 : vector<8x128xf32>
    %312 = math.exp %311 : vector<8x128xf32>
    %cst_81 = arith.constant 1.000000e+00 : f32
    %313 = vector.broadcast %cst_81 : f32 to vector<8x128xf32>
    %314 = arith.addf %313, %312 : vector<8x128xf32>
    %315 = arith.divf %313, %314 : vector<8x128xf32>
    %316 = arith.mulf %307, %248 : vector<8x128xf32>
    %317 = arith.mulf %301, %309 : vector<8x128xf32>
    %318 = arith.addf %316, %317 : vector<8x128xf32>
    %319 = math.tanh %318 : vector<8x128xf32>
    %320 = arith.mulf %315, %319 : vector<8x128xf32>
    %321 = arith.index_cast %c4_i32 : i32 to index
    %c0_82 = arith.constant 0 : index
    %c0_83 = arith.constant 0 : index
    %322 = vector.load %arg2[%321, %c0_82, %c0_83] : memref<8x8x128xf32, #tpu.memory_space<vmem>>, vector<1x8x128xf32>
    %323 = vector.shape_cast %322 : vector<1x8x128xf32> to vector<8x128xf32>
    %324 = arith.addf %320, %323 : vector<8x128xf32>
    %cst_84 = arith.constant dense<0.000000e+00> : vector<8xf32>
    %325 = vector.multi_reduction <add>, %324, %cst_84 [1] : vector<8x128xf32> to vector<8xf32>
    %326 = vector.shape_cast %325 : vector<8xf32> to vector<8x1xf32>
    %cst_85 = arith.constant 6.250000e-02 : f32
    %327 = vector.broadcast %cst_85 : f32 to vector<8x1xf32>
    %328 = arith.mulf %326, %327 : vector<8x1xf32>
    %329 = vector.broadcast %328 : vector<8x1xf32> to vector<8x128xf32>
    %330 = arith.subf %324, %329 : vector<8x128xf32>
    %331 = arith.mulf %330, %330 : vector<8x128xf32>
    %cst_86 = arith.constant dense<0.000000e+00> : vector<8xf32>
    %332 = vector.multi_reduction <add>, %331, %cst_86 [1] : vector<8x128xf32> to vector<8xf32>
    %333 = vector.shape_cast %332 : vector<8xf32> to vector<8x1xf32>
    %cst_87 = arith.constant 1.120000e+02 : f32
    %334 = vector.broadcast %cst_87 : f32 to vector<8x1xf32>
    %335 = arith.mulf %334, %328 : vector<8x1xf32>
    %336 = arith.mulf %335, %328 : vector<8x1xf32>
    %337 = arith.subf %333, %336 : vector<8x1xf32>
    %cst_88 = arith.constant 6.250000e-02 : f32
    %338 = vector.broadcast %cst_88 : f32 to vector<8x1xf32>
    %339 = arith.mulf %337, %338 : vector<8x1xf32>
    %cst_89 = arith.constant 9.99999974E-6 : f32
    %340 = vector.broadcast %cst_89 : f32 to vector<8x1xf32>
    %341 = arith.addf %339, %340 : vector<8x1xf32>
    %342 = math.rsqrt %341 : vector<8x1xf32>
    %343 = vector.broadcast %342 : vector<8x1xf32> to vector<8x128xf32>
    %344 = vector.broadcast %4 : vector<1x128xf32> to vector<8x128xf32>
    %345 = arith.mulf %343, %344 : vector<8x128xf32>
    %346 = arith.addi %7, %c4_i32 : i32
    %347 = vector.broadcast %346 : i32 to vector<8x1xi32>
    %348 = arith.cmpi slt, %347, %6 : vector<8x1xi32>
    %349 = arith.extui %348 : vector<8x1xi1> to vector<8x1xi32>
    %350 = arith.sitofp %349 : vector<8x1xi32> to vector<8x1xf32>
    %351 = arith.mulf %330, %345 : vector<8x128xf32>
    %352 = vector.broadcast %5 : vector<1x128xf32> to vector<8x128xf32>
    %353 = arith.addf %351, %352 : vector<8x128xf32>
    %354 = vector.broadcast %350 : vector<8x1xf32> to vector<8x128xf32>
    %355 = arith.mulf %353, %354 : vector<8x128xf32>
    %356 = arith.index_cast %c4_i32 : i32 to index
    %c0_90 = arith.constant 0 : index
    %c0_91 = arith.constant 0 : index
    %357 = vector.load %arg7[%356, %c0_90, %c0_91] : memref<8x8x128xf32, #tpu.memory_space<vmem>>, vector<1x8x128xf32>
    %358 = vector.shape_cast %357 : vector<1x8x128xf32> to vector<8x128xf32>
    %359 = vector.shape_cast %355 : vector<8x128xf32> to vector<1x8x128xf32>
    tpu.vector_store %arg7[%356, %c0_90, %c0_91], %359 {strides = array<i32>} : memref<8x8x128xf32, #tpu.memory_space<vmem>>, vector<1x8x128xf32>,
    %c5_i32 = arith.constant 5 : i32
    %360 = arith.index_cast %c5_i32 : i32 to index
    %c0_92 = arith.constant 0 : index
    %c0_93 = arith.constant 0 : index
    %361 = vector.load %arg1[%360, %c0_92, %c0_93] : memref<8x8x512xf32, #tpu.memory_space<vmem>>, vector<1x8x512xf32>
    %362 = vector.shape_cast %361 : vector<1x8x512xf32> to vector<8x512xf32>
    %363 = arith.truncf %320 : vector<8x128xf32> to vector<8x128xbf16>
    %cst_94 = arith.constant dense<0.000000e+00> : vector<8x512xf32>
    %364 = tpu.matmul %363, %3, %cst_94 {dimension_numbers = #tpu.dot_dimension_numbers<[1], [0], [0], [1], [0, 0, 1, 1], [], []>} : vector<8x128xbf16>, vector<128x512xbf16>, vector<8x512xf32> -> vector<8x512xf32>
    %365 = arith.addf %362, %364 : vector<8x512xf32>
    %366 = vector.extract_strided_slice %365 {offsets = [0, 0], sizes = [8, 128], strides = [1, 1]} : vector<8x512xf32> to vector<8x128xf32>
    %367 = arith.negf %366 : vector<8x128xf32>
    %368 = math.exp %367 : vector<8x128xf32>
    %cst_95 = arith.constant 1.000000e+00 : f32
    %369 = vector.broadcast %cst_95 : f32 to vector<8x128xf32>
    %370 = arith.addf %369, %368 : vector<8x128xf32>
    %371 = arith.divf %369, %370 : vector<8x128xf32>
    %372 = vector.extract_strided_slice %365 {offsets = [0, 128], sizes = [8, 128], strides = [1, 1]} : vector<8x512xf32> to vector<8x128xf32>
    %373 = arith.negf %372 : vector<8x128xf32>
    %374 = math.exp %373 : vector<8x128xf32>
    %cst_96 = arith.constant 1.000000e+00 : f32
    %375 = vector.broadcast %cst_96 : f32 to vector<8x128xf32>
    %376 = arith.addf %375, %374 : vector<8x128xf32>
    %377 = arith.divf %375, %376 : vector<8x128xf32>
    %378 = vector.extract_strided_slice %365 {offsets = [0, 256], sizes = [8, 128], strides = [1, 1]} : vector<8x512xf32> to vector<8x128xf32>
    %379 = math.tanh %378 : vector<8x128xf32>
    %380 = vector.extract_strided_slice %365 {offsets = [0, 384], sizes = [8, 128], strides = [1, 1]} : vector<8x512xf32> to vector<8x128xf32>
    %381 = arith.negf %380 : vector<8x128xf32>
    %382 = math.exp %381 : vector<8x128xf32>
    %cst_97 = arith.constant 1.000000e+00 : f32
    %383 = vector.broadcast %cst_97 : f32 to vector<8x128xf32>
    %384 = arith.addf %383, %382 : vector<8x128xf32>
    %385 = arith.divf %383, %384 : vector<8x128xf32>
    %386 = arith.mulf %377, %318 : vector<8x128xf32>
    %387 = arith.mulf %371, %379 : vector<8x128xf32>
    %388 = arith.addf %386, %387 : vector<8x128xf32>
    %389 = math.tanh %388 : vector<8x128xf32>
    %390 = arith.mulf %385, %389 : vector<8x128xf32>
    %391 = arith.index_cast %c5_i32 : i32 to index
    %c0_98 = arith.constant 0 : index
    %c0_99 = arith.constant 0 : index
    %392 = vector.load %arg2[%391, %c0_98, %c0_99] : memref<8x8x128xf32, #tpu.memory_space<vmem>>, vector<1x8x128xf32>
    %393 = vector.shape_cast %392 : vector<1x8x128xf32> to vector<8x128xf32>
    %394 = arith.addf %390, %393 : vector<8x128xf32>
    %cst_100 = arith.constant dense<0.000000e+00> : vector<8xf32>
    %395 = vector.multi_reduction <add>, %394, %cst_100 [1] : vector<8x128xf32> to vector<8xf32>
    %396 = vector.shape_cast %395 : vector<8xf32> to vector<8x1xf32>
    %cst_101 = arith.constant 6.250000e-02 : f32
    %397 = vector.broadcast %cst_101 : f32 to vector<8x1xf32>
    %398 = arith.mulf %396, %397 : vector<8x1xf32>
    %399 = vector.broadcast %398 : vector<8x1xf32> to vector<8x128xf32>
    %400 = arith.subf %394, %399 : vector<8x128xf32>
    %401 = arith.mulf %400, %400 : vector<8x128xf32>
    %cst_102 = arith.constant dense<0.000000e+00> : vector<8xf32>
    %402 = vector.multi_reduction <add>, %401, %cst_102 [1] : vector<8x128xf32> to vector<8xf32>
    %403 = vector.shape_cast %402 : vector<8xf32> to vector<8x1xf32>
    %cst_103 = arith.constant 1.120000e+02 : f32
    %404 = vector.broadcast %cst_103 : f32 to vector<8x1xf32>
    %405 = arith.mulf %404, %398 : vector<8x1xf32>
    %406 = arith.mulf %405, %398 : vector<8x1xf32>
    %407 = arith.subf %403, %406 : vector<8x1xf32>
    %cst_104 = arith.constant 6.250000e-02 : f32
    %408 = vector.broadcast %cst_104 : f32 to vector<8x1xf32>
    %409 = arith.mulf %407, %408 : vector<8x1xf32>
    %cst_105 = arith.constant 9.99999974E-6 : f32
    %410 = vector.broadcast %cst_105 : f32 to vector<8x1xf32>
    %411 = arith.addf %409, %410 : vector<8x1xf32>
    %412 = math.rsqrt %411 : vector<8x1xf32>
    %413 = vector.broadcast %412 : vector<8x1xf32> to vector<8x128xf32>
    %414 = vector.broadcast %4 : vector<1x128xf32> to vector<8x128xf32>
    %415 = arith.mulf %413, %414 : vector<8x128xf32>
    %416 = arith.addi %7, %c5_i32 : i32
    %417 = vector.broadcast %416 : i32 to vector<8x1xi32>
    %418 = arith.cmpi slt, %417, %6 : vector<8x1xi32>
    %419 = arith.extui %418 : vector<8x1xi1> to vector<8x1xi32>
    %420 = arith.sitofp %419 : vector<8x1xi32> to vector<8x1xf32>
    %421 = arith.mulf %400, %415 : vector<8x128xf32>
    %422 = vector.broadcast %5 : vector<1x128xf32> to vector<8x128xf32>
    %423 = arith.addf %421, %422 : vector<8x128xf32>
    %424 = vector.broadcast %420 : vector<8x1xf32> to vector<8x128xf32>
    %425 = arith.mulf %423, %424 : vector<8x128xf32>
    %426 = arith.index_cast %c5_i32 : i32 to index
    %c0_106 = arith.constant 0 : index
    %c0_107 = arith.constant 0 : index
    %427 = vector.load %arg7[%426, %c0_106, %c0_107] : memref<8x8x128xf32, #tpu.memory_space<vmem>>, vector<1x8x128xf32>
    %428 = vector.shape_cast %427 : vector<1x8x128xf32> to vector<8x128xf32>
    %429 = vector.shape_cast %425 : vector<8x128xf32> to vector<1x8x128xf32>
    tpu.vector_store %arg7[%426, %c0_106, %c0_107], %429 {strides = array<i32>} : memref<8x8x128xf32, #tpu.memory_space<vmem>>, vector<1x8x128xf32>,
    %c6_i32 = arith.constant 6 : i32
    %430 = arith.index_cast %c6_i32 : i32 to index
    %c0_108 = arith.constant 0 : index
    %c0_109 = arith.constant 0 : index
    %431 = vector.load %arg1[%430, %c0_108, %c0_109] : memref<8x8x512xf32, #tpu.memory_space<vmem>>, vector<1x8x512xf32>
    %432 = vector.shape_cast %431 : vector<1x8x512xf32> to vector<8x512xf32>
    %433 = arith.truncf %390 : vector<8x128xf32> to vector<8x128xbf16>
    %cst_110 = arith.constant dense<0.000000e+00> : vector<8x512xf32>
    %434 = tpu.matmul %433, %3, %cst_110 {dimension_numbers = #tpu.dot_dimension_numbers<[1], [0], [0], [1], [0, 0, 1, 1], [], []>} : vector<8x128xbf16>, vector<128x512xbf16>, vector<8x512xf32> -> vector<8x512xf32>
    %435 = arith.addf %432, %434 : vector<8x512xf32>
    %436 = vector.extract_strided_slice %435 {offsets = [0, 0], sizes = [8, 128], strides = [1, 1]} : vector<8x512xf32> to vector<8x128xf32>
    %437 = arith.negf %436 : vector<8x128xf32>
    %438 = math.exp %437 : vector<8x128xf32>
    %cst_111 = arith.constant 1.000000e+00 : f32
    %439 = vector.broadcast %cst_111 : f32 to vector<8x128xf32>
    %440 = arith.addf %439, %438 : vector<8x128xf32>
    %441 = arith.divf %439, %440 : vector<8x128xf32>
    %442 = vector.extract_strided_slice %435 {offsets = [0, 128], sizes = [8, 128], strides = [1, 1]} : vector<8x512xf32> to vector<8x128xf32>
    %443 = arith.negf %442 : vector<8x128xf32>
    %444 = math.exp %443 : vector<8x128xf32>
    %cst_112 = arith.constant 1.000000e+00 : f32
    %445 = vector.broadcast %cst_112 : f32 to vector<8x128xf32>
    %446 = arith.addf %445, %444 : vector<8x128xf32>
    %447 = arith.divf %445, %446 : vector<8x128xf32>
    %448 = vector.extract_strided_slice %435 {offsets = [0, 256], sizes = [8, 128], strides = [1, 1]} : vector<8x512xf32> to vector<8x128xf32>
    %449 = math.tanh %448 : vector<8x128xf32>
    %450 = vector.extract_strided_slice %435 {offsets = [0, 384], sizes = [8, 128], strides = [1, 1]} : vector<8x512xf32> to vector<8x128xf32>
    %451 = arith.negf %450 : vector<8x128xf32>
    %452 = math.exp %451 : vector<8x128xf32>
    %cst_113 = arith.constant 1.000000e+00 : f32
    %453 = vector.broadcast %cst_113 : f32 to vector<8x128xf32>
    %454 = arith.addf %453, %452 : vector<8x128xf32>
    %455 = arith.divf %453, %454 : vector<8x128xf32>
    %456 = arith.mulf %447, %388 : vector<8x128xf32>
    %457 = arith.mulf %441, %449 : vector<8x128xf32>
    %458 = arith.addf %456, %457 : vector<8x128xf32>
    %459 = math.tanh %458 : vector<8x128xf32>
    %460 = arith.mulf %455, %459 : vector<8x128xf32>
    %461 = arith.index_cast %c6_i32 : i32 to index
    %c0_114 = arith.constant 0 : index
    %c0_115 = arith.constant 0 : index
    %462 = vector.load %arg2[%461, %c0_114, %c0_115] : memref<8x8x128xf32, #tpu.memory_space<vmem>>, vector<1x8x128xf32>
    %463 = vector.shape_cast %462 : vector<1x8x128xf32> to vector<8x128xf32>
    %464 = arith.addf %460, %463 : vector<8x128xf32>
    %cst_116 = arith.constant dense<0.000000e+00> : vector<8xf32>
    %465 = vector.multi_reduction <add>, %464, %cst_116 [1] : vector<8x128xf32> to vector<8xf32>
    %466 = vector.shape_cast %465 : vector<8xf32> to vector<8x1xf32>
    %cst_117 = arith.constant 6.250000e-02 : f32
    %467 = vector.broadcast %cst_117 : f32 to vector<8x1xf32>
    %468 = arith.mulf %466, %467 : vector<8x1xf32>
    %469 = vector.broadcast %468 : vector<8x1xf32> to vector<8x128xf32>
    %470 = arith.subf %464, %469 : vector<8x128xf32>
    %471 = arith.mulf %470, %470 : vector<8x128xf32>
    %cst_118 = arith.constant dense<0.000000e+00> : vector<8xf32>
    %472 = vector.multi_reduction <add>, %471, %cst_118 [1] : vector<8x128xf32> to vector<8xf32>
    %473 = vector.shape_cast %472 : vector<8xf32> to vector<8x1xf32>
    %cst_119 = arith.constant 1.120000e+02 : f32
    %474 = vector.broadcast %cst_119 : f32 to vector<8x1xf32>
    %475 = arith.mulf %474, %468 : vector<8x1xf32>
    %476 = arith.mulf %475, %468 : vector<8x1xf32>
    %477 = arith.subf %473, %476 : vector<8x1xf32>
    %cst_120 = arith.constant 6.250000e-02 : f32
    %478 = vector.broadcast %cst_120 : f32 to vector<8x1xf32>
    %479 = arith.mulf %477, %478 : vector<8x1xf32>
    %cst_121 = arith.constant 9.99999974E-6 : f32
    %480 = vector.broadcast %cst_121 : f32 to vector<8x1xf32>
    %481 = arith.addf %479, %480 : vector<8x1xf32>
    %482 = math.rsqrt %481 : vector<8x1xf32>
    %483 = vector.broadcast %482 : vector<8x1xf32> to vector<8x128xf32>
    %484 = vector.broadcast %4 : vector<1x128xf32> to vector<8x128xf32>
    %485 = arith.mulf %483, %484 : vector<8x128xf32>
    %486 = arith.addi %7, %c6_i32 : i32
    %487 = vector.broadcast %486 : i32 to vector<8x1xi32>
    %488 = arith.cmpi slt, %487, %6 : vector<8x1xi32>
    %489 = arith.extui %488 : vector<8x1xi1> to vector<8x1xi32>
    %490 = arith.sitofp %489 : vector<8x1xi32> to vector<8x1xf32>
    %491 = arith.mulf %470, %485 : vector<8x128xf32>
    %492 = vector.broadcast %5 : vector<1x128xf32> to vector<8x128xf32>
    %493 = arith.addf %491, %492 : vector<8x128xf32>
    %494 = vector.broadcast %490 : vector<8x1xf32> to vector<8x128xf32>
    %495 = arith.mulf %493, %494 : vector<8x128xf32>
    %496 = arith.index_cast %c6_i32 : i32 to index
    %c0_122 = arith.constant 0 : index
    %c0_123 = arith.constant 0 : index
    %497 = vector.load %arg7[%496, %c0_122, %c0_123] : memref<8x8x128xf32, #tpu.memory_space<vmem>>, vector<1x8x128xf32>
    %498 = vector.shape_cast %497 : vector<1x8x128xf32> to vector<8x128xf32>
    %499 = vector.shape_cast %495 : vector<8x128xf32> to vector<1x8x128xf32>
    tpu.vector_store %arg7[%496, %c0_122, %c0_123], %499 {strides = array<i32>} : memref<8x8x128xf32, #tpu.memory_space<vmem>>, vector<1x8x128xf32>,
    %c7_i32 = arith.constant 7 : i32
    %500 = arith.index_cast %c7_i32 : i32 to index
    %c0_124 = arith.constant 0 : index
    %c0_125 = arith.constant 0 : index
    %501 = vector.load %arg1[%500, %c0_124, %c0_125] : memref<8x8x512xf32, #tpu.memory_space<vmem>>, vector<1x8x512xf32>
    %502 = vector.shape_cast %501 : vector<1x8x512xf32> to vector<8x512xf32>
    %503 = arith.truncf %460 : vector<8x128xf32> to vector<8x128xbf16>
    %cst_126 = arith.constant dense<0.000000e+00> : vector<8x512xf32>
    %504 = tpu.matmul %503, %3, %cst_126 {dimension_numbers = #tpu.dot_dimension_numbers<[1], [0], [0], [1], [0, 0, 1, 1], [], []>} : vector<8x128xbf16>, vector<128x512xbf16>, vector<8x512xf32> -> vector<8x512xf32>
    %505 = arith.addf %502, %504 : vector<8x512xf32>
    %506 = vector.extract_strided_slice %505 {offsets = [0, 0], sizes = [8, 128], strides = [1, 1]} : vector<8x512xf32> to vector<8x128xf32>
    %507 = arith.negf %506 : vector<8x128xf32>
    %508 = math.exp %507 : vector<8x128xf32>
    %cst_127 = arith.constant 1.000000e+00 : f32
    %509 = vector.broadcast %cst_127 : f32 to vector<8x128xf32>
    %510 = arith.addf %509, %508 : vector<8x128xf32>
    %511 = arith.divf %509, %510 : vector<8x128xf32>
    %512 = vector.extract_strided_slice %505 {offsets = [0, 128], sizes = [8, 128], strides = [1, 1]} : vector<8x512xf32> to vector<8x128xf32>
    %513 = arith.negf %512 : vector<8x128xf32>
    %514 = math.exp %513 : vector<8x128xf32>
    %cst_128 = arith.constant 1.000000e+00 : f32
    %515 = vector.broadcast %cst_128 : f32 to vector<8x128xf32>
    %516 = arith.addf %515, %514 : vector<8x128xf32>
    %517 = arith.divf %515, %516 : vector<8x128xf32>
    %518 = vector.extract_strided_slice %505 {offsets = [0, 256], sizes = [8, 128], strides = [1, 1]} : vector<8x512xf32> to vector<8x128xf32>
    %519 = math.tanh %518 : vector<8x128xf32>
    %520 = vector.extract_strided_slice %505 {offsets = [0, 384], sizes = [8, 128], strides = [1, 1]} : vector<8x512xf32> to vector<8x128xf32>
    %521 = arith.negf %520 : vector<8x128xf32>
    %522 = math.exp %521 : vector<8x128xf32>
    %cst_129 = arith.constant 1.000000e+00 : f32
    %523 = vector.broadcast %cst_129 : f32 to vector<8x128xf32>
    %524 = arith.addf %523, %522 : vector<8x128xf32>
    %525 = arith.divf %523, %524 : vector<8x128xf32>
    %526 = arith.mulf %517, %458 : vector<8x128xf32>
    %527 = arith.mulf %511, %519 : vector<8x128xf32>
    %528 = arith.addf %526, %527 : vector<8x128xf32>
    %529 = math.tanh %528 : vector<8x128xf32>
    %530 = arith.mulf %525, %529 : vector<8x128xf32>
    %531 = arith.index_cast %c7_i32 : i32 to index
    %c0_130 = arith.constant 0 : index
    %c0_131 = arith.constant 0 : index
    %532 = vector.load %arg2[%531, %c0_130, %c0_131] : memref<8x8x128xf32, #tpu.memory_space<vmem>>, vector<1x8x128xf32>
    %533 = vector.shape_cast %532 : vector<1x8x128xf32> to vector<8x128xf32>
    %534 = arith.addf %530, %533 : vector<8x128xf32>
    %cst_132 = arith.constant dense<0.000000e+00> : vector<8xf32>
    %535 = vector.multi_reduction <add>, %534, %cst_132 [1] : vector<8x128xf32> to vector<8xf32>
    %536 = vector.shape_cast %535 : vector<8xf32> to vector<8x1xf32>
    %cst_133 = arith.constant 6.250000e-02 : f32
    %537 = vector.broadcast %cst_133 : f32 to vector<8x1xf32>
    %538 = arith.mulf %536, %537 : vector<8x1xf32>
    %539 = vector.broadcast %538 : vector<8x1xf32> to vector<8x128xf32>
    %540 = arith.subf %534, %539 : vector<8x128xf32>
    %541 = arith.mulf %540, %540 : vector<8x128xf32>
    %cst_134 = arith.constant dense<0.000000e+00> : vector<8xf32>
    %542 = vector.multi_reduction <add>, %541, %cst_134 [1] : vector<8x128xf32> to vector<8xf32>
    %543 = vector.shape_cast %542 : vector<8xf32> to vector<8x1xf32>
    %cst_135 = arith.constant 1.120000e+02 : f32
    %544 = vector.broadcast %cst_135 : f32 to vector<8x1xf32>
    %545 = arith.mulf %544, %538 : vector<8x1xf32>
    %546 = arith.mulf %545, %538 : vector<8x1xf32>
    %547 = arith.subf %543, %546 : vector<8x1xf32>
    %cst_136 = arith.constant 6.250000e-02 : f32
    %548 = vector.broadcast %cst_136 : f32 to vector<8x1xf32>
    %549 = arith.mulf %547, %548 : vector<8x1xf32>
    %cst_137 = arith.constant 9.99999974E-6 : f32
    %550 = vector.broadcast %cst_137 : f32 to vector<8x1xf32>
    %551 = arith.addf %549, %550 : vector<8x1xf32>
    %552 = math.rsqrt %551 : vector<8x1xf32>
    %553 = vector.broadcast %552 : vector<8x1xf32> to vector<8x128xf32>
    %554 = vector.broadcast %4 : vector<1x128xf32> to vector<8x128xf32>
    %555 = arith.mulf %553, %554 : vector<8x128xf32>
    %556 = arith.addi %7, %c7_i32 : i32
    %557 = vector.broadcast %556 : i32 to vector<8x1xi32>
    %558 = arith.cmpi slt, %557, %6 : vector<8x1xi32>
    %559 = arith.extui %558 : vector<8x1xi1> to vector<8x1xi32>
    %560 = arith.sitofp %559 : vector<8x1xi32> to vector<8x1xf32>
    %561 = arith.mulf %540, %555 : vector<8x128xf32>
    %562 = vector.broadcast %5 : vector<1x128xf32> to vector<8x128xf32>
    %563 = arith.addf %561, %562 : vector<8x128xf32>
    %564 = vector.broadcast %560 : vector<8x1xf32> to vector<8x128xf32>
    %565 = arith.mulf %563, %564 : vector<8x128xf32>
    %566 = arith.index_cast %c7_i32 : i32 to index
    %c0_138 = arith.constant 0 : index
    %c0_139 = arith.constant 0 : index
    %567 = vector.load %arg7[%566, %c0_138, %c0_139] : memref<8x8x128xf32, #tpu.memory_space<vmem>>, vector<1x8x128xf32>
    %568 = vector.shape_cast %567 : vector<1x8x128xf32> to vector<8x128xf32>
    %569 = vector.shape_cast %565 : vector<8x128xf32> to vector<1x8x128xf32>
    tpu.vector_store %arg7[%566, %c0_138, %c0_139], %569 {strides = array<i32>} : memref<8x8x128xf32, #tpu.memory_space<vmem>>, vector<1x8x128xf32>,
    %c8_i32_140 = arith.constant 8 : i32
    %c0_141 = arith.constant 0 : index
    %c0_142 = arith.constant 0 : index
    %570 = vector.load %arg8[%c0_141, %c0_142] : memref<8x128xf32, #tpu.memory_space<vmem>>, vector<8x128xf32>
    tpu.vector_store %arg8[%c0_141, %c0_142], %530 {strides = array<i32>} : memref<8x128xf32, #tpu.memory_space<vmem>>, vector<8x128xf32>,
    %c0_143 = arith.constant 0 : index
    %c0_144 = arith.constant 0 : index
    %571 = vector.load %arg9[%c0_143, %c0_144] : memref<8x128xf32, #tpu.memory_space<vmem>>, vector<8x128xf32>
    tpu.vector_store %arg9[%c0_143, %c0_144], %528 {strides = array<i32>} : memref<8x128xf32, #tpu.memory_space<vmem>>, vector<8x128xf32>,
    return
  }
  func.func @transform_0(%arg0: i32) -> (i32, i32, i32) {
    %c0_i32 = arith.constant 0 : i32
    %c0_i32_0 = arith.constant 0 : i32
    %c0_i32_1 = arith.constant 0 : i32
    return %arg0, %c0_i32, %c0_i32_0 : i32, i32, i32
  }
  func.func @transform_1(%arg0: i32) -> (i32, i32, i32) {
    %c0_i32 = arith.constant 0 : i32
    %c0_i32_0 = arith.constant 0 : i32
    %c0_i32_1 = arith.constant 0 : i32
    return %arg0, %c0_i32, %c0_i32_0 : i32, i32, i32
  }
  func.func @transform_2(%arg0: i32) -> (i32, i32) {
    %c0_i32 = arith.constant 0 : i32
    %c0_i32_0 = arith.constant 0 : i32
    %c0_i32_1 = arith.constant 0 : i32
    return %c0_i32, %c0_i32_0 : i32, i32
  }
  func.func @transform_3(%arg0: i32) -> (i32, i32) {
    %c0_i32 = arith.constant 0 : i32
    %c0_i32_0 = arith.constant 0 : i32
    %c0_i32_1 = arith.constant 0 : i32
    return %c0_i32, %c0_i32_0 : i32, i32
  }
  func.func @transform_4(%arg0: i32) -> (i32, i32) {
    %c0_i32 = arith.constant 0 : i32
    %c0_i32_0 = arith.constant 0 : i32
    %c0_i32_1 = arith.constant 0 : i32
    return %c0_i32, %c0_i32_0 : i32, i32
  }
  func.func @transform_5(%arg0: i32) -> (i32, i32) {
    %c0_i32 = arith.constant 0 : i32
    %c0_i32_0 = arith.constant 0 : i32
    %c0_i32_1 = arith.constant 0 : i32
    return %c0_i32, %c0_i32_0 : i32, i32
  }
  func.func @transform_6(%arg0: i32) -> (i32, i32, i32) {
    %c0_i32 = arith.constant 0 : i32
    %c0_i32_0 = arith.constant 0 : i32
    %c0_i32_1 = arith.constant 0 : i32
    return %arg0, %c0_i32, %c0_i32_0 : i32, i32, i32
  }
}

module attributes {stable_mosaic.version = 11 : i64} {
  func.func @kernel(%arg0: i32, %arg1: memref<8x8x512xf32, #tpu.memory_space<vmem>>, %arg2: memref<8x8x128xf32, #tpu.memory_space<vmem>>, %arg3: memref<128x512xbf16, #tpu.memory_space<vmem>>, %arg4: memref<1x128xf32, #tpu.memory_space<vmem>>, %arg5: memref<1x128xf32, #tpu.memory_space<vmem>>, %arg6: memref<8x1xi32, #tpu.memory_space<vmem>>, %arg7: memref<8x8x128xf32, #tpu.memory_space<vmem>>, %arg8: memref<8x128xf32, #tpu.memory_space<vmem>>, %arg9: memref<8x128xf32, #tpu.memory_space<vmem>>) attributes {dimension_semantics = [#tpu.dimension_semantics<arbitrary>], iteration_bounds = array<i64: 1>, scalar_prefetch = 0 : i64, scratch_operands = 2 : i64, tpu.core_type = #tpu.core_type<tc>, window_params = [{transform_indices = @transform_0, window_bounds = array<i64: 8, 8, 512>}, {transform_indices = @transform_1, window_bounds = array<i64: 8, 8, 128>}, {pipeline_mode = #tpu.pipeline_mode<synchronous>, transform_indices = @transform_2, window_bounds = array<i64: 128, 512>}, {pipeline_mode = #tpu.pipeline_mode<synchronous>, transform_indices = @transform_3, window_bounds = array<i64: 1, 128>}, {pipeline_mode = #tpu.pipeline_mode<synchronous>, transform_indices = @transform_4, window_bounds = array<i64: 1, 128>}, {pipeline_mode = #tpu.pipeline_mode<synchronous>, transform_indices = @transform_5, window_bounds = array<i64: 8, 1>}, {transform_indices = @transform_6, window_bounds = array<i64: 8, 8, 128>}]} {
    %c0_i32 = arith.constant 0 : i32
    %0 = arith.cmpi eq, %arg0, %c0_i32 : i32
    %1 = arith.extui %0 : i1 to i32
    %c0_i32_0 = arith.constant 0 : i32
    %2 = arith.cmpi ne, %1, %c0_i32_0 : i32
    scf.if %2 {
      %cst_145 = arith.constant 0.000000e+00 : f32
      %572 = vector.broadcast %cst_145 : f32 to vector<8x128xf32>
      %c0_146 = arith.constant 0 : index
      %c0_147 = arith.constant 0 : index
      %573 = vector.load %arg8[%c0_146, %c0_147] : memref<8x128xf32, #tpu.memory_space<vmem>>, vector<8x128xf32>
      tpu.vector_store %arg8[%c0_146, %c0_147], %572 {strides = array<i32>} : memref<8x128xf32, #tpu.memory_space<vmem>>, vector<8x128xf32>,
      %cst_148 = arith.constant 0.000000e+00 : f32
      %574 = vector.broadcast %cst_148 : f32 to vector<8x128xf32>
      %c0_149 = arith.constant 0 : index
      %c0_150 = arith.constant 0 : index
      %575 = vector.load %arg9[%c0_149, %c0_150] : memref<8x128xf32, #tpu.memory_space<vmem>>, vector<8x128xf32>
      tpu.vector_store %arg9[%c0_149, %c0_150], %574 {strides = array<i32>} : memref<8x128xf32, #tpu.memory_space<vmem>>, vector<8x128xf32>,
    } else {
    }
    %c0 = arith.constant 0 : index
    %c0_1 = arith.constant 0 : index
    %3 = vector.load %arg3[%c0, %c0_1] : memref<128x512xbf16, #tpu.memory_space<vmem>>, vector<128x512xbf16>
    %c0_2 = arith.constant 0 : index
    %c0_3 = arith.constant 0 : index
    %4 = vector.load %arg4[%c0_2, %c0_3] : memref<1x128xf32, #tpu.memory_space<vmem>>, vector<1x128xf32>
    %c0_4 = arith.constant 0 : index
    %c0_5 = arith.constant 0 : index
    %5 = vector.load %arg5[%c0_4, %c0_5] : memref<1x128xf32, #tpu.memory_space<vmem>>, vector<1x128xf32>
    %c0_6 = arith.constant 0 : index
    %c0_7 = arith.constant 0 : index
    %6 = vector.load %arg6[%c0_6, %c0_7] : memref<8x1xi32, #tpu.memory_space<vmem>>, vector<8x1xi32>
    %c8_i32 = arith.constant 8 : i32
    %7 = arith.muli %arg0, %c8_i32 : i32
    %c0_8 = arith.constant 0 : index
    %c0_9 = arith.constant 0 : index
    %8 = vector.load %arg8[%c0_8, %c0_9] : memref<8x128xf32, #tpu.memory_space<vmem>>, vector<8x128xf32>
    %c0_10 = arith.constant 0 : index
    %c0_11 = arith.constant 0 : index
    %9 = vector.load %arg9[%c0_10, %c0_11] : memref<8x128xf32, #tpu.memory_space<vmem>>, vector<8x128xf32>
    %c0_i32_12 = arith.constant 0 : i32
    %10 = arith.index_cast %c0_i32_12 : i32 to index
    %c0_13 = arith.constant 0 : index
    %c0_14 = arith.constant 0 : index
    %11 = vector.load %arg1[%10, %c0_13, %c0_14] : memref<8x8x512xf32, #tpu.memory_space<vmem>>, vector<1x8x512xf32>
    %12 = vector.shape_cast %11 : vector<1x8x512xf32> to vector<8x512xf32>
    %13 = arith.truncf %8 : vector<8x128xf32> to vector<8x128xbf16>
    %cst = arith.constant dense<0.000000e+00> : vector<8x512xf32>
    %14 = tpu.matmul %13, %3, %cst {dimension_numbers = #tpu.dot_dimension_numbers<[1], [0], [0], [1], [0, 0, 1, 1], [], []>} : vector<8x128xbf16>, vector<128x512xbf16>, vector<8x512xf32> -> vector<8x512xf32>
    %15 = arith.addf %12, %14 : vector<8x512xf32>
    %16 = vector.extract_strided_slice %15 {offsets = [0, 0], sizes = [8, 128], strides = [1, 1]} : vector<8x512xf32> to vector<8x128xf32>
    %17 = arith.negf %16 : vector<8x128xf32>
    %18 = math.exp %17 : vector<8x128xf32>
    %cst_15 = arith.constant 1.000000e+00 : f32
    %19 = vector.broadcast %cst_15 : f32 to vector<8x128xf32>
    %20 = arith.addf %19, %18 : vector<8x128xf32>
    %21 = arith.divf %19, %20 : vector<8x128xf32>
    %22 = vector.extract_strided_slice %15 {offsets = [0, 128], sizes = [8, 128], strides = [1, 1]} : vector<8x512xf32> to vector<8x128xf32>
    %23 = arith.negf %22 : vector<8x128xf32>
    %24 = math.exp %23 : vector<8x128xf32>
    %cst_16 = arith.constant 1.000000e+00 : f32
    %25 = vector.broadcast %cst_16 : f32 to vector<8x128xf32>
    %26 = arith.addf %25, %24 : vector<8x128xf32>
    %27 = arith.divf %25, %26 : vector<8x128xf32>
    %28 = vector.extract_strided_slice %15 {offsets = [0, 256], sizes = [8, 128], strides = [1, 1]} : vector<8x512xf32> to vector<8x128xf32>
    %29 = math.tanh %28 : vector<8x128xf32>
    %30 = vector.extract_strided_slice %15 {offsets = [0, 384], sizes = [8, 128], strides = [1, 1]} : vector<8x512xf32> to vector<8x128xf32>
    %31 = arith.negf %30 : vector<8x128xf32>
    %32 = math.exp %31 : vector<8x128xf32>
    %cst_17 = arith.constant 1.000000e+00 : f32
    %33 = vector.broadcast %cst_17 : f32 to vector<8x128xf32>
    %34 = arith.addf %33, %32 : vector<8x128xf32>
    %35 = arith.divf %33, %34 : vector<8x128xf32>
    %36 = arith.mulf %27, %9 : vector<8x128xf32>
    %37 = arith.mulf %21, %29 : vector<8x128xf32>
    %38 = arith.addf %36, %37 : vector<8x128xf32>
    %39 = math.tanh %38 : vector<8x128xf32>
    %40 = arith.mulf %35, %39 : vector<8x128xf32>
    %41 = arith.index_cast %c0_i32_12 : i32 to index
    %c0_18 = arith.constant 0 : index
    %c0_19 = arith.constant 0 : index
    %42 = vector.load %arg2[%41, %c0_18, %c0_19] : memref<8x8x128xf32, #tpu.memory_space<vmem>>, vector<1x8x128xf32>
    %43 = vector.shape_cast %42 : vector<1x8x128xf32> to vector<8x128xf32>
    %44 = arith.addf %40, %43 : vector<8x128xf32>
    %cst_20 = arith.constant dense<0.000000e+00> : vector<8xf32>
    %45 = vector.multi_reduction <add>, %44, %cst_20 [1] : vector<8x128xf32> to vector<8xf32>
    %46 = vector.shape_cast %45 : vector<8xf32> to vector<8x1xf32>
    %cst_21 = arith.constant 3.125000e-02 : f32
    %47 = vector.broadcast %cst_21 : f32 to vector<8x1xf32>
    %48 = arith.mulf %46, %47 : vector<8x1xf32>
    %49 = vector.broadcast %48 : vector<8x1xf32> to vector<8x128xf32>
    %50 = arith.subf %44, %49 : vector<8x128xf32>
    %51 = arith.mulf %50, %50 : vector<8x128xf32>
    %cst_22 = arith.constant dense<0.000000e+00> : vector<8xf32>
    %52 = vector.multi_reduction <add>, %51, %cst_22 [1] : vector<8x128xf32> to vector<8xf32>
    %53 = vector.shape_cast %52 : vector<8xf32> to vector<8x1xf32>
    %cst_23 = arith.constant 9.600000e+01 : f32
    %54 = vector.broadcast %cst_23 : f32 to vector<8x1xf32>
    %55 = arith.mulf %54, %48 : vector<8x1xf32>
    %56 = arith.mulf %55, %48 : vector<8x1xf32>
    %57 = arith.subf %53, %56 : vector<8x1xf32>
    %cst_24 = arith.constant 3.125000e-02 : f32
    %58 = vector.broadcast %cst_24 : f32 to vector<8x1xf32>
    %59 = arith.mulf %57, %58 : vector<8x1xf32>
    %cst_25 = arith.constant 9.99999974E-6 : f32
    %60 = vector.broadcast %cst_25 : f32 to vector<8x1xf32>
    %61 = arith.addf %59, %60 : vector<8x1xf32>
    %62 = math.rsqrt %61 : vector<8x1xf32>
    %63 = vector.broadcast %62 : vector<8x1xf32> to vector<8x128xf32>
    %64 = vector.broadcast %4 : vector<1x128xf32> to vector<8x128xf32>
    %65 = arith.mulf %63, %64 : vector<8x128xf32>
    %66 = arith.addi %7, %c0_i32_12 : i32
    %67 = vector.broadcast %66 : i32 to vector<8x1xi32>
    %68 = arith.cmpi slt, %67, %6 : vector<8x1xi32>
    %69 = arith.extui %68 : vector<8x1xi1> to vector<8x1xi32>
    %70 = arith.sitofp %69 : vector<8x1xi32> to vector<8x1xf32>
    %71 = arith.mulf %50, %65 : vector<8x128xf32>
    %72 = vector.broadcast %5 : vector<1x128xf32> to vector<8x128xf32>
    %73 = arith.addf %71, %72 : vector<8x128xf32>
    %74 = vector.broadcast %70 : vector<8x1xf32> to vector<8x128xf32>
    %75 = arith.mulf %73, %74 : vector<8x128xf32>
    %76 = arith.index_cast %c0_i32_12 : i32 to index
    %c0_26 = arith.constant 0 : index
    %c0_27 = arith.constant 0 : index
    %77 = vector.load %arg7[%76, %c0_26, %c0_27] : memref<8x8x128xf32, #tpu.memory_space<vmem>>, vector<1x8x128xf32>
    %78 = vector.shape_cast %77 : vector<1x8x128xf32> to vector<8x128xf32>
    %79 = vector.shape_cast %75 : vector<8x128xf32> to vector<1x8x128xf32>
    tpu.vector_store %arg7[%76, %c0_26, %c0_27], %79 {strides = array<i32>} : memref<8x8x128xf32, #tpu.memory_space<vmem>>, vector<1x8x128xf32>,
    %c1_i32 = arith.constant 1 : i32
    %80 = arith.index_cast %c1_i32 : i32 to index
    %c0_28 = arith.constant 0 : index
    %c0_29 = arith.constant 0 : index
    %81 = vector.load %arg1[%80, %c0_28, %c0_29] : memref<8x8x512xf32, #tpu.memory_space<vmem>>, vector<1x8x512xf32>
    %82 = vector.shape_cast %81 : vector<1x8x512xf32> to vector<8x512xf32>
    %83 = arith.truncf %40 : vector<8x128xf32> to vector<8x128xbf16>
    %cst_30 = arith.constant dense<0.000000e+00> : vector<8x512xf32>
    %84 = tpu.matmul %83, %3, %cst_30 {dimension_numbers = #tpu.dot_dimension_numbers<[1], [0], [0], [1], [0, 0, 1, 1], [], []>} : vector<8x128xbf16>, vector<128x512xbf16>, vector<8x512xf32> -> vector<8x512xf32>
    %85 = arith.addf %82, %84 : vector<8x512xf32>
    %86 = vector.extract_strided_slice %85 {offsets = [0, 0], sizes = [8, 128], strides = [1, 1]} : vector<8x512xf32> to vector<8x128xf32>
    %87 = arith.negf %86 : vector<8x128xf32>
    %88 = math.exp %87 : vector<8x128xf32>
    %cst_31 = arith.constant 1.000000e+00 : f32
    %89 = vector.broadcast %cst_31 : f32 to vector<8x128xf32>
    %90 = arith.addf %89, %88 : vector<8x128xf32>
    %91 = arith.divf %89, %90 : vector<8x128xf32>
    %92 = vector.extract_strided_slice %85 {offsets = [0, 128], sizes = [8, 128], strides = [1, 1]} : vector<8x512xf32> to vector<8x128xf32>
    %93 = arith.negf %92 : vector<8x128xf32>
    %94 = math.exp %93 : vector<8x128xf32>
    %cst_32 = arith.constant 1.000000e+00 : f32
    %95 = vector.broadcast %cst_32 : f32 to vector<8x128xf32>
    %96 = arith.addf %95, %94 : vector<8x128xf32>
    %97 = arith.divf %95, %96 : vector<8x128xf32>
    %98 = vector.extract_strided_slice %85 {offsets = [0, 256], sizes = [8, 128], strides = [1, 1]} : vector<8x512xf32> to vector<8x128xf32>
    %99 = math.tanh %98 : vector<8x128xf32>
    %100 = vector.extract_strided_slice %85 {offsets = [0, 384], sizes = [8, 128], strides = [1, 1]} : vector<8x512xf32> to vector<8x128xf32>
    %101 = arith.negf %100 : vector<8x128xf32>
    %102 = math.exp %101 : vector<8x128xf32>
    %cst_33 = arith.constant 1.000000e+00 : f32
    %103 = vector.broadcast %cst_33 : f32 to vector<8x128xf32>
    %104 = arith.addf %103, %102 : vector<8x128xf32>
    %105 = arith.divf %103, %104 : vector<8x128xf32>
    %106 = arith.mulf %97, %38 : vector<8x128xf32>
    %107 = arith.mulf %91, %99 : vector<8x128xf32>
    %108 = arith.addf %106, %107 : vector<8x128xf32>
    %109 = math.tanh %108 : vector<8x128xf32>
    %110 = arith.mulf %105, %109 : vector<8x128xf32>
    %111 = arith.index_cast %c1_i32 : i32 to index
    %c0_34 = arith.constant 0 : index
    %c0_35 = arith.constant 0 : index
    %112 = vector.load %arg2[%111, %c0_34, %c0_35] : memref<8x8x128xf32, #tpu.memory_space<vmem>>, vector<1x8x128xf32>
    %113 = vector.shape_cast %112 : vector<1x8x128xf32> to vector<8x128xf32>
    %114 = arith.addf %110, %113 : vector<8x128xf32>
    %cst_36 = arith.constant dense<0.000000e+00> : vector<8xf32>
    %115 = vector.multi_reduction <add>, %114, %cst_36 [1] : vector<8x128xf32> to vector<8xf32>
    %116 = vector.shape_cast %115 : vector<8xf32> to vector<8x1xf32>
    %cst_37 = arith.constant 3.125000e-02 : f32
    %117 = vector.broadcast %cst_37 : f32 to vector<8x1xf32>
    %118 = arith.mulf %116, %117 : vector<8x1xf32>
    %119 = vector.broadcast %118 : vector<8x1xf32> to vector<8x128xf32>
    %120 = arith.subf %114, %119 : vector<8x128xf32>
    %121 = arith.mulf %120, %120 : vector<8x128xf32>
    %cst_38 = arith.constant dense<0.000000e+00> : vector<8xf32>
    %122 = vector.multi_reduction <add>, %121, %cst_38 [1] : vector<8x128xf32> to vector<8xf32>
    %123 = vector.shape_cast %122 : vector<8xf32> to vector<8x1xf32>
    %cst_39 = arith.constant 9.600000e+01 : f32
    %124 = vector.broadcast %cst_39 : f32 to vector<8x1xf32>
    %125 = arith.mulf %124, %118 : vector<8x1xf32>
    %126 = arith.mulf %125, %118 : vector<8x1xf32>
    %127 = arith.subf %123, %126 : vector<8x1xf32>
    %cst_40 = arith.constant 3.125000e-02 : f32
    %128 = vector.broadcast %cst_40 : f32 to vector<8x1xf32>
    %129 = arith.mulf %127, %128 : vector<8x1xf32>
    %cst_41 = arith.constant 9.99999974E-6 : f32
    %130 = vector.broadcast %cst_41 : f32 to vector<8x1xf32>
    %131 = arith.addf %129, %130 : vector<8x1xf32>
    %132 = math.rsqrt %131 : vector<8x1xf32>
    %133 = vector.broadcast %132 : vector<8x1xf32> to vector<8x128xf32>
    %134 = vector.broadcast %4 : vector<1x128xf32> to vector<8x128xf32>
    %135 = arith.mulf %133, %134 : vector<8x128xf32>
    %136 = arith.addi %7, %c1_i32 : i32
    %137 = vector.broadcast %136 : i32 to vector<8x1xi32>
    %138 = arith.cmpi slt, %137, %6 : vector<8x1xi32>
    %139 = arith.extui %138 : vector<8x1xi1> to vector<8x1xi32>
    %140 = arith.sitofp %139 : vector<8x1xi32> to vector<8x1xf32>
    %141 = arith.mulf %120, %135 : vector<8x128xf32>
    %142 = vector.broadcast %5 : vector<1x128xf32> to vector<8x128xf32>
    %143 = arith.addf %141, %142 : vector<8x128xf32>
    %144 = vector.broadcast %140 : vector<8x1xf32> to vector<8x128xf32>
    %145 = arith.mulf %143, %144 : vector<8x128xf32>
    %146 = arith.index_cast %c1_i32 : i32 to index
    %c0_42 = arith.constant 0 : index
    %c0_43 = arith.constant 0 : index
    %147 = vector.load %arg7[%146, %c0_42, %c0_43] : memref<8x8x128xf32, #tpu.memory_space<vmem>>, vector<1x8x128xf32>
    %148 = vector.shape_cast %147 : vector<1x8x128xf32> to vector<8x128xf32>
    %149 = vector.shape_cast %145 : vector<8x128xf32> to vector<1x8x128xf32>
    tpu.vector_store %arg7[%146, %c0_42, %c0_43], %149 {strides = array<i32>} : memref<8x8x128xf32, #tpu.memory_space<vmem>>, vector<1x8x128xf32>,
    %c2_i32 = arith.constant 2 : i32
    %150 = arith.index_cast %c2_i32 : i32 to index
    %c0_44 = arith.constant 0 : index
    %c0_45 = arith.constant 0 : index
    %151 = vector.load %arg1[%150, %c0_44, %c0_45] : memref<8x8x512xf32, #tpu.memory_space<vmem>>, vector<1x8x512xf32>
    %152 = vector.shape_cast %151 : vector<1x8x512xf32> to vector<8x512xf32>
    %153 = arith.truncf %110 : vector<8x128xf32> to vector<8x128xbf16>
    %cst_46 = arith.constant dense<0.000000e+00> : vector<8x512xf32>
    %154 = tpu.matmul %153, %3, %cst_46 {dimension_numbers = #tpu.dot_dimension_numbers<[1], [0], [0], [1], [0, 0, 1, 1], [], []>} : vector<8x128xbf16>, vector<128x512xbf16>, vector<8x512xf32> -> vector<8x512xf32>
    %155 = arith.addf %152, %154 : vector<8x512xf32>
    %156 = vector.extract_strided_slice %155 {offsets = [0, 0], sizes = [8, 128], strides = [1, 1]} : vector<8x512xf32> to vector<8x128xf32>
    %157 = arith.negf %156 : vector<8x128xf32>
    %158 = math.exp %157 : vector<8x128xf32>
    %cst_47 = arith.constant 1.000000e+00 : f32
    %159 = vector.broadcast %cst_47 : f32 to vector<8x128xf32>
    %160 = arith.addf %159, %158 : vector<8x128xf32>
    %161 = arith.divf %159, %160 : vector<8x128xf32>
    %162 = vector.extract_strided_slice %155 {offsets = [0, 128], sizes = [8, 128], strides = [1, 1]} : vector<8x512xf32> to vector<8x128xf32>
    %163 = arith.negf %162 : vector<8x128xf32>
    %164 = math.exp %163 : vector<8x128xf32>
    %cst_48 = arith.constant 1.000000e+00 : f32
    %165 = vector.broadcast %cst_48 : f32 to vector<8x128xf32>
    %166 = arith.addf %165, %164 : vector<8x128xf32>
    %167 = arith.divf %165, %166 : vector<8x128xf32>
    %168 = vector.extract_strided_slice %155 {offsets = [0, 256], sizes = [8, 128], strides = [1, 1]} : vector<8x512xf32> to vector<8x128xf32>
    %169 = math.tanh %168 : vector<8x128xf32>
    %170 = vector.extract_strided_slice %155 {offsets = [0, 384], sizes = [8, 128], strides = [1, 1]} : vector<8x512xf32> to vector<8x128xf32>
    %171 = arith.negf %170 : vector<8x128xf32>
    %172 = math.exp %171 : vector<8x128xf32>
    %cst_49 = arith.constant 1.000000e+00 : f32
    %173 = vector.broadcast %cst_49 : f32 to vector<8x128xf32>
    %174 = arith.addf %173, %172 : vector<8x128xf32>
    %175 = arith.divf %173, %174 : vector<8x128xf32>
    %176 = arith.mulf %167, %108 : vector<8x128xf32>
    %177 = arith.mulf %161, %169 : vector<8x128xf32>
    %178 = arith.addf %176, %177 : vector<8x128xf32>
    %179 = math.tanh %178 : vector<8x128xf32>
    %180 = arith.mulf %175, %179 : vector<8x128xf32>
    %181 = arith.index_cast %c2_i32 : i32 to index
    %c0_50 = arith.constant 0 : index
    %c0_51 = arith.constant 0 : index
    %182 = vector.load %arg2[%181, %c0_50, %c0_51] : memref<8x8x128xf32, #tpu.memory_space<vmem>>, vector<1x8x128xf32>
    %183 = vector.shape_cast %182 : vector<1x8x128xf32> to vector<8x128xf32>
    %184 = arith.addf %180, %183 : vector<8x128xf32>
    %cst_52 = arith.constant dense<0.000000e+00> : vector<8xf32>
    %185 = vector.multi_reduction <add>, %184, %cst_52 [1] : vector<8x128xf32> to vector<8xf32>
    %186 = vector.shape_cast %185 : vector<8xf32> to vector<8x1xf32>
    %cst_53 = arith.constant 3.125000e-02 : f32
    %187 = vector.broadcast %cst_53 : f32 to vector<8x1xf32>
    %188 = arith.mulf %186, %187 : vector<8x1xf32>
    %189 = vector.broadcast %188 : vector<8x1xf32> to vector<8x128xf32>
    %190 = arith.subf %184, %189 : vector<8x128xf32>
    %191 = arith.mulf %190, %190 : vector<8x128xf32>
    %cst_54 = arith.constant dense<0.000000e+00> : vector<8xf32>
    %192 = vector.multi_reduction <add>, %191, %cst_54 [1] : vector<8x128xf32> to vector<8xf32>
    %193 = vector.shape_cast %192 : vector<8xf32> to vector<8x1xf32>
    %cst_55 = arith.constant 9.600000e+01 : f32
    %194 = vector.broadcast %cst_55 : f32 to vector<8x1xf32>
    %195 = arith.mulf %194, %188 : vector<8x1xf32>
    %196 = arith.mulf %195, %188 : vector<8x1xf32>
    %197 = arith.subf %193, %196 : vector<8x1xf32>
    %cst_56 = arith.constant 3.125000e-02 : f32
    %198 = vector.broadcast %cst_56 : f32 to vector<8x1xf32>
    %199 = arith.mulf %197, %198 : vector<8x1xf32>
    %cst_57 = arith.constant 9.99999974E-6 : f32
    %200 = vector.broadcast %cst_57 : f32 to vector<8x1xf32>
    %201 = arith.addf %199, %200 : vector<8x1xf32>
    %202 = math.rsqrt %201 : vector<8x1xf32>
    %203 = vector.broadcast %202 : vector<8x1xf32> to vector<8x128xf32>
    %204 = vector.broadcast %4 : vector<1x128xf32> to vector<8x128xf32>
    %205 = arith.mulf %203, %204 : vector<8x128xf32>
    %206 = arith.addi %7, %c2_i32 : i32
    %207 = vector.broadcast %206 : i32 to vector<8x1xi32>
    %208 = arith.cmpi slt, %207, %6 : vector<8x1xi32>
    %209 = arith.extui %208 : vector<8x1xi1> to vector<8x1xi32>
    %210 = arith.sitofp %209 : vector<8x1xi32> to vector<8x1xf32>
    %211 = arith.mulf %190, %205 : vector<8x128xf32>
    %212 = vector.broadcast %5 : vector<1x128xf32> to vector<8x128xf32>
    %213 = arith.addf %211, %212 : vector<8x128xf32>
    %214 = vector.broadcast %210 : vector<8x1xf32> to vector<8x128xf32>
    %215 = arith.mulf %213, %214 : vector<8x128xf32>
    %216 = arith.index_cast %c2_i32 : i32 to index
    %c0_58 = arith.constant 0 : index
    %c0_59 = arith.constant 0 : index
    %217 = vector.load %arg7[%216, %c0_58, %c0_59] : memref<8x8x128xf32, #tpu.memory_space<vmem>>, vector<1x8x128xf32>
    %218 = vector.shape_cast %217 : vector<1x8x128xf32> to vector<8x128xf32>
    %219 = vector.shape_cast %215 : vector<8x128xf32> to vector<1x8x128xf32>
    tpu.vector_store %arg7[%216, %c0_58, %c0_59], %219 {strides = array<i32>} : memref<8x8x128xf32, #tpu.memory_space<vmem>>, vector<1x8x128xf32>,
    %c3_i32 = arith.constant 3 : i32
    %220 = arith.index_cast %c3_i32 : i32 to index
    %c0_60 = arith.constant 0 : index
    %c0_61 = arith.constant 0 : index
    %221 = vector.load %arg1[%220, %c0_60, %c0_61] : memref<8x8x512xf32, #tpu.memory_space<vmem>>, vector<1x8x512xf32>
    %222 = vector.shape_cast %221 : vector<1x8x512xf32> to vector<8x512xf32>
    %223 = arith.truncf %180 : vector<8x128xf32> to vector<8x128xbf16>
    %cst_62 = arith.constant dense<0.000000e+00> : vector<8x512xf32>
    %224 = tpu.matmul %223, %3, %cst_62 {dimension_numbers = #tpu.dot_dimension_numbers<[1], [0], [0], [1], [0, 0, 1, 1], [], []>} : vector<8x128xbf16>, vector<128x512xbf16>, vector<8x512xf32> -> vector<8x512xf32>
    %225 = arith.addf %222, %224 : vector<8x512xf32>
    %226 = vector.extract_strided_slice %225 {offsets = [0, 0], sizes = [8, 128], strides = [1, 1]} : vector<8x512xf32> to vector<8x128xf32>
    %227 = arith.negf %226 : vector<8x128xf32>
    %228 = math.exp %227 : vector<8x128xf32>
    %cst_63 = arith.constant 1.000000e+00 : f32
    %229 = vector.broadcast %cst_63 : f32 to vector<8x128xf32>
    %230 = arith.addf %229, %228 : vector<8x128xf32>
    %231 = arith.divf %229, %230 : vector<8x128xf32>
    %232 = vector.extract_strided_slice %225 {offsets = [0, 128], sizes = [8, 128], strides = [1, 1]} : vector<8x512xf32> to vector<8x128xf32>
    %233 = arith.negf %232 : vector<8x128xf32>
    %234 = math.exp %233 : vector<8x128xf32>
    %cst_64 = arith.constant 1.000000e+00 : f32
    %235 = vector.broadcast %cst_64 : f32 to vector<8x128xf32>
    %236 = arith.addf %235, %234 : vector<8x128xf32>
    %237 = arith.divf %235, %236 : vector<8x128xf32>
    %238 = vector.extract_strided_slice %225 {offsets = [0, 256], sizes = [8, 128], strides = [1, 1]} : vector<8x512xf32> to vector<8x128xf32>
    %239 = math.tanh %238 : vector<8x128xf32>
    %240 = vector.extract_strided_slice %225 {offsets = [0, 384], sizes = [8, 128], strides = [1, 1]} : vector<8x512xf32> to vector<8x128xf32>
    %241 = arith.negf %240 : vector<8x128xf32>
    %242 = math.exp %241 : vector<8x128xf32>
    %cst_65 = arith.constant 1.000000e+00 : f32
    %243 = vector.broadcast %cst_65 : f32 to vector<8x128xf32>
    %244 = arith.addf %243, %242 : vector<8x128xf32>
    %245 = arith.divf %243, %244 : vector<8x128xf32>
    %246 = arith.mulf %237, %178 : vector<8x128xf32>
    %247 = arith.mulf %231, %239 : vector<8x128xf32>
    %248 = arith.addf %246, %247 : vector<8x128xf32>
    %249 = math.tanh %248 : vector<8x128xf32>
    %250 = arith.mulf %245, %249 : vector<8x128xf32>
    %251 = arith.index_cast %c3_i32 : i32 to index
    %c0_66 = arith.constant 0 : index
    %c0_67 = arith.constant 0 : index
    %252 = vector.load %arg2[%251, %c0_66, %c0_67] : memref<8x8x128xf32, #tpu.memory_space<vmem>>, vector<1x8x128xf32>
    %253 = vector.shape_cast %252 : vector<1x8x128xf32> to vector<8x128xf32>
    %254 = arith.addf %250, %253 : vector<8x128xf32>
    %cst_68 = arith.constant dense<0.000000e+00> : vector<8xf32>
    %255 = vector.multi_reduction <add>, %254, %cst_68 [1] : vector<8x128xf32> to vector<8xf32>
    %256 = vector.shape_cast %255 : vector<8xf32> to vector<8x1xf32>
    %cst_69 = arith.constant 3.125000e-02 : f32
    %257 = vector.broadcast %cst_69 : f32 to vector<8x1xf32>
    %258 = arith.mulf %256, %257 : vector<8x1xf32>
    %259 = vector.broadcast %258 : vector<8x1xf32> to vector<8x128xf32>
    %260 = arith.subf %254, %259 : vector<8x128xf32>
    %261 = arith.mulf %260, %260 : vector<8x128xf32>
    %cst_70 = arith.constant dense<0.000000e+00> : vector<8xf32>
    %262 = vector.multi_reduction <add>, %261, %cst_70 [1] : vector<8x128xf32> to vector<8xf32>
    %263 = vector.shape_cast %262 : vector<8xf32> to vector<8x1xf32>
    %cst_71 = arith.constant 9.600000e+01 : f32
    %264 = vector.broadcast %cst_71 : f32 to vector<8x1xf32>
    %265 = arith.mulf %264, %258 : vector<8x1xf32>
    %266 = arith.mulf %265, %258 : vector<8x1xf32>
    %267 = arith.subf %263, %266 : vector<8x1xf32>
    %cst_72 = arith.constant 3.125000e-02 : f32
    %268 = vector.broadcast %cst_72 : f32 to vector<8x1xf32>
    %269 = arith.mulf %267, %268 : vector<8x1xf32>
    %cst_73 = arith.constant 9.99999974E-6 : f32
    %270 = vector.broadcast %cst_73 : f32 to vector<8x1xf32>
    %271 = arith.addf %269, %270 : vector<8x1xf32>
    %272 = math.rsqrt %271 : vector<8x1xf32>
    %273 = vector.broadcast %272 : vector<8x1xf32> to vector<8x128xf32>
    %274 = vector.broadcast %4 : vector<1x128xf32> to vector<8x128xf32>
    %275 = arith.mulf %273, %274 : vector<8x128xf32>
    %276 = arith.addi %7, %c3_i32 : i32
    %277 = vector.broadcast %276 : i32 to vector<8x1xi32>
    %278 = arith.cmpi slt, %277, %6 : vector<8x1xi32>
    %279 = arith.extui %278 : vector<8x1xi1> to vector<8x1xi32>
    %280 = arith.sitofp %279 : vector<8x1xi32> to vector<8x1xf32>
    %281 = arith.mulf %260, %275 : vector<8x128xf32>
    %282 = vector.broadcast %5 : vector<1x128xf32> to vector<8x128xf32>
    %283 = arith.addf %281, %282 : vector<8x128xf32>
    %284 = vector.broadcast %280 : vector<8x1xf32> to vector<8x128xf32>
    %285 = arith.mulf %283, %284 : vector<8x128xf32>
    %286 = arith.index_cast %c3_i32 : i32 to index
    %c0_74 = arith.constant 0 : index
    %c0_75 = arith.constant 0 : index
    %287 = vector.load %arg7[%286, %c0_74, %c0_75] : memref<8x8x128xf32, #tpu.memory_space<vmem>>, vector<1x8x128xf32>
    %288 = vector.shape_cast %287 : vector<1x8x128xf32> to vector<8x128xf32>
    %289 = vector.shape_cast %285 : vector<8x128xf32> to vector<1x8x128xf32>
    tpu.vector_store %arg7[%286, %c0_74, %c0_75], %289 {strides = array<i32>} : memref<8x8x128xf32, #tpu.memory_space<vmem>>, vector<1x8x128xf32>,
    %c4_i32 = arith.constant 4 : i32
    %290 = arith.index_cast %c4_i32 : i32 to index
    %c0_76 = arith.constant 0 : index
    %c0_77 = arith.constant 0 : index
    %291 = vector.load %arg1[%290, %c0_76, %c0_77] : memref<8x8x512xf32, #tpu.memory_space<vmem>>, vector<1x8x512xf32>
    %292 = vector.shape_cast %291 : vector<1x8x512xf32> to vector<8x512xf32>
    %293 = arith.truncf %250 : vector<8x128xf32> to vector<8x128xbf16>
    %cst_78 = arith.constant dense<0.000000e+00> : vector<8x512xf32>
    %294 = tpu.matmul %293, %3, %cst_78 {dimension_numbers = #tpu.dot_dimension_numbers<[1], [0], [0], [1], [0, 0, 1, 1], [], []>} : vector<8x128xbf16>, vector<128x512xbf16>, vector<8x512xf32> -> vector<8x512xf32>
    %295 = arith.addf %292, %294 : vector<8x512xf32>
    %296 = vector.extract_strided_slice %295 {offsets = [0, 0], sizes = [8, 128], strides = [1, 1]} : vector<8x512xf32> to vector<8x128xf32>
    %297 = arith.negf %296 : vector<8x128xf32>
    %298 = math.exp %297 : vector<8x128xf32>
    %cst_79 = arith.constant 1.000000e+00 : f32
    %299 = vector.broadcast %cst_79 : f32 to vector<8x128xf32>
    %300 = arith.addf %299, %298 : vector<8x128xf32>
    %301 = arith.divf %299, %300 : vector<8x128xf32>
    %302 = vector.extract_strided_slice %295 {offsets = [0, 128], sizes = [8, 128], strides = [1, 1]} : vector<8x512xf32> to vector<8x128xf32>
    %303 = arith.negf %302 : vector<8x128xf32>
    %304 = math.exp %303 : vector<8x128xf32>
    %cst_80 = arith.constant 1.000000e+00 : f32
    %305 = vector.broadcast %cst_80 : f32 to vector<8x128xf32>
    %306 = arith.addf %305, %304 : vector<8x128xf32>
    %307 = arith.divf %305, %306 : vector<8x128xf32>
    %308 = vector.extract_strided_slice %295 {offsets = [0, 256], sizes = [8, 128], strides = [1, 1]} : vector<8x512xf32> to vector<8x128xf32>
    %309 = math.tanh %308 : vector<8x128xf32>
    %310 = vector.extract_strided_slice %295 {offsets = [0, 384], sizes = [8, 128], strides = [1, 1]} : vector<8x512xf32> to vector<8x128xf32>
    %311 = arith.negf %310 : vector<8x128xf32>
    %312 = math.exp %311 : vector<8x128xf32>
    %cst_81 = arith.constant 1.000000e+00 : f32
    %313 = vector.broadcast %cst_81 : f32 to vector<8x128xf32>
    %314 = arith.addf %313, %312 : vector<8x128xf32>
    %315 = arith.divf %313, %314 : vector<8x128xf32>
    %316 = arith.mulf %307, %248 : vector<8x128xf32>
    %317 = arith.mulf %301, %309 : vector<8x128xf32>
    %318 = arith.addf %316, %317 : vector<8x128xf32>
    %319 = math.tanh %318 : vector<8x128xf32>
    %320 = arith.mulf %315, %319 : vector<8x128xf32>
    %321 = arith.index_cast %c4_i32 : i32 to index
    %c0_82 = arith.constant 0 : index
    %c0_83 = arith.constant 0 : index
    %322 = vector.load %arg2[%321, %c0_82, %c0_83] : memref<8x8x128xf32, #tpu.memory_space<vmem>>, vector<1x8x128xf32>
    %323 = vector.shape_cast %322 : vector<1x8x128xf32> to vector<8x128xf32>
    %324 = arith.addf %320, %323 : vector<8x128xf32>
    %cst_84 = arith.constant dense<0.000000e+00> : vector<8xf32>
    %325 = vector.multi_reduction <add>, %324, %cst_84 [1] : vector<8x128xf32> to vector<8xf32>
    %326 = vector.shape_cast %325 : vector<8xf32> to vector<8x1xf32>
    %cst_85 = arith.constant 3.125000e-02 : f32
    %327 = vector.broadcast %cst_85 : f32 to vector<8x1xf32>
    %328 = arith.mulf %326, %327 : vector<8x1xf32>
    %329 = vector.broadcast %328 : vector<8x1xf32> to vector<8x128xf32>
    %330 = arith.subf %324, %329 : vector<8x128xf32>
    %331 = arith.mulf %330, %330 : vector<8x128xf32>
    %cst_86 = arith.constant dense<0.000000e+00> : vector<8xf32>
    %332 = vector.multi_reduction <add>, %331, %cst_86 [1] : vector<8x128xf32> to vector<8xf32>
    %333 = vector.shape_cast %332 : vector<8xf32> to vector<8x1xf32>
    %cst_87 = arith.constant 9.600000e+01 : f32
    %334 = vector.broadcast %cst_87 : f32 to vector<8x1xf32>
    %335 = arith.mulf %334, %328 : vector<8x1xf32>
    %336 = arith.mulf %335, %328 : vector<8x1xf32>
    %337 = arith.subf %333, %336 : vector<8x1xf32>
    %cst_88 = arith.constant 3.125000e-02 : f32
    %338 = vector.broadcast %cst_88 : f32 to vector<8x1xf32>
    %339 = arith.mulf %337, %338 : vector<8x1xf32>
    %cst_89 = arith.constant 9.99999974E-6 : f32
    %340 = vector.broadcast %cst_89 : f32 to vector<8x1xf32>
    %341 = arith.addf %339, %340 : vector<8x1xf32>
    %342 = math.rsqrt %341 : vector<8x1xf32>
    %343 = vector.broadcast %342 : vector<8x1xf32> to vector<8x128xf32>
    %344 = vector.broadcast %4 : vector<1x128xf32> to vector<8x128xf32>
    %345 = arith.mulf %343, %344 : vector<8x128xf32>
    %346 = arith.addi %7, %c4_i32 : i32
    %347 = vector.broadcast %346 : i32 to vector<8x1xi32>
    %348 = arith.cmpi slt, %347, %6 : vector<8x1xi32>
    %349 = arith.extui %348 : vector<8x1xi1> to vector<8x1xi32>
    %350 = arith.sitofp %349 : vector<8x1xi32> to vector<8x1xf32>
    %351 = arith.mulf %330, %345 : vector<8x128xf32>
    %352 = vector.broadcast %5 : vector<1x128xf32> to vector<8x128xf32>
    %353 = arith.addf %351, %352 : vector<8x128xf32>
    %354 = vector.broadcast %350 : vector<8x1xf32> to vector<8x128xf32>
    %355 = arith.mulf %353, %354 : vector<8x128xf32>
    %356 = arith.index_cast %c4_i32 : i32 to index
    %c0_90 = arith.constant 0 : index
    %c0_91 = arith.constant 0 : index
    %357 = vector.load %arg7[%356, %c0_90, %c0_91] : memref<8x8x128xf32, #tpu.memory_space<vmem>>, vector<1x8x128xf32>
    %358 = vector.shape_cast %357 : vector<1x8x128xf32> to vector<8x128xf32>
    %359 = vector.shape_cast %355 : vector<8x128xf32> to vector<1x8x128xf32>
    tpu.vector_store %arg7[%356, %c0_90, %c0_91], %359 {strides = array<i32>} : memref<8x8x128xf32, #tpu.memory_space<vmem>>, vector<1x8x128xf32>,
    %c5_i32 = arith.constant 5 : i32
    %360 = arith.index_cast %c5_i32 : i32 to index
    %c0_92 = arith.constant 0 : index
    %c0_93 = arith.constant 0 : index
    %361 = vector.load %arg1[%360, %c0_92, %c0_93] : memref<8x8x512xf32, #tpu.memory_space<vmem>>, vector<1x8x512xf32>
    %362 = vector.shape_cast %361 : vector<1x8x512xf32> to vector<8x512xf32>
    %363 = arith.truncf %320 : vector<8x128xf32> to vector<8x128xbf16>
    %cst_94 = arith.constant dense<0.000000e+00> : vector<8x512xf32>
    %364 = tpu.matmul %363, %3, %cst_94 {dimension_numbers = #tpu.dot_dimension_numbers<[1], [0], [0], [1], [0, 0, 1, 1], [], []>} : vector<8x128xbf16>, vector<128x512xbf16>, vector<8x512xf32> -> vector<8x512xf32>
    %365 = arith.addf %362, %364 : vector<8x512xf32>
    %366 = vector.extract_strided_slice %365 {offsets = [0, 0], sizes = [8, 128], strides = [1, 1]} : vector<8x512xf32> to vector<8x128xf32>
    %367 = arith.negf %366 : vector<8x128xf32>
    %368 = math.exp %367 : vector<8x128xf32>
    %cst_95 = arith.constant 1.000000e+00 : f32
    %369 = vector.broadcast %cst_95 : f32 to vector<8x128xf32>
    %370 = arith.addf %369, %368 : vector<8x128xf32>
    %371 = arith.divf %369, %370 : vector<8x128xf32>
    %372 = vector.extract_strided_slice %365 {offsets = [0, 128], sizes = [8, 128], strides = [1, 1]} : vector<8x512xf32> to vector<8x128xf32>
    %373 = arith.negf %372 : vector<8x128xf32>
    %374 = math.exp %373 : vector<8x128xf32>
    %cst_96 = arith.constant 1.000000e+00 : f32
    %375 = vector.broadcast %cst_96 : f32 to vector<8x128xf32>
    %376 = arith.addf %375, %374 : vector<8x128xf32>
    %377 = arith.divf %375, %376 : vector<8x128xf32>
    %378 = vector.extract_strided_slice %365 {offsets = [0, 256], sizes = [8, 128], strides = [1, 1]} : vector<8x512xf32> to vector<8x128xf32>
    %379 = math.tanh %378 : vector<8x128xf32>
    %380 = vector.extract_strided_slice %365 {offsets = [0, 384], sizes = [8, 128], strides = [1, 1]} : vector<8x512xf32> to vector<8x128xf32>
    %381 = arith.negf %380 : vector<8x128xf32>
    %382 = math.exp %381 : vector<8x128xf32>
    %cst_97 = arith.constant 1.000000e+00 : f32
    %383 = vector.broadcast %cst_97 : f32 to vector<8x128xf32>
    %384 = arith.addf %383, %382 : vector<8x128xf32>
    %385 = arith.divf %383, %384 : vector<8x128xf32>
    %386 = arith.mulf %377, %318 : vector<8x128xf32>
    %387 = arith.mulf %371, %379 : vector<8x128xf32>
    %388 = arith.addf %386, %387 : vector<8x128xf32>
    %389 = math.tanh %388 : vector<8x128xf32>
    %390 = arith.mulf %385, %389 : vector<8x128xf32>
    %391 = arith.index_cast %c5_i32 : i32 to index
    %c0_98 = arith.constant 0 : index
    %c0_99 = arith.constant 0 : index
    %392 = vector.load %arg2[%391, %c0_98, %c0_99] : memref<8x8x128xf32, #tpu.memory_space<vmem>>, vector<1x8x128xf32>
    %393 = vector.shape_cast %392 : vector<1x8x128xf32> to vector<8x128xf32>
    %394 = arith.addf %390, %393 : vector<8x128xf32>
    %cst_100 = arith.constant dense<0.000000e+00> : vector<8xf32>
    %395 = vector.multi_reduction <add>, %394, %cst_100 [1] : vector<8x128xf32> to vector<8xf32>
    %396 = vector.shape_cast %395 : vector<8xf32> to vector<8x1xf32>
    %cst_101 = arith.constant 3.125000e-02 : f32
    %397 = vector.broadcast %cst_101 : f32 to vector<8x1xf32>
    %398 = arith.mulf %396, %397 : vector<8x1xf32>
    %399 = vector.broadcast %398 : vector<8x1xf32> to vector<8x128xf32>
    %400 = arith.subf %394, %399 : vector<8x128xf32>
    %401 = arith.mulf %400, %400 : vector<8x128xf32>
    %cst_102 = arith.constant dense<0.000000e+00> : vector<8xf32>
    %402 = vector.multi_reduction <add>, %401, %cst_102 [1] : vector<8x128xf32> to vector<8xf32>
    %403 = vector.shape_cast %402 : vector<8xf32> to vector<8x1xf32>
    %cst_103 = arith.constant 9.600000e+01 : f32
    %404 = vector.broadcast %cst_103 : f32 to vector<8x1xf32>
    %405 = arith.mulf %404, %398 : vector<8x1xf32>
    %406 = arith.mulf %405, %398 : vector<8x1xf32>
    %407 = arith.subf %403, %406 : vector<8x1xf32>
    %cst_104 = arith.constant 3.125000e-02 : f32
    %408 = vector.broadcast %cst_104 : f32 to vector<8x1xf32>
    %409 = arith.mulf %407, %408 : vector<8x1xf32>
    %cst_105 = arith.constant 9.99999974E-6 : f32
    %410 = vector.broadcast %cst_105 : f32 to vector<8x1xf32>
    %411 = arith.addf %409, %410 : vector<8x1xf32>
    %412 = math.rsqrt %411 : vector<8x1xf32>
    %413 = vector.broadcast %412 : vector<8x1xf32> to vector<8x128xf32>
    %414 = vector.broadcast %4 : vector<1x128xf32> to vector<8x128xf32>
    %415 = arith.mulf %413, %414 : vector<8x128xf32>
    %416 = arith.addi %7, %c5_i32 : i32
    %417 = vector.broadcast %416 : i32 to vector<8x1xi32>
    %418 = arith.cmpi slt, %417, %6 : vector<8x1xi32>
    %419 = arith.extui %418 : vector<8x1xi1> to vector<8x1xi32>
    %420 = arith.sitofp %419 : vector<8x1xi32> to vector<8x1xf32>
    %421 = arith.mulf %400, %415 : vector<8x128xf32>
    %422 = vector.broadcast %5 : vector<1x128xf32> to vector<8x128xf32>
    %423 = arith.addf %421, %422 : vector<8x128xf32>
    %424 = vector.broadcast %420 : vector<8x1xf32> to vector<8x128xf32>
    %425 = arith.mulf %423, %424 : vector<8x128xf32>
    %426 = arith.index_cast %c5_i32 : i32 to index
    %c0_106 = arith.constant 0 : index
    %c0_107 = arith.constant 0 : index
    %427 = vector.load %arg7[%426, %c0_106, %c0_107] : memref<8x8x128xf32, #tpu.memory_space<vmem>>, vector<1x8x128xf32>
    %428 = vector.shape_cast %427 : vector<1x8x128xf32> to vector<8x128xf32>
    %429 = vector.shape_cast %425 : vector<8x128xf32> to vector<1x8x128xf32>
    tpu.vector_store %arg7[%426, %c0_106, %c0_107], %429 {strides = array<i32>} : memref<8x8x128xf32, #tpu.memory_space<vmem>>, vector<1x8x128xf32>,
    %c6_i32 = arith.constant 6 : i32
    %430 = arith.index_cast %c6_i32 : i32 to index
    %c0_108 = arith.constant 0 : index
    %c0_109 = arith.constant 0 : index
    %431 = vector.load %arg1[%430, %c0_108, %c0_109] : memref<8x8x512xf32, #tpu.memory_space<vmem>>, vector<1x8x512xf32>
    %432 = vector.shape_cast %431 : vector<1x8x512xf32> to vector<8x512xf32>
    %433 = arith.truncf %390 : vector<8x128xf32> to vector<8x128xbf16>
    %cst_110 = arith.constant dense<0.000000e+00> : vector<8x512xf32>
    %434 = tpu.matmul %433, %3, %cst_110 {dimension_numbers = #tpu.dot_dimension_numbers<[1], [0], [0], [1], [0, 0, 1, 1], [], []>} : vector<8x128xbf16>, vector<128x512xbf16>, vector<8x512xf32> -> vector<8x512xf32>
    %435 = arith.addf %432, %434 : vector<8x512xf32>
    %436 = vector.extract_strided_slice %435 {offsets = [0, 0], sizes = [8, 128], strides = [1, 1]} : vector<8x512xf32> to vector<8x128xf32>
    %437 = arith.negf %436 : vector<8x128xf32>
    %438 = math.exp %437 : vector<8x128xf32>
    %cst_111 = arith.constant 1.000000e+00 : f32
    %439 = vector.broadcast %cst_111 : f32 to vector<8x128xf32>
    %440 = arith.addf %439, %438 : vector<8x128xf32>
    %441 = arith.divf %439, %440 : vector<8x128xf32>
    %442 = vector.extract_strided_slice %435 {offsets = [0, 128], sizes = [8, 128], strides = [1, 1]} : vector<8x512xf32> to vector<8x128xf32>
    %443 = arith.negf %442 : vector<8x128xf32>
    %444 = math.exp %443 : vector<8x128xf32>
    %cst_112 = arith.constant 1.000000e+00 : f32
    %445 = vector.broadcast %cst_112 : f32 to vector<8x128xf32>
    %446 = arith.addf %445, %444 : vector<8x128xf32>
    %447 = arith.divf %445, %446 : vector<8x128xf32>
    %448 = vector.extract_strided_slice %435 {offsets = [0, 256], sizes = [8, 128], strides = [1, 1]} : vector<8x512xf32> to vector<8x128xf32>
    %449 = math.tanh %448 : vector<8x128xf32>
    %450 = vector.extract_strided_slice %435 {offsets = [0, 384], sizes = [8, 128], strides = [1, 1]} : vector<8x512xf32> to vector<8x128xf32>
    %451 = arith.negf %450 : vector<8x128xf32>
    %452 = math.exp %451 : vector<8x128xf32>
    %cst_113 = arith.constant 1.000000e+00 : f32
    %453 = vector.broadcast %cst_113 : f32 to vector<8x128xf32>
    %454 = arith.addf %453, %452 : vector<8x128xf32>
    %455 = arith.divf %453, %454 : vector<8x128xf32>
    %456 = arith.mulf %447, %388 : vector<8x128xf32>
    %457 = arith.mulf %441, %449 : vector<8x128xf32>
    %458 = arith.addf %456, %457 : vector<8x128xf32>
    %459 = math.tanh %458 : vector<8x128xf32>
    %460 = arith.mulf %455, %459 : vector<8x128xf32>
    %461 = arith.index_cast %c6_i32 : i32 to index
    %c0_114 = arith.constant 0 : index
    %c0_115 = arith.constant 0 : index
    %462 = vector.load %arg2[%461, %c0_114, %c0_115] : memref<8x8x128xf32, #tpu.memory_space<vmem>>, vector<1x8x128xf32>
    %463 = vector.shape_cast %462 : vector<1x8x128xf32> to vector<8x128xf32>
    %464 = arith.addf %460, %463 : vector<8x128xf32>
    %cst_116 = arith.constant dense<0.000000e+00> : vector<8xf32>
    %465 = vector.multi_reduction <add>, %464, %cst_116 [1] : vector<8x128xf32> to vector<8xf32>
    %466 = vector.shape_cast %465 : vector<8xf32> to vector<8x1xf32>
    %cst_117 = arith.constant 3.125000e-02 : f32
    %467 = vector.broadcast %cst_117 : f32 to vector<8x1xf32>
    %468 = arith.mulf %466, %467 : vector<8x1xf32>
    %469 = vector.broadcast %468 : vector<8x1xf32> to vector<8x128xf32>
    %470 = arith.subf %464, %469 : vector<8x128xf32>
    %471 = arith.mulf %470, %470 : vector<8x128xf32>
    %cst_118 = arith.constant dense<0.000000e+00> : vector<8xf32>
    %472 = vector.multi_reduction <add>, %471, %cst_118 [1] : vector<8x128xf32> to vector<8xf32>
    %473 = vector.shape_cast %472 : vector<8xf32> to vector<8x1xf32>
    %cst_119 = arith.constant 9.600000e+01 : f32
    %474 = vector.broadcast %cst_119 : f32 to vector<8x1xf32>
    %475 = arith.mulf %474, %468 : vector<8x1xf32>
    %476 = arith.mulf %475, %468 : vector<8x1xf32>
    %477 = arith.subf %473, %476 : vector<8x1xf32>
    %cst_120 = arith.constant 3.125000e-02 : f32
    %478 = vector.broadcast %cst_120 : f32 to vector<8x1xf32>
    %479 = arith.mulf %477, %478 : vector<8x1xf32>
    %cst_121 = arith.constant 9.99999974E-6 : f32
    %480 = vector.broadcast %cst_121 : f32 to vector<8x1xf32>
    %481 = arith.addf %479, %480 : vector<8x1xf32>
    %482 = math.rsqrt %481 : vector<8x1xf32>
    %483 = vector.broadcast %482 : vector<8x1xf32> to vector<8x128xf32>
    %484 = vector.broadcast %4 : vector<1x128xf32> to vector<8x128xf32>
    %485 = arith.mulf %483, %484 : vector<8x128xf32>
    %486 = arith.addi %7, %c6_i32 : i32
    %487 = vector.broadcast %486 : i32 to vector<8x1xi32>
    %488 = arith.cmpi slt, %487, %6 : vector<8x1xi32>
    %489 = arith.extui %488 : vector<8x1xi1> to vector<8x1xi32>
    %490 = arith.sitofp %489 : vector<8x1xi32> to vector<8x1xf32>
    %491 = arith.mulf %470, %485 : vector<8x128xf32>
    %492 = vector.broadcast %5 : vector<1x128xf32> to vector<8x128xf32>
    %493 = arith.addf %491, %492 : vector<8x128xf32>
    %494 = vector.broadcast %490 : vector<8x1xf32> to vector<8x128xf32>
    %495 = arith.mulf %493, %494 : vector<8x128xf32>
    %496 = arith.index_cast %c6_i32 : i32 to index
    %c0_122 = arith.constant 0 : index
    %c0_123 = arith.constant 0 : index
    %497 = vector.load %arg7[%496, %c0_122, %c0_123] : memref<8x8x128xf32, #tpu.memory_space<vmem>>, vector<1x8x128xf32>
    %498 = vector.shape_cast %497 : vector<1x8x128xf32> to vector<8x128xf32>
    %499 = vector.shape_cast %495 : vector<8x128xf32> to vector<1x8x128xf32>
    tpu.vector_store %arg7[%496, %c0_122, %c0_123], %499 {strides = array<i32>} : memref<8x8x128xf32, #tpu.memory_space<vmem>>, vector<1x8x128xf32>,
    %c7_i32 = arith.constant 7 : i32
    %500 = arith.index_cast %c7_i32 : i32 to index
    %c0_124 = arith.constant 0 : index
    %c0_125 = arith.constant 0 : index
    %501 = vector.load %arg1[%500, %c0_124, %c0_125] : memref<8x8x512xf32, #tpu.memory_space<vmem>>, vector<1x8x512xf32>
    %502 = vector.shape_cast %501 : vector<1x8x512xf32> to vector<8x512xf32>
    %503 = arith.truncf %460 : vector<8x128xf32> to vector<8x128xbf16>
    %cst_126 = arith.constant dense<0.000000e+00> : vector<8x512xf32>
    %504 = tpu.matmul %503, %3, %cst_126 {dimension_numbers = #tpu.dot_dimension_numbers<[1], [0], [0], [1], [0, 0, 1, 1], [], []>} : vector<8x128xbf16>, vector<128x512xbf16>, vector<8x512xf32> -> vector<8x512xf32>
    %505 = arith.addf %502, %504 : vector<8x512xf32>
    %506 = vector.extract_strided_slice %505 {offsets = [0, 0], sizes = [8, 128], strides = [1, 1]} : vector<8x512xf32> to vector<8x128xf32>
    %507 = arith.negf %506 : vector<8x128xf32>
    %508 = math.exp %507 : vector<8x128xf32>
    %cst_127 = arith.constant 1.000000e+00 : f32
    %509 = vector.broadcast %cst_127 : f32 to vector<8x128xf32>
    %510 = arith.addf %509, %508 : vector<8x128xf32>
    %511 = arith.divf %509, %510 : vector<8x128xf32>
    %512 = vector.extract_strided_slice %505 {offsets = [0, 128], sizes = [8, 128], strides = [1, 1]} : vector<8x512xf32> to vector<8x128xf32>
    %513 = arith.negf %512 : vector<8x128xf32>
    %514 = math.exp %513 : vector<8x128xf32>
    %cst_128 = arith.constant 1.000000e+00 : f32
    %515 = vector.broadcast %cst_128 : f32 to vector<8x128xf32>
    %516 = arith.addf %515, %514 : vector<8x128xf32>
    %517 = arith.divf %515, %516 : vector<8x128xf32>
    %518 = vector.extract_strided_slice %505 {offsets = [0, 256], sizes = [8, 128], strides = [1, 1]} : vector<8x512xf32> to vector<8x128xf32>
    %519 = math.tanh %518 : vector<8x128xf32>
    %520 = vector.extract_strided_slice %505 {offsets = [0, 384], sizes = [8, 128], strides = [1, 1]} : vector<8x512xf32> to vector<8x128xf32>
    %521 = arith.negf %520 : vector<8x128xf32>
    %522 = math.exp %521 : vector<8x128xf32>
    %cst_129 = arith.constant 1.000000e+00 : f32
    %523 = vector.broadcast %cst_129 : f32 to vector<8x128xf32>
    %524 = arith.addf %523, %522 : vector<8x128xf32>
    %525 = arith.divf %523, %524 : vector<8x128xf32>
    %526 = arith.mulf %517, %458 : vector<8x128xf32>
    %527 = arith.mulf %511, %519 : vector<8x128xf32>
    %528 = arith.addf %526, %527 : vector<8x128xf32>
    %529 = math.tanh %528 : vector<8x128xf32>
    %530 = arith.mulf %525, %529 : vector<8x128xf32>
    %531 = arith.index_cast %c7_i32 : i32 to index
    %c0_130 = arith.constant 0 : index
    %c0_131 = arith.constant 0 : index
    %532 = vector.load %arg2[%531, %c0_130, %c0_131] : memref<8x8x128xf32, #tpu.memory_space<vmem>>, vector<1x8x128xf32>
    %533 = vector.shape_cast %532 : vector<1x8x128xf32> to vector<8x128xf32>
    %534 = arith.addf %530, %533 : vector<8x128xf32>
    %cst_132 = arith.constant dense<0.000000e+00> : vector<8xf32>
    %535 = vector.multi_reduction <add>, %534, %cst_132 [1] : vector<8x128xf32> to vector<8xf32>
    %536 = vector.shape_cast %535 : vector<8xf32> to vector<8x1xf32>
    %cst_133 = arith.constant 3.125000e-02 : f32
    %537 = vector.broadcast %cst_133 : f32 to vector<8x1xf32>
    %538 = arith.mulf %536, %537 : vector<8x1xf32>
    %539 = vector.broadcast %538 : vector<8x1xf32> to vector<8x128xf32>
    %540 = arith.subf %534, %539 : vector<8x128xf32>
    %541 = arith.mulf %540, %540 : vector<8x128xf32>
    %cst_134 = arith.constant dense<0.000000e+00> : vector<8xf32>
    %542 = vector.multi_reduction <add>, %541, %cst_134 [1] : vector<8x128xf32> to vector<8xf32>
    %543 = vector.shape_cast %542 : vector<8xf32> to vector<8x1xf32>
    %cst_135 = arith.constant 9.600000e+01 : f32
    %544 = vector.broadcast %cst_135 : f32 to vector<8x1xf32>
    %545 = arith.mulf %544, %538 : vector<8x1xf32>
    %546 = arith.mulf %545, %538 : vector<8x1xf32>
    %547 = arith.subf %543, %546 : vector<8x1xf32>
    %cst_136 = arith.constant 3.125000e-02 : f32
    %548 = vector.broadcast %cst_136 : f32 to vector<8x1xf32>
    %549 = arith.mulf %547, %548 : vector<8x1xf32>
    %cst_137 = arith.constant 9.99999974E-6 : f32
    %550 = vector.broadcast %cst_137 : f32 to vector<8x1xf32>
    %551 = arith.addf %549, %550 : vector<8x1xf32>
    %552 = math.rsqrt %551 : vector<8x1xf32>
    %553 = vector.broadcast %552 : vector<8x1xf32> to vector<8x128xf32>
    %554 = vector.broadcast %4 : vector<1x128xf32> to vector<8x128xf32>
    %555 = arith.mulf %553, %554 : vector<8x128xf32>
    %556 = arith.addi %7, %c7_i32 : i32
    %557 = vector.broadcast %556 : i32 to vector<8x1xi32>
    %558 = arith.cmpi slt, %557, %6 : vector<8x1xi32>
    %559 = arith.extui %558 : vector<8x1xi1> to vector<8x1xi32>
    %560 = arith.sitofp %559 : vector<8x1xi32> to vector<8x1xf32>
    %561 = arith.mulf %540, %555 : vector<8x128xf32>
    %562 = vector.broadcast %5 : vector<1x128xf32> to vector<8x128xf32>
    %563 = arith.addf %561, %562 : vector<8x128xf32>
    %564 = vector.broadcast %560 : vector<8x1xf32> to vector<8x128xf32>
    %565 = arith.mulf %563, %564 : vector<8x128xf32>
    %566 = arith.index_cast %c7_i32 : i32 to index
    %c0_138 = arith.constant 0 : index
    %c0_139 = arith.constant 0 : index
    %567 = vector.load %arg7[%566, %c0_138, %c0_139] : memref<8x8x128xf32, #tpu.memory_space<vmem>>, vector<1x8x128xf32>
    %568 = vector.shape_cast %567 : vector<1x8x128xf32> to vector<8x128xf32>
    %569 = vector.shape_cast %565 : vector<8x128xf32> to vector<1x8x128xf32>
    tpu.vector_store %arg7[%566, %c0_138, %c0_139], %569 {strides = array<i32>} : memref<8x8x128xf32, #tpu.memory_space<vmem>>, vector<1x8x128xf32>,
    %c8_i32_140 = arith.constant 8 : i32
    %c0_141 = arith.constant 0 : index
    %c0_142 = arith.constant 0 : index
    %570 = vector.load %arg8[%c0_141, %c0_142] : memref<8x128xf32, #tpu.memory_space<vmem>>, vector<8x128xf32>
    tpu.vector_store %arg8[%c0_141, %c0_142], %530 {strides = array<i32>} : memref<8x128xf32, #tpu.memory_space<vmem>>, vector<8x128xf32>,
    %c0_143 = arith.constant 0 : index
    %c0_144 = arith.constant 0 : index
    %571 = vector.load %arg9[%c0_143, %c0_144] : memref<8x128xf32, #tpu.memory_space<vmem>>, vector<8x128xf32>
    tpu.vector_store %arg9[%c0_143, %c0_144], %528 {strides = array<i32>} : memref<8x128xf32, #tpu.memory_space<vmem>>, vector<8x128xf32>,
    return
  }
  func.func @transform_0(%arg0: i32) -> (i32, i32, i32) {
    %c0_i32 = arith.constant 0 : i32
    %c0_i32_0 = arith.constant 0 : i32
    %c0_i32_1 = arith.constant 0 : i32
    return %arg0, %c0_i32, %c0_i32_0 : i32, i32, i32
  }
  func.func @transform_1(%arg0: i32) -> (i32, i32, i32) {
    %c0_i32 = arith.constant 0 : i32
    %c0_i32_0 = arith.constant 0 : i32
    %c0_i32_1 = arith.constant 0 : i32
    return %arg0, %c0_i32, %c0_i32_0 : i32, i32, i32
  }
  func.func @transform_2(%arg0: i32) -> (i32, i32) {
    %c0_i32 = arith.constant 0 : i32
    %c0_i32_0 = arith.constant 0 : i32
    %c0_i32_1 = arith.constant 0 : i32
    return %c0_i32, %c0_i32_0 : i32, i32
  }
  func.func @transform_3(%arg0: i32) -> (i32, i32) {
    %c0_i32 = arith.constant 0 : i32
    %c0_i32_0 = arith.constant 0 : i32
    %c0_i32_1 = arith.constant 0 : i32
    return %c0_i32, %c0_i32_0 : i32, i32
  }
  func.func @transform_4(%arg0: i32) -> (i32, i32) {
    %c0_i32 = arith.constant 0 : i32
    %c0_i32_0 = arith.constant 0 : i32
    %c0_i32_1 = arith.constant 0 : i32
    return %c0_i32, %c0_i32_0 : i32, i32
  }
  func.func @transform_5(%arg0: i32) -> (i32, i32) {
    %c0_i32 = arith.constant 0 : i32
    %c0_i32_0 = arith.constant 0 : i32
    %c0_i32_1 = arith.constant 0 : i32
    return %c0_i32, %c0_i32_0 : i32, i32
  }
  func.func @transform_6(%arg0: i32) -> (i32, i32, i32) {
    %c0_i32 = arith.constant 0 : i32
    %c0_i32_0 = arith.constant 0 : i32
    %c0_i32_1 = arith.constant 0 : i32
    return %arg0, %c0_i32, %c0_i32_0 : i32, i32, i32
  }
}

</mosaic_0001>

<bundles_post_ra>
// kernel: _listener_forward_padded.2
= control target key start
LH: loop header
LB: loop body
LE: loop exit
PB: predicated region body
PF: predicated region fallthrough
CT: control target
= control target key end

     0   :  { %v1791_v1 = vmov 0   ;;  %v1792_v33 = vmov 0.0|0.0   ;;  %s2694_s2 = inlined_call_operand.vmem [shape: bf16[128,512], index: 2, kind: input, shape index: {}]   ;;  %s2695_s0 = inlined_call_operand.vmem [shape: f32[8,8,512], index: 0, kind: input, shape index: {}]   ;;  %s2696_s1 = inlined_call_operand.vmem [shape: f32[8,8,128], index: 1, kind: input, shape index: {}]   ;;  %s2697_s5 = inlined_call_operand.vmem [shape: s32[8,1], index: 5, kind: input, shape index: {}]   ;;  %s2698_s3 = inlined_call_operand.vmem [shape: f32[1,128], index: 3, kind: input, shape index: {}]   ;;  %s2699_s4 = inlined_call_operand.vmem [shape: f32[1,128], index: 4, kind: input, shape index: {}]   ;;  %s2700_s6 = inlined_call_operand.vmem [shape: f32[8,8,128], index: 6, kind: output, shape index: {}]  }
   0x1   :  { %v1832_v0 = vld [vmem:[%s2694_s2 + $0x4] ss:$16 sps:$4 sm:$0xff]   ;;  %265 = vmatprep.mubr.bf16.mxu0 %v1791_v1  ;;  %306 = vmatprep.mubr.bf16.mxu1 %v1791_v1  ;;  %v1839_v2 = vld [vmem:[%s2694_s2] ss:$16 sps:$4 sm:$0xff]   ;;  %v1864_v6 = vld [vmem:[%s2694_s2 + $0xc] ss:$16 sps:$4 sm:$0xff]  }
   0x2   :  { %1545 = vset.pattern.permute.xlu0 %v1791_v1  ;;  %1551 = vset.pattern.permute.xlu1 %v1791_v1  ;;  %v1847_v3 = vld [vmem:[%s2694_s2 + $0x24] ss:$16 sps:$4 sm:$0xff]   ;;  %v1853_v4 = vld [vmem:[%s2694_s2 + $0x20] ss:$16 sps:$4 sm:$0xff]   ;;  %v1869_v7 = vld [vmem:[%s2694_s2 + $0x8] ss:$16 sps:$4 sm:$0xff]  }
   0x3   :  { %233 = vmatprep.subr.bf16.mxu0 %v1832_v0  ;;  %v1859_v5 = vld [vmem:[%s2694_s2 + $0x44] ss:$16 sps:$4 sm:$0xff]   ;;  %v1875_v8 = vld [vmem:[%s2694_s2 + $0x40] ss:$16 sps:$4 sm:$0xff]   ;;  %274 = vmatprep.subr.bf16.mxu1 %v1864_v6  ;;  %v1888_v10 = vld [vmem:[%s2694_s2 + $0x2c] ss:$16 sps:$4 sm:$0xff]  }
   0x4   :  { %234 = vmatpush1.bf16.msra.mxu0 %v1839_v2  ;;  %v1882_v9 = vld [vmem:[%s2694_s2 + $0x64] ss:$16 sps:$4 sm:$0xff]   ;;  %275 = vmatpush1.bf16.msra.mxu1 %v1869_v7  ;;  %v1893_v11 = vld [vmem:[%s2694_s2 + $0x28] ss:$16 sps:$4 sm:$0xff]   ;;  %v1900_v12 = vld [vmem:[%s2694_s2 + $0x60] ss:$16 sps:$4 sm:$0xff]  }
   0x5   :  { %235 = vmatprep.subr.bf16.mxu0 %v1847_v3  ;;  %276 = vmatprep.subr.bf16.mxu1 %v1888_v10  ;;  %v1905_v13 = vld [vmem:[%s2694_s2 + $0x84] ss:$16 sps:$4 sm:$0xff]   ;;  %v1910_v14 = vld [vmem:[%s2694_s2 + $0x4c] ss:$16 sps:$4 sm:$0xff]   ;;  %v1917_v15 = vld [vmem:[%s2694_s2 + $0x48] ss:$16 sps:$4 sm:$0xff]  }
   0x6   :  { %v1923_v16 = vld [vmem:[%s2694_s2 + $0x6c] ss:$16 sps:$4 sm:$0xff]   ;;  %v1929_v17 = vld [vmem:[%s2694_s2 + $0x80] ss:$16 sps:$4 sm:$0xff]   ;;  %v1935_v18 = vld [vmem:[%s2694_s2 + $0xa4] ss:$16 sps:$4 sm:$0xff]  }
   0x7   :  { %v1941_v19 = vld [vmem:[%s2694_s2 + $0x68] ss:$16 sps:$4 sm:$0xff]   ;;  %v1947_v20 = vld [vmem:[%s2694_s2 + $0x8c] ss:$16 sps:$4 sm:$0xff]   ;;  %v1953_v21 = vld [vmem:[%s2694_s2 + $0xa0] ss:$16 sps:$4 sm:$0xff]  }
   0x8   :  { %236 = vmatpush1.bf16.msra.mxu0 %v1853_v4  ;;  %277 = vmatpush1.bf16.msra.mxu1 %v1893_v11  ;;  %v1958_v22 = vld [vmem:[%s2694_s2 + $0xc4] ss:$16 sps:$4 sm:$0xff]   ;;  %v1965_v23 = vld [vmem:[%s2694_s2 + $0x88] ss:$16 sps:$4 sm:$0xff]   ;;  %v1971_v24 = vld [vmem:[%s2694_s2 + $0xac] ss:$16 sps:$4 sm:$0xff]  }
   0x9   :  { %237 = vmatprep.subr.bf16.mxu0 %v1859_v5  ;;  %278 = vmatprep.subr.bf16.mxu1 %v1910_v14  ;;  %v1977_v25 = vld [vmem:[%s2694_s2 + $0xc0] ss:$16 sps:$4 sm:$0xff]   ;;  %v1983_v26 = vld [vmem:[%s2694_s2 + $0xe4] ss:$16 sps:$4 sm:$0xff]   ;;  %v1989_v27 = vld [vmem:[%s2694_s2 + $0xa8] ss:$16 sps:$4 sm:$0xff]  }
   0xa   :  { %v1995_v28 = vld [vmem:[%s2694_s2 + $0xcc] ss:$16 sps:$4 sm:$0xff]   ;;  %v2001_v29 = vld [vmem:[%s2694_s2 + $0xe0] ss:$16 sps:$4 sm:$0xff]   ;;  %v2008_v30 = vld [vmem:[%s2694_s2 + $0xc8] ss:$16 sps:$4 sm:$0xff]  }
   0xb   :  { %v2014_v31 = vld [vmem:[%s2694_s2 + $0xec] ss:$16 sps:$4 sm:$0xff]   ;;  %v2021_v32 = vld [vmem:[%s2694_s2 + $0xe8] ss:$16 sps:$4 sm:$0xff]   ;;  %v68_v34 = vld [vmem:[%s2695_s0] sm:$0xff] }
   0xc   :  { %238 = vmatpush1.bf16.msra.mxu0 %v1875_v8  ;;  %279 = vmatpush1.bf16.msra.mxu1 %v1917_v15  ;;  %v69_v35 = vld [vmem:[%s2695_s0 + $0x8] sm:$0xff]  ;;  %v71_v44 = vld [vmem:[%s2695_s0 + $0x18] sm:$0xff]  ;;  %v70_v50 = vld [vmem:[%s2695_s0 + $0x10] sm:$0xff] }
   0xd   :  { %239 = vmatprep.subr.bf16.mxu0 %v1882_v9  ;;  %280 = vmatprep.subr.bf16.mxu1 %v1923_v16 }
  0x10   :  { %240 = vmatpush1.bf16.msra.mxu0 %v1900_v12  ;;  %281 = vmatpush1.bf16.msra.mxu1 %v1941_v19 }
  0x11   :  { %241 = vmatprep.subr.bf16.mxu0 %v1905_v13  ;;  %282 = vmatprep.subr.bf16.mxu1 %v1947_v20 }
  0x14   :  { %242 = vmatpush1.bf16.msra.mxu0 %v1929_v17  ;;  %283 = vmatpush1.bf16.msra.mxu1 %v1965_v23 }
  0x15   :  { %243 = vmatprep.subr.bf16.mxu0 %v1935_v18  ;;  %284 = vmatprep.subr.bf16.mxu1 %v1971_v24 }
  0x18   :  { %244 = vmatpush1.bf16.msra.mxu0 %v1953_v21  ;;  %285 = vmatpush1.bf16.msra.mxu1 %v1989_v27 }
  0x19   :  { %245 = vmatprep.subr.bf16.mxu0 %v1958_v22  ;;  %286 = vmatprep.subr.bf16.mxu1 %v1995_v28 }
  0x1c   :  { %246 = vmatpush1.bf16.msra.mxu0 %v1977_v25  ;;  %287 = vmatpush1.bf16.msra.mxu1 %v2008_v30 }
  0x1d   :  { %247 = vmatprep.subr.bf16.mxu0 %v1983_v26  ;;  %288 = vmatprep.subr.bf16.mxu1 %v2014_v31 }
  0x20   :  { %248 = vmatpush1.bf16.msra.mxu0 %v2001_v29  ;;  %289 = vmatpush1.bf16.msra.mxu1 %v2021_v32 }
  0x21   :  { %390 = vmatprep.subr.bf16.mxu0 %v1832_v0  ;;  %431 = vmatprep.subr.bf16.mxu1 %v1864_v6 }
  0x23   :  { %266 = vmatmul.mubr.bf16.vlgmr.msra.gmra.mrb[0].mxu0 %v1792_v33  ;;  %307 = vmatmul.mubr.bf16.vlgmr.msra.gmra.mrb[0].mxu1 %v1792_v33 }
  0x24   :  { %391 = vmatpush1.bf16.msra.mxu0 %v1839_v2  ;;  %422 = vmatprep.mubr.bf16.mxu0 %v1791_v1 }
  0x25   :  { %392 = vmatprep.subr.bf16.mxu0 %v1847_v3  ;;  %432 = vmatpush1.bf16.msra.mxu1 %v1869_v7 }
  0x26   :  { %433 = vmatprep.subr.bf16.mxu1 %v1888_v10  ;;  %463 = vmatprep.mubr.bf16.mxu1 %v1791_v1 }
  0x28   :  { %393 = vmatpush1.bf16.msra.mxu0 %v1853_v4 }
  0x29   :  { %394 = vmatprep.subr.bf16.mxu0 %v1859_v5  ;;  %434 = vmatpush1.bf16.msra.mxu1 %v1893_v11 }
  0x2a   :  { %435 = vmatprep.subr.bf16.mxu1 %v1910_v14 }
  0x2c   :  { %395 = vmatpush1.bf16.msra.mxu0 %v1875_v8 }
  0x2d   :  { %396 = vmatprep.subr.bf16.mxu0 %v1882_v9  ;;  %436 = vmatpush1.bf16.msra.mxu1 %v1917_v15 }
  0x2e   :  { %437 = vmatprep.subr.bf16.mxu1 %v1923_v16 }
  0x30   :  { %397 = vmatpush1.bf16.msra.mxu0 %v1900_v12 }
  0x31   :  { %398 = vmatprep.subr.bf16.mxu0 %v1905_v13  ;;  %438 = vmatpush1.bf16.msra.mxu1 %v1941_v19 }
  0x32   :  { %439 = vmatprep.subr.bf16.mxu1 %v1947_v20 }
  0x34   :  { %399 = vmatpush1.bf16.msra.mxu0 %v1929_v17 }
  0x35   :  { %400 = vmatprep.subr.bf16.mxu0 %v1935_v18  ;;  %440 = vmatpush1.bf16.msra.mxu1 %v1965_v23 }
  0x36   :  { %441 = vmatprep.subr.bf16.mxu1 %v1971_v24 }
  0x38   :  { %401 = vmatpush1.bf16.msra.mxu0 %v1953_v21 }
  0x39   :  { %402 = vmatprep.subr.bf16.mxu0 %v1958_v22  ;;  %442 = vmatpush1.bf16.msra.mxu1 %v1989_v27 }
  0x3a   :  { %443 = vmatprep.subr.bf16.mxu1 %v1995_v28 }
  0x3c   :  { %403 = vmatpush1.bf16.msra.mxu0 %v1977_v25 }
  0x3d   :  { %404 = vmatprep.subr.bf16.mxu0 %v1983_v26  ;;  %444 = vmatpush1.bf16.msra.mxu1 %v2008_v30 }
  0x3e   :  { %445 = vmatprep.subr.bf16.mxu1 %v2014_v31 }
  0x40   :  { %405 = vmatpush1.bf16.msra.mxu0 %v2001_v29 }
  0x41   :  { %538 = vmatprep.subr.bf16.mxu0 %v1832_v0  ;;  %446 = vmatpush1.bf16.msra.mxu1 %v2021_v32 }
  0x42   :  { %579 = vmatprep.subr.bf16.mxu1 %v1864_v6 }
  0xf6   :  { %v267_v36 = vpop.f32.mrb[0].mxu0  ;;  %v308_v45 = vpop.f32.mrb[0].mxu1 }
  0xf7   :  { %v315_v37 = vadd.f32 %v267_v36, %v68_v34  ;;  %v269_v38 = vpop.f32.mrb[1].mxu0  ;;  %v310_v46 = vpop.f32.mrb[1].mxu1  ;;  %v317_v52 = vadd.f32 %v308_v45, %v70_v50  ;;  %v343_v36 = vld [vmem:[%s2696_s1] sm:$0xff]  ;;  %v1466_v45 = vld [vmem:[%s2695_s0 + $0x28] sm:$0xff] }
  0xf8   :  { %v316_v39 = vadd.f32 %v269_v38, %v69_v35  ;;  %v271_v40 = vpop.f32.mrb[2].mxu0  ;;  %v318_v47 = vadd.f32 %v310_v46, %v71_v44  ;;  %v312_v48 = vpop.f32.mrb[2].mxu1  ;;  %v1465_v44 = vld [vmem:[%s2695_s0 + $0x20] sm:$0xff] }
  0xf9   :  { %v1458_v41 = vmul.f32 -1.442695, %v315_v37  ;;  %v272_v42 = vpop.f32.mrb[3].mxu0  ;;  %v313_v49 = vpop.f32.mrb[3].mxu1 }
  0xfa   :  { %v1459_v43 = vmul.f32 -1.442695, %v316_v39  ;;  %v1460_v51 = vmul.f32 -1.442695, %v318_v47 }
  0xfb   :  { %1615 = vpow2.f32 %v1458_v41 }
  0xfc   :  { %1617 = vpow2.f32 %v1459_v43 }
  0xfd   :  { %1619 = vpow2.f32 %v1460_v51 }
  0xfe   :  { %1621 = vtanh.f32 %v317_v52 }
 0x105   :  { %v1616_v53 = vpop.eup %1615 }
 0x106   :  { %v1618_v54 = vpop.eup %1617  ;;  %v322_v55 = vadd.f32 1.0, %v1616_v53 }
 0x107   :  { %v328_v56 = vadd.f32 1.0, %v1618_v54  ;;  %v1620_v57 = vpop.eup %1619 }
 0x108   :  { %1623 = vrcp.f32 %v322_v55  ;;  %v1622_v58 = vpop.eup %1621  ;;  %v335_v60 = vadd.f32 1.0, %v1620_v57 }
 0x109   :  { %1625 = vrcp.f32 %v328_v56 }
 0x10a   :  { %1627 = vrcp.f32 %v335_v60  ;;  %v1467_v60 = vld [vmem:[%s2695_s0 + $0x30] sm:$0xff] }
 0x112   :  { %v1624_v59 = vpop.eup %1623 }
 0x113   :  { %v1626_v61 = vpop.eup %1625  ;;  %v339_v62 = vmul.f32 %v1624_v59, %v1622_v58  ;;  %v1468_v58 = vld [vmem:[%s2695_s0 + $0x38] sm:$0xff] }
 0x114   :  { %v338_v63 = vmul.f32 0.0, %v1626_v61  ;;  %v1628_v34 = vpop.eup %1627 }
 0x116   :  { %v2073_v33 = vadd.f32 %v339_v62, %v338_v63 }
 0x118   :  { %1629 = vtanh.f32 %v2073_v33 }
 0x122   :  { %v1630_v35 = vpop.eup %1629 }
 0x123   :  { %v342_v37 = vmul.f32 %v1630_v35, %v1628_v34 }
 0x125   :  { %v389_v38 = vpack.c.bf16 %v342_v37, %v342_v37  ;;  %v344_v39 = vadd.f32 %v343_v36, %v342_v37 }
 0x127   :  { %423 = vmatmul.mubr.bf16.vlgmr.msra.gmra.mrb[4].mxu0 %v389_v38  ;;  %464 = vmatmul.mubr.bf16.vlgmr.msra.gmra.mrb[4].mxu1 %v389_v38 }
 0x128   :  { %345 = vadd.xlane.f32.xlu0 %v344_v39  ;;  %539 = vmatpush1.bf16.msra.mxu0 %v1839_v2 }
 0x129   :  { %580 = vmatpush1.bf16.msra.mxu1 %v1869_v7  ;;  %540 = vmatprep.subr.bf16.mxu0 %v1847_v3 }
 0x12a   :  { %581 = vmatprep.subr.bf16.mxu1 %v1888_v10  ;;  %570 = vmatprep.mubr.bf16.mxu0 %v1791_v1 }
 0x12b   :  { %611 = vmatprep.mubr.bf16.mxu1 %v1791_v1 }
 0x12c   :  { %541 = vmatpush1.bf16.msra.mxu0 %v1853_v4 }
 0x12d   :  { %582 = vmatpush1.bf16.msra.mxu1 %v1893_v11  ;;  %542 = vmatprep.subr.bf16.mxu0 %v1859_v5 }
 0x12e   :  { %583 = vmatprep.subr.bf16.mxu1 %v1910_v14 }
 0x130   :  { %543 = vmatpush1.bf16.msra.mxu0 %v1875_v8 }
 0x131   :  { %584 = vmatpush1.bf16.msra.mxu1 %v1917_v15  ;;  %544 = vmatprep.subr.bf16.mxu0 %v1882_v9 }
 0x132   :  { %585 = vmatprep.subr.bf16.mxu1 %v1923_v16 }
 0x134   :  { %545 = vmatpush1.bf16.msra.mxu0 %v1900_v12 }
 0x135   :  { %586 = vmatpush1.bf16.msra.mxu1 %v1941_v19  ;;  %546 = vmatprep.subr.bf16.mxu0 %v1905_v13 }
 0x136   :  { %587 = vmatprep.subr.bf16.mxu1 %v1947_v20 }
 0x138   :  { %547 = vmatpush1.bf16.msra.mxu0 %v1929_v17 }
 0x139   :  { %588 = vmatpush1.bf16.msra.mxu1 %v1965_v23  ;;  %548 = vmatprep.subr.bf16.mxu0 %v1935_v18 }
 0x13a   :  { %589 = vmatprep.subr.bf16.mxu1 %v1971_v24 }
 0x13c   :  { %549 = vmatpush1.bf16.msra.mxu0 %v1953_v21 }
 0x13d   :  { %590 = vmatpush1.bf16.msra.mxu1 %v1989_v27  ;;  %550 = vmatprep.subr.bf16.mxu0 %v1958_v22 }
 0x13e   :  { %591 = vmatprep.subr.bf16.mxu1 %v1995_v28 }
 0x140   :  { %551 = vmatpush1.bf16.msra.mxu0 %v1977_v25 }
 0x141   :  { %592 = vmatpush1.bf16.msra.mxu1 %v2008_v30  ;;  %552 = vmatprep.subr.bf16.mxu0 %v1983_v26 }
 0x142   :  { %593 = vmatprep.subr.bf16.mxu1 %v2014_v31 }
 0x144   :  { %553 = vmatpush1.bf16.msra.mxu0 %v2001_v29 }
 0x145   :  { %594 = vmatpush1.bf16.msra.mxu1 %v2021_v32  ;;  %686 = vmatprep.subr.bf16.mxu0 %v1832_v0 }
 0x146   :  { %727 = vmatprep.subr.bf16.mxu1 %v1864_v6 }
 0x1b5   :  { %v346_v40 = vpop.xlane.xlu0 %345 }
 0x1b6   :  { %v2113_v41 = vmul.f32 0.0625, %v346_v40 }
 0x1b8   :  { %v2116_v42 = vsub.f32 %v344_v39, %v2113_v41 }
 0x1ba   :  { %v349_v43 = vmul.f32 %v2116_v42, %v2116_v42 }
 0x1bc   :  { %350 = vadd.xlane.f32.xlu0 %v349_v43 }
 0x1fa   :  { %v424_v46 = vpop.f32.mrb[4].mxu0  ;;  %v465_v47 = vpop.f32.mrb[4].mxu1 }
 0x1fb   :  { %v472_v48 = vadd.f32 %v1465_v44, %v424_v46  ;;  %v426_v49 = vpop.f32.mrb[5].mxu0  ;;  %v467_v50 = vpop.f32.mrb[5].mxu1  ;;  %v474_v62 = vadd.f32 %v1467_v60, %v465_v47 }
 0x1fc   :  { %v473_v51 = vadd.f32 %v1466_v45, %v426_v49  ;;  %v428_v52 = vpop.f32.mrb[6].mxu0  ;;  %v469_v53 = vpop.f32.mrb[6].mxu1  ;;  %v475_v59 = vadd.f32 %v1468_v58, %v467_v50  ;;  %v1472_v49 = vld [vmem:[%s2696_s1 + $0x8] sm:$0xff] }
 0x1fd   :  { %v1469_v54 = vmul.f32 -1.442695, %v472_v48  ;;  %v429_v55 = vpop.f32.mrb[7].mxu0  ;;  %v470_v56 = vpop.f32.mrb[7].mxu1 }
 0x1fe   :  { %v1470_v57 = vmul.f32 -1.442695, %v473_v51  ;;  %v1471_v61 = vmul.f32 -1.442695, %v475_v59  ;;  %v1476_v56 = vld [vmem:[%s2695_s0 + $0x40] sm:$0xff] }
 0x1ff   :  { %1631 = vpow2.f32 %v1469_v54 }
 0x200   :  { %1633 = vpow2.f32 %v1470_v57  ;;  %v1477_v57 = vld [vmem:[%s2695_s0 + $0x48] sm:$0xff] }
 0x201   :  { %1635 = vpow2.f32 %v1471_v61 }
 0x202   :  { %1637 = vtanh.f32 %v474_v62 }
 0x209   :  { %v1632_v63 = vpop.eup %1631 }
 0x20a   :  { %v1634_v34 = vpop.eup %1633  ;;  %v479_v35 = vadd.f32 1.0, %v1632_v63 }
 0x20b   :  { %v485_v36 = vadd.f32 1.0, %v1634_v34  ;;  %v1636_v37 = vpop.eup %1635 }
 0x20c   :  { %1639 = vrcp.f32 %v479_v35  ;;  %v1638_v38 = vpop.eup %1637  ;;  %v492_v44 = vadd.f32 1.0, %v1636_v37 }
 0x20d   :  { %1641 = vrcp.f32 %v485_v36 }
 0x20e   :  { %1643 = vrcp.f32 %v492_v44  ;;  %v1478_v44 = vld [vmem:[%s2695_s0 + $0x50] sm:$0xff] }
 0x216   :  { %v1640_v39 = vpop.eup %1639 }
 0x217   :  { %v1642_v40 = vpop.eup %1641  ;;  %v496_v43 = vmul.f32 %v1640_v39, %v1638_v38 }
 0x218   :  { %v495_v45 = vmul.f32 %v1642_v40, %v2073_v33  ;;  %v1644_v47 = vpop.eup %1643  ;;  %v1479_v40 = vld [vmem:[%s2695_s0 + $0x58] sm:$0xff] }
 0x21a   :  { %v2133_v46 = vadd.f32 %v496_v43, %v495_v45 }
 0x21c   :  { %1645 = vtanh.f32 %v2133_v46 }
 0x226   :  { %v1646_v48 = vpop.eup %1645 }
 0x227   :  { %v499_v50 = vmul.f32 %v1646_v48, %v1644_v47 }
 0x229   :  { %v537_v51 = vpack.c.bf16 %v499_v50, %v499_v50  ;;  %v502_v52 = vadd.f32 %v1472_v49, %v499_v50 }
 0x22b   :  { %571 = vmatmul.mubr.bf16.vlgmr.msra.gmra.mrb[8].mxu0 %v537_v51  ;;  %612 = vmatmul.mubr.bf16.vlgmr.msra.gmra.mrb[8].mxu1 %v537_v51 }
 0x22c   :  { %503 = vadd.xlane.f32.xlu1 %v502_v52  ;;  %687 = vmatpush1.bf16.msra.mxu0 %v1839_v2 }
 0x22d   :  { %728 = vmatpush1.bf16.msra.mxu1 %v1869_v7  ;;  %688 = vmatprep.subr.bf16.mxu0 %v1847_v3 }
 0x22e   :  { %729 = vmatprep.subr.bf16.mxu1 %v1888_v10  ;;  %718 = vmatprep.mubr.bf16.mxu0 %v1791_v1 }
 0x22f   :  { %759 = vmatprep.mubr.bf16.mxu1 %v1791_v1 }
 0x230   :  { %689 = vmatpush1.bf16.msra.mxu0 %v1853_v4 }
 0x231   :  { %730 = vmatpush1.bf16.msra.mxu1 %v1893_v11  ;;  %690 = vmatprep.subr.bf16.mxu0 %v1859_v5 }
 0x232   :  { %731 = vmatprep.subr.bf16.mxu1 %v1910_v14 }
 0x234   :  { %691 = vmatpush1.bf16.msra.mxu0 %v1875_v8 }
 0x235   :  { %732 = vmatpush1.bf16.msra.mxu1 %v1917_v15  ;;  %692 = vmatprep.subr.bf16.mxu0 %v1882_v9 }
 0x236   :  { %733 = vmatprep.subr.bf16.mxu1 %v1923_v16 }
 0x238   :  { %693 = vmatpush1.bf16.msra.mxu0 %v1900_v12 }
 0x239   :  { %734 = vmatpush1.bf16.msra.mxu1 %v1941_v19  ;;  %694 = vmatprep.subr.bf16.mxu0 %v1905_v13 }
 0x23a   :  { %735 = vmatprep.subr.bf16.mxu1 %v1947_v20 }
 0x23c   :  { %695 = vmatpush1.bf16.msra.mxu0 %v1929_v17 }
 0x23d   :  { %736 = vmatpush1.bf16.msra.mxu1 %v1965_v23  ;;  %696 = vmatprep.subr.bf16.mxu0 %v1935_v18 }
 0x23e   :  { %737 = vmatprep.subr.bf16.mxu1 %v1971_v24 }
 0x240   :  { %697 = vmatpush1.bf16.msra.mxu0 %v1953_v21 }
 0x241   :  { %738 = vmatpush1.bf16.msra.mxu1 %v1989_v27  ;;  %698 = vmatprep.subr.bf16.mxu0 %v1958_v22 }
 0x242   :  { %739 = vmatprep.subr.bf16.mxu1 %v1995_v28 }
 0x244   :  { %699 = vmatpush1.bf16.msra.mxu0 %v1977_v25 }
 0x245   :  { %740 = vmatpush1.bf16.msra.mxu1 %v2008_v30  ;;  %700 = vmatprep.subr.bf16.mxu0 %v1983_v26 }
 0x246   :  { %741 = vmatprep.subr.bf16.mxu1 %v2014_v31 }
 0x248   :  { %701 = vmatpush1.bf16.msra.mxu0 %v2001_v29 }
 0x249   :  { %742 = vmatpush1.bf16.msra.mxu1 %v2021_v32  ;;  %834 = vmatprep.subr.bf16.mxu0 %v1832_v0 }
 0x24a   :  { %875 = vmatprep.subr.bf16.mxu1 %v1864_v6 }
 0x2b9   :  { %v504_v33 = vpop.xlane.xlu1 %503 }
 0x2ba   :  { %v2173_v53 = vmul.f32 0.0625, %v504_v33 }
 0x2bc   :  { %v2176_v54 = vsub.f32 %v502_v52, %v2173_v53 }
 0x2be   :  { %v507_v55 = vmul.f32 %v2176_v54, %v2176_v54 }
 0x2c0   :  { %508 = vadd.xlane.f32.xlu0 %v507_v55 }
 0x2fe   :  { %v572_v58 = vpop.f32.mrb[8].mxu0  ;;  %v613_v59 = vpop.f32.mrb[8].mxu1 }
 0x2ff   :  { %v620_v60 = vadd.f32 %v1476_v56, %v572_v58  ;;  %v574_v61 = vpop.f32.mrb[9].mxu0  ;;  %v615_v62 = vpop.f32.mrb[9].mxu1  ;;  %v622_v47 = vadd.f32 %v1478_v44, %v613_v59 }
 0x300   :  { %v621_v63 = vadd.f32 %v1477_v57, %v574_v61  ;;  %v576_v34 = vpop.f32.mrb[10].mxu0  ;;  %v617_v35 = vpop.f32.mrb[10].mxu1  ;;  %v623_v43 = vadd.f32 %v1479_v40, %v615_v62 }
 0x301   :  { %v1480_v36 = vmul.f32 -1.442695, %v620_v60  ;;  %v577_v37 = vpop.f32.mrb[11].mxu0  ;;  %v618_v38 = vpop.f32.mrb[11].mxu1 }
 0x302   :  { %v1481_v39 = vmul.f32 -1.442695, %v621_v63  ;;  %v1482_v45 = vmul.f32 -1.442695, %v623_v43  ;;  %v1483_v63 = vld [vmem:[%s2696_s1 + $0x10] sm:$0xff]  ;;  %v1793_v37 = vmov 0.0   ;;  %v2242_v43 = vpop.xlane.xlu0 %350 }
 0x303   :  { %1647 = vpow2.f32 %v1480_v36 }
 0x304   :  { %1649 = vpow2.f32 %v1481_v39 }
 0x305   :  { %1651 = vpow2.f32 %v1482_v45 }
 0x306   :  { %1653 = vtanh.f32 %v622_v47 }
 0x30d   :  { %v1648_v48 = vpop.eup %1647 }
 0x30e   :  { %v1650_v49 = vpop.eup %1649  ;;  %v627_v50 = vadd.f32 1.0, %v1648_v48 }
 0x30f   :  { %v633_v51 = vadd.f32 1.0, %v1650_v49  ;;  %v1652_v52 = vpop.eup %1651 }
 0x310   :  { %1655 = vrcp.f32 %v627_v50  ;;  %v1654_v33 = vpop.eup %1653  ;;  %v640_v58 = vadd.f32 1.0, %v1652_v52  ;;  %v1487_v50 = vld [vmem:[%s2695_s0 + $0x60] sm:$0xff] }
 0x311   :  { %1657 = vrcp.f32 %v633_v51  ;;  %v1488_v51 = vld [vmem:[%s2695_s0 + $0x68] sm:$0xff] }
 0x312   :  { %1659 = vrcp.f32 %v640_v58 }
 0x31a   :  { %v1656_v55 = vpop.eup %1655 }
 0x31b   :  { %v1658_v56 = vpop.eup %1657  ;;  %v644_v57 = vmul.f32 %v1656_v55, %v1654_v33 }
 0x31c   :  { %v643_v60 = vmul.f32 %v1658_v56, %v2133_v46  ;;  %v1660_v59 = vpop.eup %1659  ;;  %v2213_v46 = vld [vmem:[%s2697_s5] sm:$0xff] }
 0x31d   :  { %vm1484_vm0 = vcmp.gt.s32.totalorder %v2213_v46, 2  ;;  %vm1495_vm1 = vcmp.gt.s32.totalorder %v2213_v46, 3  ;;  %vm1462_vm2 = vcmp.gt.s32.totalorder %v2213_v46, 0  ;;  %vm1473_vm3 = vcmp.gt.s32.totalorder %v2213_v46, 1 }
 0x31e   :  { %v2193_v61 = vadd.f32 %v644_v57, %v643_v60  ;;  %v1485_v38 = vsel %vm1484_vm0, 1.0, %v1793_v37  ;;  %v1496_v39 = vsel %vm1495_vm1, 1.0, %v1793_v37  ;;  %vm1506_vm4 = vcmp.gt.s32.totalorder %v2213_v46, 4 }
 0x31f   :  { %v1546_v40 = vpack.i.bf16 %v1496_v39, %v1485_v38  ;;  %v1489_v39 = vld [vmem:[%s2695_s0 + $0x70] sm:$0xff]  ;;  %vm1517_vm5 = vcmp.gt.s32.totalorder %v2213_v46, 5  ;;  %vm1528_vm6 = vcmp.gt.s32.totalorder %v2213_v46, 6  ;;  %vm1539_vm7 = vcmp.gt.s32.totalorder %v2213_v46, 7 }
 0x320   :  { %1661 = vtanh.f32 %v2193_v61 }
 0x32a   :  { %v1662_v62 = vpop.eup %1661 }
 0x32b   :  { %v647_v34 = vmul.f32 %v1662_v62, %v1660_v59 }
 0x32d   :  { %v685_v35 = vpack.c.bf16 %v647_v34, %v647_v34  ;;  %v650_v36 = vadd.f32 %v1483_v63, %v647_v34 }
 0x32f   :  { %719 = vmatmul.mubr.bf16.vlgmr.msra.gmra.mrb[12].mxu0 %v685_v35  ;;  %760 = vmatmul.mubr.bf16.vlgmr.msra.gmra.mrb[12].mxu1 %v685_v35 }
 0x330   :  { %651 = vadd.xlane.f32.xlu0 %v650_v36  ;;  %835 = vmatpush1.bf16.msra.mxu0 %v1839_v2 }
 0x331   :  { %876 = vmatpush1.bf16.msra.mxu1 %v1869_v7  ;;  %836 = vmatprep.subr.bf16.mxu0 %v1847_v3 }
 0x332   :  { %877 = vmatprep.subr.bf16.mxu1 %v1888_v10  ;;  %866 = vmatprep.mubr.bf16.mxu0 %v1791_v1 }
 0x333   :  { %907 = vmatprep.mubr.bf16.mxu1 %v1791_v1 }
 0x334   :  { %837 = vmatpush1.bf16.msra.mxu0 %v1853_v4 }
 0x335   :  { %878 = vmatpush1.bf16.msra.mxu1 %v1893_v11  ;;  %838 = vmatprep.subr.bf16.mxu0 %v1859_v5 }
 0x336   :  { %879 = vmatprep.subr.bf16.mxu1 %v1910_v14 }
 0x338   :  { %839 = vmatpush1.bf16.msra.mxu0 %v1875_v8 }
 0x339   :  { %880 = vmatpush1.bf16.msra.mxu1 %v1917_v15  ;;  %840 = vmatprep.subr.bf16.mxu0 %v1882_v9 }
 0x33a   :  { %881 = vmatprep.subr.bf16.mxu1 %v1923_v16 }
 0x33c   :  { %841 = vmatpush1.bf16.msra.mxu0 %v1900_v12 }
 0x33d   :  { %882 = vmatpush1.bf16.msra.mxu1 %v1941_v19  ;;  %842 = vmatprep.subr.bf16.mxu0 %v1905_v13 }
 0x33e   :  { %883 = vmatprep.subr.bf16.mxu1 %v1947_v20 }
 0x340   :  { %843 = vmatpush1.bf16.msra.mxu0 %v1929_v17 }
 0x341   :  { %884 = vmatpush1.bf16.msra.mxu1 %v1965_v23  ;;  %844 = vmatprep.subr.bf16.mxu0 %v1935_v18 }
 0x342   :  { %885 = vmatprep.subr.bf16.mxu1 %v1971_v24 }
 0x344   :  { %845 = vmatpush1.bf16.msra.mxu0 %v1953_v21 }
 0x345   :  { %886 = vmatpush1.bf16.msra.mxu1 %v1989_v27  ;;  %846 = vmatprep.subr.bf16.mxu0 %v1958_v22 }
 0x346   :  { %1547 = vperm.xlu0 %1545, %v1546_v40   ;;  %887 = vmatprep.subr.bf16.mxu1 %v1995_v28 }
 0x348   :  { %847 = vmatpush1.bf16.msra.mxu0 %v1977_v25 }
 0x349   :  { %888 = vmatpush1.bf16.msra.mxu1 %v2008_v30  ;;  %848 = vmatprep.subr.bf16.mxu0 %v1983_v26 }
 0x34a   :  { %889 = vmatprep.subr.bf16.mxu1 %v2014_v31 }
 0x34c   :  { %849 = vmatpush1.bf16.msra.mxu0 %v2001_v29 }
 0x34d   :  { %890 = vmatpush1.bf16.msra.mxu1 %v2021_v32  ;;  %982 = vmatprep.subr.bf16.mxu0 %v1832_v0  ;;  %v2244_v44 = vpop.xlane.xlu0 %508 }
 0x34e   :  { %1023 = vmatprep.subr.bf16.mxu1 %v1864_v6 }
 0x3bd   :  { %v652_v45 = vpop.xlane.xlu0 %651 }
 0x3be   :  { %v2246_v47 = vmul.f32 0.0625, %v652_v45 }
 0x3c0   :  { %v2249_v48 = vsub.f32 %v650_v36, %v2246_v47  ;;  %v1490_v36 = vld [vmem:[%s2695_s0 + $0x78] sm:$0xff] }
 0x3c2   :  { %v655_v49 = vmul.f32 %v2249_v48, %v2249_v48 }
 0x3c4   :  { %656 = vadd.xlane.f32.xlu0 %v655_v49 }
 0x402   :  { %v720_v52 = vpop.f32.mrb[12].mxu0  ;;  %v761_v33 = vpop.f32.mrb[12].mxu1 }
 0x403   :  { %v768_v55 = vadd.f32 %v1487_v50, %v720_v52  ;;  %v722_v56 = vpop.f32.mrb[13].mxu0  ;;  %v763_v57 = vpop.f32.mrb[13].mxu1  ;;  %v770_v45 = vadd.f32 %v1489_v39, %v761_v33 }
 0x404   :  { %v769_v58 = vadd.f32 %v1488_v51, %v722_v56  ;;  %v724_v60 = vpop.f32.mrb[14].mxu0  ;;  %v765_v59 = vpop.f32.mrb[14].mxu1  ;;  %v771_v38 = vadd.f32 %v1490_v36, %v763_v57 }
 0x405   :  { %v1491_v62 = vmul.f32 -1.442695, %v768_v55  ;;  %v725_v63 = vpop.f32.mrb[15].mxu0  ;;  %v766_v34 = vpop.f32.mrb[15].mxu1 }
 0x406   :  { %v1492_v35 = vmul.f32 -1.442695, %v769_v58  ;;  %v1493_v40 = vmul.f32 -1.442695, %v771_v38 }
 0x407   :  { %1663 = vpow2.f32 %v1491_v62 }
 0x408   :  { %1665 = vpow2.f32 %v1492_v35  ;;  %v1494_v35 = vld [vmem:[%s2696_s1 + $0x18] sm:$0xff] }
 0x409   :  { %1667 = vpow2.f32 %v1493_v40 }
 0x40a   :  { %1669 = vtanh.f32 %v770_v45 }
 0x411   :  { %v1664_v49 = vpop.eup %1663 }
 0x412   :  { %v1666_v50 = vpop.eup %1665  ;;  %v775_v51 = vadd.f32 1.0, %v1664_v49 }
 0x413   :  { %v781_v52 = vadd.f32 1.0, %v1666_v50  ;;  %v1668_v55 = vpop.eup %1667 }
 0x414   :  { %1671 = vrcp.f32 %v775_v51  ;;  %v1670_v56 = vpop.eup %1669  ;;  %v788_v57 = vadd.f32 1.0, %v1668_v55 }
 0x415   :  { %1673 = vrcp.f32 %v781_v52  ;;  %v1501_v52 = vld [vmem:[%s2695_s0 + $0x98] sm:$0xff] }
 0x416   :  { %1675 = vrcp.f32 %v788_v57 }
 0x41e   :  { %v1672_v58 = vpop.eup %1671 }
 0x41f   :  { %v1674_v60 = vpop.eup %1673  ;;  %v792_v59 = vmul.f32 %v1672_v58, %v1670_v56  ;;  %v1500_v56 = vld [vmem:[%s2695_s0 + $0x90] sm:$0xff] }
 0x420   :  { %v791_v62 = vmul.f32 %v1674_v60, %v2193_v61  ;;  %v1676_v33 = vpop.eup %1675 }
 0x422   :  { %v2266_v63 = vadd.f32 %v792_v59, %v791_v62 }
 0x424   :  { %1677 = vtanh.f32 %v2266_v63 }
 0x42e   :  { %v1678_v34 = vpop.eup %1677 }
 0x42f   :  { %v795_v36 = vmul.f32 %v1678_v34, %v1676_v33 }
 0x431   :  { %v833_v38 = vpack.c.bf16 %v795_v36, %v795_v36  ;;  %v798_v39 = vadd.f32 %v1494_v35, %v795_v36 }
 0x433   :  { %867 = vmatmul.mubr.bf16.vlgmr.msra.gmra.mrb[16].mxu0 %v833_v38  ;;  %908 = vmatmul.mubr.bf16.vlgmr.msra.gmra.mrb[16].mxu1 %v833_v38 }
 0x434   :  { %799 = vadd.xlane.f32.xlu1 %v798_v39  ;;  %983 = vmatpush1.bf16.msra.mxu0 %v1839_v2  ;;  %v2298_v2 = vpop.permute.xlu0 %1547 }
 0x435   :  { %1024 = vmatpush1.bf16.msra.mxu1 %v1869_v7  ;;  %984 = vmatprep.subr.bf16.mxu0 %v1847_v3  ;;  %v658_v3 = vmul.f32 112.0, %v2246_v47 }
 0x436   :  { %1025 = vmatprep.subr.bf16.mxu1 %v1888_v10  ;;  %1014 = vmatprep.mubr.bf16.mxu0 %v1791_v1 }
 0x437   :  { %1055 = vmatprep.mubr.bf16.mxu1 %v1791_v1 }
 0x438   :  { %985 = vmatpush1.bf16.msra.mxu0 %v1853_v4  ;;  %v659_v4 = vmul.f32 %v658_v3, %v2246_v47 }
 0x439   :  { %1026 = vmatpush1.bf16.msra.mxu1 %v1893_v11  ;;  %986 = vmatprep.subr.bf16.mxu0 %v1859_v5  ;;  %v2313_v11 = vld [vmem:[%s2698_s3] ss:$0 sm:$0xff] }
 0x43a   :  { %1027 = vmatprep.subr.bf16.mxu1 %v1910_v14 }
 0x43c   :  { %987 = vmatpush1.bf16.msra.mxu0 %v1875_v8 }
 0x43d   :  { %1028 = vmatpush1.bf16.msra.mxu1 %v1917_v15  ;;  %988 = vmatprep.subr.bf16.mxu0 %v1882_v9 }
 0x43e   :  { %1029 = vmatprep.subr.bf16.mxu1 %v1923_v16 }
 0x440   :  { %989 = vmatpush1.bf16.msra.mxu0 %v1900_v12 }
 0x441   :  { %1030 = vmatpush1.bf16.msra.mxu1 %v1941_v19  ;;  %990 = vmatprep.subr.bf16.mxu0 %v1905_v13  ;;  %v1549_v13 = vunpack.i.l.bf16 %v2298_v2 }
 0x442   :  { %1031 = vmatprep.subr.bf16.mxu1 %v1947_v20  ;;  %v1498_v20 = vld [vmem:[%s2695_s0 + $0x80] sm:$0xff] }
 0x444   :  { %991 = vmatpush1.bf16.msra.mxu0 %v1929_v17 }
 0x445   :  { %1032 = vmatpush1.bf16.msra.mxu1 %v1965_v23  ;;  %992 = vmatprep.subr.bf16.mxu0 %v1935_v18 }
 0x446   :  { %1033 = vmatprep.subr.bf16.mxu1 %v1971_v24 }
 0x448   :  { %993 = vmatpush1.bf16.msra.mxu0 %v1953_v21  ;;  %v1499_v21 = vld [vmem:[%s2695_s0 + $0x88] sm:$0xff] }
 0x449   :  { %1034 = vmatpush1.bf16.msra.mxu1 %v1989_v27  ;;  %994 = vmatprep.subr.bf16.mxu0 %v1958_v22 }
 0x44a   :  { %1035 = vmatprep.subr.bf16.mxu1 %v1995_v28 }
 0x44c   :  { %995 = vmatpush1.bf16.msra.mxu0 %v1977_v25 }
 0x44d   :  { %1036 = vmatpush1.bf16.msra.mxu1 %v2008_v30  ;;  %996 = vmatprep.subr.bf16.mxu0 %v1983_v26 }
 0x44e   :  { %1037 = vmatprep.subr.bf16.mxu1 %v2014_v31 }
 0x450   :  { %997 = vmatpush1.bf16.msra.mxu0 %v2001_v29 }
 0x451   :  { %v657_v5 = vpop.xlane.xlu0 %656  ;;  %1038 = vmatpush1.bf16.msra.mxu1 %v2021_v32  ;;  %1130 = vmatprep.subr.bf16.mxu0 %v1832_v0  ;;  %v2321_v0 = vld [vmem:[%s2699_s4] ss:$0 sm:$0xff] }
 0x452   :  { %v660_v7 = vsub.f32 %v657_v5, %v659_v4  ;;  %1171 = vmatprep.subr.bf16.mxu1 %v1864_v6 }
 0x454   :  { %v661_v8 = vmul.f32 0.0625, %v660_v7 }
 0x456   :  { %v662_v9 = vadd.f32 1e-05, %v661_v8 }
 0x458   :  { %1679 = vrsqrt.f32 %v662_v9  ;;  %v1505_v9 = vld [vmem:[%s2696_s1 + $0x20] sm:$0xff] }
 0x462   :  { %v1680_v10 = vpop.eup %1679 }
 0x463   :  { %v664_v12 = vmul.f32 %v1680_v10, %v2313_v11 }
 0x465   :  { %v670_v14 = vmul.f32 %v664_v12, %v2249_v48 }
 0x467   :  { %v671_v6 = vadd.f32 %v2321_v0, %v670_v14  ;;  %v2365_v14 = vld [vmem:[%s2694_s2 + $0x8] ss:$16 sps:$4 sm:$0xff]  }
 0x469   :  { %v677_v15 = vmul.f32 %v1549_v13, %v671_v6  ;;  %v2371_v6 = vld [vmem:[%s2694_s2 + $0x24] ss:$16 sps:$4 sm:$0xff]  }
 0x46b   :  { %1486 = vst [vmem:[%s2700_s6 + $0x10] sm:$0xff] %v677_v15  ;;  %v2377_v15 = vld [vmem:[%s2694_s2 + $0x2c] ss:$16 sps:$4 sm:$0xff]  }
 0x4c1   :  { %v800_v16 = vpop.xlane.xlu1 %799 }
 0x4c2   :  { %v2327_v17 = vmul.f32 0.0625, %v800_v16  ;;  %v2385_v16 = vld [vmem:[%s2694_s2 + $0x20] ss:$16 sps:$4 sm:$0xff]  }
 0x4c4   :  { %v2330_v18 = vsub.f32 %v798_v39, %v2327_v17 }
 0x4c6   :  { %v803_v19 = vmul.f32 %v2330_v18, %v2330_v18 }
 0x4c8   :  { %804 = vadd.xlane.f32.xlu1 %v803_v19  ;;  %v2391_v19 = vld [vmem:[%s2694_s2 + $0x28] ss:$16 sps:$4 sm:$0xff]  }
 0x506   :  { %v868_v22 = vpop.f32.mrb[16].mxu0  ;;  %v909_v23 = vpop.f32.mrb[16].mxu1 }
 0x507   :  { %v916_v25 = vadd.f32 %v1498_v20, %v868_v22  ;;  %v870_v26 = vpop.f32.mrb[17].mxu0  ;;  %v911_v61 = vpop.f32.mrb[17].mxu1  ;;  %v918_v60 = vadd.f32 %v1500_v56, %v909_v23  ;;  %v2397_v20 = vld [vmem:[%s2694_s2 + $0x44] ss:$16 sps:$4 sm:$0xff]   ;;  %v2409_v22 = vld [vmem:[%s2694_s2 + $0x40] ss:$16 sps:$4 sm:$0xff]  }
 0x508   :  { %v917_v47 = vadd.f32 %v1499_v21, %v870_v26  ;;  %v872_v48 = vpop.f32.mrb[18].mxu0  ;;  %v913_v40 = vpop.f32.mrb[18].mxu1  ;;  %v919_v55 = vadd.f32 %v1501_v52, %v911_v61  ;;  %v2403_v21 = vld [vmem:[%s2694_s2 + $0x4c] ss:$16 sps:$4 sm:$0xff]   ;;  %v2415_v23 = vld [vmem:[%s2694_s2 + $0x48] ss:$16 sps:$4 sm:$0xff]  }
 0x509   :  { %v1502_v45 = vmul.f32 -1.442695, %v916_v25  ;;  %v873_v49 = vpop.f32.mrb[19].mxu0  ;;  %v914_v50 = vpop.f32.mrb[19].mxu1  ;;  %v2421_v25 = vld [vmem:[%s2694_s2 + $0x64] ss:$16 sps:$4 sm:$0xff]  }
 0x50a   :  { %v1503_v51 = vmul.f32 -1.442695, %v917_v47  ;;  %v1504_v58 = vmul.f32 -1.442695, %v919_v55  ;;  %v2427_v26 = vld [vmem:[%s2694_s2 + $0x6c] ss:$16 sps:$4 sm:$0xff]  }
 0x50b   :  { %1681 = vpow2.f32 %v1502_v45  ;;  %v2433_v61 = vld [vmem:[%s2694_s2 + $0x60] ss:$16 sps:$4 sm:$0xff]   ;;  %v2439_v47 = vld [vmem:[%s2694_s2 + $0x68] ss:$16 sps:$4 sm:$0xff]   ;;  %v2445_v48 = vld [vmem:[%s2694_s2 + $0x84] ss:$16 sps:$4 sm:$0xff]  }
 0x50c   :  { %1683 = vpow2.f32 %v1503_v51  ;;  %v2451_v40 = vld [vmem:[%s2694_s2 + $0x8c] ss:$16 sps:$4 sm:$0xff]   ;;  %v2457_v45 = vld [vmem:[%s2694_s2 + $0x80] ss:$16 sps:$4 sm:$0xff]   ;;  %v2463_v49 = vld [vmem:[%s2694_s2 + $0x88] ss:$16 sps:$4 sm:$0xff]  }
 0x50d   :  { %1685 = vpow2.f32 %v1504_v58  ;;  %v2469_v50 = vld [vmem:[%s2694_s2 + $0xa4] ss:$16 sps:$4 sm:$0xff]   ;;  %v2476_v51 = vld [vmem:[%s2694_s2 + $0xa0] ss:$16 sps:$4 sm:$0xff]  }
 0x50e   :  { %1687 = vtanh.f32 %v918_v60  ;;  %v2483_v52 = vld [vmem:[%s2694_s2 + $0xc4] ss:$16 sps:$4 sm:$0xff]   ;;  %v2491_v55 = vld [vmem:[%s2694_s2 + $0xc0] ss:$16 sps:$4 sm:$0xff]   ;;  %v1783_v60 = vld [vmem:[%s2694_s2 + $0xc] ss:$16 sps:$4 sm:$0xff]  }
 0x515   :  { %v1682_v59 = vpop.eup %1681 }
 0x516   :  { %v1684_v57 = vpop.eup %1683  ;;  %v923_v62 = vadd.f32 1.0, %v1682_v59 }
 0x517   :  { %v929_v33 = vadd.f32 1.0, %v1684_v57  ;;  %v1686_v34 = vpop.eup %1685  ;;  %v1550_v57 = vunpack.i.h.bf16 %v2298_v2  ;;  %v1509_v2 = vld [vmem:[%s2695_s0 + $0xa0] sm:$0xff] }
 0x518   :  { %1689 = vrcp.f32 %v923_v62  ;;  %v1688_v35 = vpop.eup %1687  ;;  %v936_v3 = vadd.f32 1.0, %v1686_v34 }
 0x519   :  { %1691 = vrcp.f32 %v929_v33 }
 0x51a   :  { %1693 = vrcp.f32 %v936_v3 }
 0x522   :  { %v1690_v36 = vpop.eup %1689 }
 0x523   :  { %v1692_v38 = vpop.eup %1691  ;;  %v940_v39 = vmul.f32 %v1690_v36, %v1688_v35 }
 0x524   :  { %v939_v4 = vmul.f32 %v1692_v38, %v2266_v63  ;;  %v1694_v7 = vpop.eup %1693  ;;  %v2359_v63 = vld [vmem:[%s2694_s2] ss:$16 sps:$4 sm:$0xff]  }
 0x526   :  { %v2347_v5 = vadd.f32 %v940_v39, %v939_v4 }
 0x528   :  { %1695 = vtanh.f32 %v2347_v5 }
 0x532   :  { %v1696_v8 = vpop.eup %1695 }
 0x533   :  { %v943_v10 = vmul.f32 %v1696_v8, %v1694_v7 }
 0x535   :  { %v981_v12 = vpack.c.bf16 %v943_v10, %v943_v10  ;;  %v2353_v13 = vadd.f32 %v1505_v9, %v943_v10 }
 0x537   :  { %1015 = vmatmul.mubr.bf16.vlgmr.msra.gmra.mrb[20].mxu0 %v981_v12  ;;  %1056 = vmatmul.mubr.bf16.vlgmr.msra.gmra.mrb[20].mxu1 %v981_v12 }
 0x538   :  { %947 = vadd.xlane.f32.xlu1 %v2353_v13  ;;  %1131 = vmatpush1.bf16.msra.mxu0 %v2359_v63 }
 0x539   :  { %1172 = vmatpush1.bf16.msra.mxu1 %v2365_v14  ;;  %1132 = vmatprep.subr.bf16.mxu0 %v2371_v6 }
 0x53a   :  { %1173 = vmatprep.subr.bf16.mxu1 %v2377_v15  ;;  %1162 = vmatprep.mubr.bf16.mxu0 %v1791_v1 }
 0x53b   :  { %1203 = vmatprep.mubr.bf16.mxu1 %v1791_v1 }
 0x53c   :  { %1133 = vmatpush1.bf16.msra.mxu0 %v2385_v16 }
 0x53d   :  { %1174 = vmatpush1.bf16.msra.mxu1 %v2391_v19  ;;  %1134 = vmatprep.subr.bf16.mxu0 %v2397_v20 }
 0x53e   :  { %1175 = vmatprep.subr.bf16.mxu1 %v2403_v21 }
 0x540   :  { %1135 = vmatpush1.bf16.msra.mxu0 %v2409_v22 }
 0x541   :  { %1176 = vmatpush1.bf16.msra.mxu1 %v2415_v23  ;;  %1136 = vmatprep.subr.bf16.mxu0 %v2421_v25 }
 0x542   :  { %1177 = vmatprep.subr.bf16.mxu1 %v2427_v26 }
 0x544   :  { %1137 = vmatpush1.bf16.msra.mxu0 %v2433_v61 }
 0x545   :  { %1178 = vmatpush1.bf16.msra.mxu1 %v2439_v47  ;;  %1138 = vmatprep.subr.bf16.mxu0 %v2445_v48 }
 0x546   :  { %1179 = vmatprep.subr.bf16.mxu1 %v2451_v40 }
 0x548   :  { %1139 = vmatpush1.bf16.msra.mxu0 %v2457_v45 }
 0x549   :  { %1180 = vmatpush1.bf16.msra.mxu1 %v2463_v49  ;;  %1140 = vmatprep.subr.bf16.mxu0 %v2469_v50 }
 0x54a   :  { %1181 = vmatprep.subr.bf16.mxu1 %v1971_v24  ;;  %v806_v24 = vmul.f32 112.0, %v2327_v17 }
 0x54c   :  { %1141 = vmatpush1.bf16.msra.mxu0 %v2476_v51 }
 0x54d   :  { %1182 = vmatpush1.bf16.msra.mxu1 %v1989_v27  ;;  %1142 = vmatprep.subr.bf16.mxu0 %v2483_v52  ;;  %v2498_v27 = vld [vmem:[%s2694_s2 + $0xe4] ss:$16 sps:$4 sm:$0xff]  }
 0x54e   :  { %1183 = vmatprep.subr.bf16.mxu1 %v1995_v28  ;;  %v807_v28 = vmul.f32 %v806_v24, %v2327_v17 }
 0x550   :  { %1143 = vmatpush1.bf16.msra.mxu0 %v2491_v55 }
 0x551   :  { %1184 = vmatpush1.bf16.msra.mxu1 %v2008_v30  ;;  %1144 = vmatprep.subr.bf16.mxu0 %v2498_v27  ;;  %v1782_v30 = vld [vmem:[%s2694_s2 + $0x4] ss:$16 sps:$4 sm:$0xff]  }
 0x552   :  { %1185 = vmatprep.subr.bf16.mxu1 %v2014_v31 }
 0x554   :  { %1145 = vmatpush1.bf16.msra.mxu0 %v2001_v29 }
 0x555   :  { %v805_v56 = vpop.xlane.xlu1 %804  ;;  %1186 = vmatpush1.bf16.msra.mxu1 %v2021_v32  ;;  %1278 = vmatprep.subr.bf16.mxu0 %v1782_v30  ;;  %v1512_v30 = vld [vmem:[%s2695_s0 + $0xb8] sm:$0xff] }
 0x556   :  { %v808_v58 = vsub.f32 %v805_v56, %v807_v28  ;;  %1319 = vmatprep.subr.bf16.mxu1 %v1783_v60  ;;  %v1511_v60 = vld [vmem:[%s2695_s0 + $0xb0] sm:$0xff] }
 0x558   :  { %v809_v59 = vmul.f32 0.0625, %v808_v58 }
 0x55a   :  { %v810_v31 = vadd.f32 1e-05, %v809_v59 }
 0x55c   :  { %1697 = vrsqrt.f32 %v810_v31 }
 0x566   :  { %v1698_v17 = vpop.eup %1697 }
 0x567   :  { %v812_v29 = vmul.f32 %v1698_v17, %v2313_v11 }
 0x569   :  { %v818_v32 = vmul.f32 %v812_v29, %v2330_v18  ;;  %v1510_v18 = vld [vmem:[%s2695_s0 + $0xa8] sm:$0xff] }
 0x56b   :  { %v819_v62 = vadd.f32 %v2321_v0, %v818_v32 }
 0x56d   :  { %v825_v33 = vmul.f32 %v1550_v57, %v819_v62 }
 0x56f   :  { %1497 = vst [vmem:[%s2700_s6 + $0x18] sm:$0xff] %v825_v33 }
 0x5c5   :  { %v948_v34 = vpop.xlane.xlu1 %947 }
 0x5c6   :  { %v2518_v35 = vmul.f32 0.0625, %v948_v34 }
 0x5c8   :  { %v2522_v36 = vsub.f32 %v2353_v13, %v2518_v35 }
 0x5ca   :  { %v951_v38 = vmul.f32 %v2522_v36, %v2522_v36 }
 0x5cc   :  { %952 = vadd.xlane.f32.xlu0 %v951_v38 }
 0x60a   :  { %v1016_v39 = vpop.f32.mrb[20].mxu0  ;;  %v1057_v3 = vpop.f32.mrb[20].mxu1 }
 0x60b   :  { %v1064_v4 = vadd.f32 %v1509_v2, %v1016_v39  ;;  %v1018_v7 = vpop.f32.mrb[21].mxu0  ;;  %v1059_v8 = vpop.f32.mrb[21].mxu1  ;;  %v1066_v31 = vadd.f32 %v1511_v60, %v1057_v3 }
 0x60c   :  { %v1065_v9 = vadd.f32 %v1510_v18, %v1018_v7  ;;  %v1020_v10 = vpop.f32.mrb[22].mxu0  ;;  %v1061_v12 = vpop.f32.mrb[22].mxu1  ;;  %v1067_v58 = vadd.f32 %v1512_v30, %v1059_v8  ;;  %v1516_v8 = vld [vmem:[%s2696_s1 + $0x28] sm:$0xff] }
 0x60d   :  { %v1513_v13 = vmul.f32 -1.442695, %v1064_v4  ;;  %v1021_v24 = vpop.f32.mrb[23].mxu0  ;;  %v1062_v28 = vpop.f32.mrb[23].mxu1 }
 0x60e   :  { %v1514_v56 = vmul.f32 -1.442695, %v1065_v9  ;;  %v1515_v59 = vmul.f32 -1.442695, %v1067_v58 }
 0x60f   :  { %1699 = vpow2.f32 %v1513_v13 }
 0x610   :  { %1701 = vpow2.f32 %v1514_v56 }
 0x611   :  { %1703 = vpow2.f32 %v1515_v59 }
 0x612   :  { %1705 = vtanh.f32 %v1066_v31 }
 0x619   :  { %v1700_v17 = vpop.eup %1699 }
 0x61a   :  { %v1702_v29 = vpop.eup %1701  ;;  %v1071_v57 = vadd.f32 1.0, %v1700_v17 }
 0x61b   :  { %v1077_v32 = vadd.f32 1.0, %v1702_v29  ;;  %v1704_v62 = vpop.eup %1703 }
 0x61c   :  { %1707 = vrcp.f32 %v1071_v57  ;;  %v1706_v33 = vpop.eup %1705  ;;  %v1084_v18 = vadd.f32 1.0, %v1704_v62 }
 0x61d   :  { %1709 = vrcp.f32 %v1077_v32 }
 0x61e   :  { %1711 = vrcp.f32 %v1084_v18 }
 0x626   :  { %v1708_v34 = vpop.eup %1707 }
 0x627   :  { %v1710_v38 = vpop.eup %1709  ;;  %v1088_v2 = vmul.f32 %v1708_v34, %v1706_v33  ;;  %v1527_v34 = vld [vmem:[%s2696_s1 + $0x30] sm:$0xff] }
 0x628   :  { %v1087_v39 = vmul.f32 %v1710_v38, %v2347_v5  ;;  %v1712_v3 = vpop.eup %1711  ;;  %v1785_v5 = vld [vmem:[%s2694_s2 + $0xa8] ss:$16 sps:$4 sm:$0xff]  }
 0x62a   :  { %v2539_v4 = vadd.f32 %v1088_v2, %v1087_v39 }
 0x62c   :  { %1713 = vtanh.f32 %v2539_v4 }
 0x636   :  { %v1714_v7 = vpop.eup %1713 }
 0x637   :  { %v1091_v9 = vmul.f32 %v1714_v7, %v1712_v3 }
 0x639   :  { %v1129_v10 = vpack.c.bf16 %v1091_v9, %v1091_v9  ;;  %v2545_v12 = vadd.f32 %v1516_v8, %v1091_v9  ;;  %v1531_v9 = vld [vmem:[%s2695_s0 + $0xe0] sm:$0xff] }
 0x63b   :  { %1163 = vmatmul.mubr.bf16.vlgmr.msra.gmra.mrb[24].mxu0 %v1129_v10  ;;  %1204 = vmatmul.mubr.bf16.vlgmr.msra.gmra.mrb[24].mxu1 %v1129_v10  ;;  %v1532_v10 = vld [vmem:[%s2695_s0 + $0xe8] sm:$0xff] }
 0x63c   :  { %1095 = vadd.xlane.f32.xlu1 %v2545_v12  ;;  %1279 = vmatpush1.bf16.msra.mxu0 %v2359_v63  ;;  %v1786_v63 = vld [vmem:[%s2694_s2 + $0xcc] ss:$16 sps:$4 sm:$0xff]  }
 0x63d   :  { %1320 = vmatpush1.bf16.msra.mxu1 %v2365_v14  ;;  %1280 = vmatprep.subr.bf16.mxu0 %v2371_v6  ;;  %v1787_v14 = vld [vmem:[%s2694_s2 + $0xc8] ss:$16 sps:$4 sm:$0xff]   ;;  %v1788_v6 = vld [vmem:[%s2694_s2 + $0xec] ss:$16 sps:$4 sm:$0xff]  }
 0x63e   :  { %1321 = vmatprep.subr.bf16.mxu1 %v2377_v15  ;;  %1310 = vmatprep.mubr.bf16.mxu0 %v1791_v1  ;;  %v1789_v15 = vld [vmem:[%s2694_s2 + $0xe0] ss:$16 sps:$4 sm:$0xff]  }
 0x63f   :  { %1351 = vmatprep.mubr.bf16.mxu1 %v1791_v1  ;;  %v1784_v1 = vld [vmem:[%s2694_s2 + $0xac] ss:$16 sps:$4 sm:$0xff]  }
 0x640   :  { %1281 = vmatpush1.bf16.msra.mxu0 %v2385_v16  ;;  %v1790_v16 = vld [vmem:[%s2694_s2 + $0xe8] ss:$16 sps:$4 sm:$0xff]  }
 0x641   :  { %1322 = vmatpush1.bf16.msra.mxu1 %v2391_v19  ;;  %1282 = vmatprep.subr.bf16.mxu0 %v2397_v20  ;;  %v1520_v19 = vld [vmem:[%s2695_s0 + $0xc0] sm:$0xff]  ;;  %v1521_v20 = vld [vmem:[%s2695_s0 + $0xc8] sm:$0xff] }
 0x642   :  { %1323 = vmatprep.subr.bf16.mxu1 %v2403_v21 }
 0x644   :  { %1283 = vmatpush1.bf16.msra.mxu0 %v2409_v22 }
 0x645   :  { %1324 = vmatpush1.bf16.msra.mxu1 %v2415_v23  ;;  %1284 = vmatprep.subr.bf16.mxu0 %v2421_v25 }
 0x646   :  { %1325 = vmatprep.subr.bf16.mxu1 %v2427_v26 }
 0x648   :  { %1285 = vmatpush1.bf16.msra.mxu0 %v2433_v61 }
 0x649   :  { %1326 = vmatpush1.bf16.msra.mxu1 %v2439_v47  ;;  %1286 = vmatprep.subr.bf16.mxu0 %v2445_v48 }
 0x64a   :  { %1327 = vmatprep.subr.bf16.mxu1 %v2451_v40 }
 0x64c   :  { %1287 = vmatpush1.bf16.msra.mxu0 %v2457_v45 }
 0x64d   :  { %1328 = vmatpush1.bf16.msra.mxu1 %v2463_v49  ;;  %1288 = vmatprep.subr.bf16.mxu0 %v2469_v50 }
 0x64e   :  { %1329 = vmatprep.subr.bf16.mxu1 %v1784_v1 }
 0x650   :  { %1289 = vmatpush1.bf16.msra.mxu0 %v2476_v51  ;;  %v1523_v51 = vld [vmem:[%s2695_s0 + $0xd8] sm:$0xff] }
 0x651   :  { %1330 = vmatpush1.bf16.msra.mxu1 %v1785_v5  ;;  %1290 = vmatprep.subr.bf16.mxu0 %v2483_v52 }
 0x652   :  { %1331 = vmatprep.subr.bf16.mxu1 %v1786_v63 }
 0x654   :  { %1291 = vmatpush1.bf16.msra.mxu0 %v2491_v55  ;;  %v1522_v55 = vld [vmem:[%s2695_s0 + $0xd0] sm:$0xff] }
 0x655   :  { %1332 = vmatpush1.bf16.msra.mxu1 %v1787_v14  ;;  %1292 = vmatprep.subr.bf16.mxu0 %v2498_v27 }
 0x656   :  { %1333 = vmatprep.subr.bf16.mxu1 %v1788_v6 }
 0x658   :  { %1293 = vmatpush1.bf16.msra.mxu0 %v1789_v15 }
 0x659   :  { %1334 = vmatpush1.bf16.msra.mxu1 %v1790_v16 }
 0x6c9   :  { %v1096_v39 = vpop.xlane.xlu1 %1095 }
 0x70e   :  { %v1164_v21 = vpop.f32.mrb[24].mxu0  ;;  %v1205_v22 = vpop.f32.mrb[24].mxu1 }
 0x70f   :  { %v1212_v23 = vadd.f32 %v1520_v19, %v1164_v21  ;;  %v1166_v25 = vpop.f32.mrb[25].mxu0  ;;  %v1207_v26 = vpop.f32.mrb[25].mxu1  ;;  %v1214_v13 = vadd.f32 %v1522_v55, %v1205_v22 }
 0x710   :  { %v1213_v61 = vadd.f32 %v1521_v20, %v1166_v25  ;;  %v1168_v47 = vpop.f32.mrb[26].mxu0  ;;  %v1209_v48 = vpop.f32.mrb[26].mxu1  ;;  %v1215_v52 = vadd.f32 %v1523_v51, %v1207_v26  ;;  %v1534_v25 = vld [vmem:[%s2695_s0 + $0xf8] sm:$0xff] }
 0x711   :  { %v1524_v40 = vmul.f32 -1.442695, %v1212_v23  ;;  %v1169_v45 = vpop.f32.mrb[27].mxu0  ;;  %v1210_v49 = vpop.f32.mrb[27].mxu1 }
 0x712   :  { %v1525_v50 = vmul.f32 -1.442695, %v1213_v61  ;;  %v1526_v27 = vmul.f32 -1.442695, %v1215_v52  ;;  %v1533_v61 = vld [vmem:[%s2695_s0 + $0xf0] sm:$0xff] }
 0x713   :  { %1715 = vpow2.f32 %v1524_v40 }
 0x714   :  { %1717 = vpow2.f32 %v1525_v50 }
 0x715   :  { %1719 = vpow2.f32 %v1526_v27 }
 0x716   :  { %1721 = vtanh.f32 %v1214_v13 }
 0x71d   :  { %v1716_v24 = vpop.eup %1715 }
 0x71e   :  { %v1718_v28 = vpop.eup %1717  ;;  %v1219_v56 = vadd.f32 1.0, %v1716_v24 }
 0x71f   :  { %v1225_v30 = vadd.f32 1.0, %v1718_v28  ;;  %v1720_v58 = vpop.eup %1719 }
 0x720   :  { %1723 = vrcp.f32 %v1219_v56  ;;  %v1722_v60 = vpop.eup %1721  ;;  %v1232_v29 = vadd.f32 1.0, %v1720_v58 }
 0x721   :  { %1725 = vrcp.f32 %v1225_v30 }
 0x722   :  { %1727 = vrcp.f32 %v1232_v29  ;;  %v1474_v29 = vsel %vm1473_vm3, 1.0, %v1793_v37 }
 0x72a   :  { %v1724_v59 = vpop.eup %1723 }
 0x72b   :  { %v1726_v31 = vpop.eup %1725  ;;  %v1236_v17 = vmul.f32 %v1724_v59, %v1722_v60  ;;  %v1538_v60 = vld [vmem:[%s2696_s1 + $0x38] sm:$0xff] }
 0x72c   :  { %v1235_v57 = vmul.f32 %v1726_v31, %v2539_v4  ;;  %v1728_v62 = vpop.eup %1727 }
 0x72e   :  { %v1237_v32 = vadd.f32 %v1236_v17, %v1235_v57  ;;  %v1463_v17 = vsel %vm1462_vm2, 1.0, %v1793_v37 }
 0x72f   :  { %v1552_v57 = vpack.i.bf16 %v1474_v29, %v1463_v17 }
 0x730   :  { %1729 = vtanh.f32 %v1237_v32 }
 0x73a   :  { %v1730_v33 = vpop.eup %1729 }
 0x73b   :  { %v1239_v38 = vmul.f32 %v1730_v33, %v1728_v62  ;;  %v1518_v62 = vsel %vm1517_vm5, 1.0, %v1793_v37 }
 0x73d   :  { %v1277_v2 = vpack.c.bf16 %v1239_v38, %v1239_v38  ;;  %v1242_v18 = vadd.f32 %v1527_v34, %v1239_v38  ;;  %v1097_v34 = vmul.f32 0.0625, %v1096_v39 }
 0x73f   :  { %1311 = vmatmul.mubr.bf16.vlgmr.msra.gmra.mrb[28].mxu0 %v1277_v2  ;;  %1352 = vmatmul.mubr.bf16.vlgmr.msra.gmra.mrb[28].mxu1 %v1277_v2  ;;  %v2641_v38 = vsub.f32 %v2545_v12, %v1097_v34  ;;  %v953_v12 = vpop.xlane.xlu0 %952 }
 0x740   :  { %1243 = vadd.xlane.f32.xlu1 %v1242_v18 }
 0x741   :  { %v1099_v2 = vmul.f32 %v2641_v38, %v2641_v38 }
 0x7cd   :  { %v1244_v3 = vpop.xlane.xlu1 %1243 }
 0x7ce   :  { %v2610_v7 = vmul.f32 0.0625, %v1244_v3  ;;  %v510_v3 = vmul.f32 112.0, %v2173_v53 }
 0x7d0   :  { %v2613_v4 = vsub.f32 %v1242_v18, %v2610_v7  ;;  %v352_v18 = vmul.f32 112.0, %v2113_v41 }
 0x7d2   :  { %v1247_v8 = vmul.f32 %v2613_v4, %v2613_v4 }
 0x7d4   :  { %1248 = vadd.xlane.f32.xlu0 %v1247_v8  ;;  %v353_v8 = vmul.f32 %v352_v18, %v2113_v41 }
 0x812   :  { %v1312_v1 = vpop.f32.mrb[28].mxu0  ;;  %v1353_v5 = vpop.f32.mrb[28].mxu1 }
 0x813   :  { %v1360_v63 = vadd.f32 %v1531_v9, %v1312_v1  ;;  %v1314_v14 = vpop.f32.mrb[29].mxu0  ;;  %v1355_v6 = vpop.f32.mrb[29].mxu1  ;;  %v1362_v48 = vadd.f32 %v1533_v61, %v1353_v5  ;;  %v511_v9 = vmul.f32 %v510_v3, %v2173_v53  ;;  %v954_v1 = vmul.f32 112.0, %v2518_v35 }
 0x814   :  { %v1361_v15 = vadd.f32 %v1532_v10, %v1314_v14  ;;  %v1316_v16 = vpop.f32.mrb[30].mxu0  ;;  %v1357_v19 = vpop.f32.mrb[30].mxu1  ;;  %v1363_v26 = vadd.f32 %v1534_v25, %v1355_v6  ;;  %v354_v10 = vsub.f32 %v2242_v43, %v353_v8 }
 0x815   :  { %v1535_v20 = vmul.f32 -1.442695, %v1360_v63  ;;  %v1317_v21 = vpop.f32.mrb[31].mxu0  ;;  %v1358_v22 = vpop.f32.mrb[31].mxu1  ;;  %v512_v39 = vsub.f32 %v2244_v44, %v511_v9  ;;  %v955_v63 = vmul.f32 %v954_v1, %v2518_v35 }
 0x816   :  { %v1536_v23 = vmul.f32 -1.442695, %v1361_v15  ;;  %v1537_v47 = vmul.f32 -1.442695, %v1363_v26  ;;  %v355_v5 = vmul.f32 0.0625, %v354_v10 }
 0x817   :  { %1731 = vpow2.f32 %v1535_v20  ;;  %v513_v14 = vmul.f32 0.0625, %v512_v39  ;;  %v956_v6 = vsub.f32 %v953_v12, %v955_v63 }
 0x818   :  { %1733 = vpow2.f32 %v1536_v23  ;;  %v356_v15 = vadd.f32 1e-05, %v355_v5 }
 0x819   :  { %1735 = vpow2.f32 %v1537_v47  ;;  %v514_v16 = vadd.f32 1e-05, %v513_v14  ;;  %v957_v19 = vmul.f32 0.0625, %v956_v6 }
 0x81a   :  { %1737 = vtanh.f32 %v1362_v48 }
 0x81b   :  { %v958_v41 = vadd.f32 1e-05, %v957_v19 }
 0x821   :  { %v1732_v40 = vpop.eup %1731 }
 0x822   :  { %v1734_v45 = vpop.eup %1733  ;;  %v1367_v49 = vadd.f32 1.0, %v1732_v40 }
 0x823   :  { %v1373_v50 = vadd.f32 1.0, %v1734_v45  ;;  %v1736_v51 = vpop.eup %1735 }
 0x824   :  { %1739 = vrcp.f32 %v1367_v49  ;;  %v1738_v52 = vpop.eup %1737  ;;  %v1380_v24 = vadd.f32 1.0, %v1736_v51 }
 0x825   :  { %1741 = vrcp.f32 %v1373_v50 }
 0x826   :  { %1743 = vrcp.f32 %v1380_v24  ;;  %v1540_v24 = vsel %vm1539_vm7, 1.0, %v1793_v37 }
 0x82e   :  { %v1740_v55 = vpop.eup %1739 }
 0x82f   :  { %v1742_v27 = vpop.eup %1741  ;;  %v1384_v13 = vmul.f32 %v1740_v55, %v1738_v52 }
 0x830   :  { %v1383_v28 = vmul.f32 %v1742_v27, %v1237_v32  ;;  %v1744_v30 = vpop.eup %1743  ;;  %v1507_v32 = vsel %vm1506_vm4, 1.0, %v1793_v37 }
 0x831   :  { %v1557_v33 = vpack.i.bf16 %v1518_v62, %v1507_v32 }
 0x832   :  { %v1385_v56 = vadd.f32 %v1384_v13, %v1383_v28 }
 0x834   :  { %1745 = vtanh.f32 %v1385_v56  ;;  %v1102_v56 = vmul.f32 112.0, %v1097_v34 }
 0x835   :  { %1747 = vrsqrt.f32 %v356_v15 }
 0x836   :  { %1749 = vrsqrt.f32 %v514_v16 }
 0x837   :  { %1751 = vrsqrt.f32 %v958_v41 }
 0x83e   :  { %v1746_v58 = vpop.eup %1745 }
 0x83f   :  { %v1387_v59 = vmul.f32 %v1746_v58, %v1744_v30  ;;  %v1748_v53 = vpop.eup %1747  ;;  %v1103_v30 = vmul.f32 %v1102_v56, %v1097_v34 }
 0x840   :  { %v1750_v20 = vpop.eup %1749  ;;  %v364_v43 = vmul.f32 %v1748_v53, %v2313_v11 }
 0x841   :  { %v1390_v31 = vadd.f32 %v1538_v60, %v1387_v59  ;;  %v516_v21 = vmul.f32 %v1750_v20, %v2313_v11  ;;  %v1752_v44 = vpop.eup %1751 }
 0x842   :  { %v369_v23 = vmul.f32 %v364_v43, %v2116_v42  ;;  %v960_v26 = vmul.f32 %v1752_v44, %v2313_v11 }
 0x843   :  { %1391 = vadd.xlane.f32.xlu1 %v1390_v31  ;;  %v522_v35 = vmul.f32 %v516_v21, %v2176_v54 }
 0x844   :  { %v376_v48 = vadd.f32 %v2321_v0, %v369_v23  ;;  %v966_v51 = vmul.f32 %v960_v26, %v2522_v36  ;;  %v1529_v36 = vsel %vm1528_vm6, 1.0, %v1793_v37  ;;  %v1250_v37 = vmul.f32 112.0, %v2610_v7 }
 0x845   :  { %v523_v40 = vadd.f32 %v2321_v0, %v522_v35  ;;  %v1562_v28 = vpack.i.bf16 %v1540_v24, %v1529_v36 }
 0x846   :  { %v967_v27 = vadd.f32 %v2321_v0, %v966_v51  ;;  %v1251_v34 = vmul.f32 %v1250_v37, %v2610_v7 }
 0x854   :  { %1553 = vperm.xlu1 %1551, %v1552_v57  }
 0x858   :  { %1558 = vperm.xlu1 %1551, %v1557_v33  }
 0x861   :  { %v1249_v33 = vpop.xlane.xlu0 %1248 }
 0x87c   :  { %1100 = vadd.xlane.f32.xlu1 %v1099_v2  ;;  %v1252_v2 = vsub.f32 %v1249_v33, %v1251_v34 }
 0x87e   :  { %v1253_v18 = vmul.f32 0.0625, %v1252_v2 }
 0x880   :  { %v1254_v3 = vadd.f32 1e-05, %v1253_v18 }
 0x8d0   :  { %v1392_v22 = vpop.xlane.xlu1 %1391 }
 0x8d1   :  { %v1393_v25 = vmul.f32 0.0625, %v1392_v22 }
 0x8d3   :  { %v1394_v61 = vsub.f32 %v1390_v31, %v1393_v25  ;;  %v1398_v8 = vmul.f32 112.0, %v1393_v25 }
 0x8d4   :  { %v1554_v47 = vpop.permute.xlu1 %1553 }
 0x8d5   :  { %v1556_v45 = vunpack.i.h.bf16 %v1554_v47  ;;  %v1555_v49 = vunpack.i.l.bf16 %v1554_v47  ;;  %v1395_v50 = vmul.f32 %v1394_v61, %v1394_v61  ;;  %v1399_v10 = vmul.f32 %v1398_v8, %v1393_v25 }
 0x8d7   :  { %v382_v52 = vmul.f32 %v1555_v49, %v376_v48  ;;  %v529_v55 = vmul.f32 %v1556_v45, %v523_v40  ;;  %1396 = vadd.xlane.f32.xlu0 %v1395_v50 }
 0x8d8   :  { %v1559_v42 = vpop.permute.xlu1 %1558 }
 0x8d9   :  { %383 = vst [vmem:[%s2700_s6] sm:$0xff] %v382_v52  ;;  %1475 = vst [vmem:[%s2700_s6 + $0x8] sm:$0xff] %v529_v55  ;;  %v1560_v54 = vunpack.i.l.bf16 %v1559_v42  ;;  %v1561_v57 = vunpack.i.h.bf16 %v1559_v42 }
 0x8db   :  { %v973_v13 = vmul.f32 %v1560_v54, %v967_v27 }
 0x8dd   :  { %1508 = vst [vmem:[%s2700_s6 + $0x20] sm:$0xff] %v973_v13 }
 0x8ed   :  { %1563 = vperm.xlu0 %1545, %v1562_v28  }
 0x909   :  { %v1101_v58 = vpop.xlane.xlu1 %1100 }
 0x90a   :  { %v1104_v60 = vsub.f32 %v1101_v58, %v1103_v30 }
 0x90c   :  { %v1105_v59 = vmul.f32 0.0625, %v1104_v60 }
 0x90e   :  { %v1106_v31 = vadd.f32 1e-05, %v1105_v59 }
 0x910   :  { %1753 = vrsqrt.f32 %v1106_v31 }
 0x911   :  { %1755 = vrsqrt.f32 %v1254_v3 }
 0x91a   :  { %v1754_v17 = vpop.eup %1753 }
 0x91b   :  { %v1108_v29 = vmul.f32 %v1754_v17, %v2313_v11  ;;  %v1756_v9 = vpop.eup %1755 }
 0x91c   :  { %v1256_v39 = vmul.f32 %v1756_v9, %v2313_v11 }
 0x91d   :  { %v1114_v32 = vmul.f32 %v1108_v29, %v2641_v38 }
 0x91e   :  { %v1262_v63 = vmul.f32 %v1256_v39, %v2613_v4 }
 0x91f   :  { %v1115_v46 = vadd.f32 %v2321_v0, %v1114_v32 }
 0x920   :  { %v1263_v6 = vadd.f32 %v2321_v0, %v1262_v63 }
 0x921   :  { %v1121_v62 = vmul.f32 %v1561_v57, %v1115_v46 }
 0x923   :  { %1519 = vst [vmem:[%s2700_s6 + $0x28] sm:$0xff] %v1121_v62 }
 0x964   :  { %v1397_v38 = vpop.xlane.xlu0 %1396 }
 0x965   :  { %v1400_v1 = vsub.f32 %v1397_v38, %v1399_v10 }
 0x967   :  { %v1401_v12 = vmul.f32 0.0625, %v1400_v1 }
 0x969   :  { %v1402_v5 = vadd.f32 1e-05, %v1401_v12 }
 0x96b   :  { %1757 = vrsqrt.f32 %v1402_v5 }
 0x96c   :  { %v1564_v14 = vpop.permute.xlu0 %1563 }
 0x96d   :  { %v1565_v7 = vunpack.i.l.bf16 %v1564_v14  ;;  %v1566_v20 = vunpack.i.h.bf16 %v1564_v14 }
 0x96f   :  { %v1269_v15 = vmul.f32 %v1565_v7, %v1263_v6 }
 0x971   :  { %1530 = vst [vmem:[%s2700_s6 + $0x30] sm:$0xff] %v1269_v15 }
 0x975   :  { %v1758_v16 = vpop.eup %1757 }
 0x976   :  { %v1404_v19 = vmul.f32 %v1758_v16, %v2313_v11 }
 0x978   :  { %v1410_v41 = vmul.f32 %v1404_v19, %v1394_v61 }
 0x97a   :  { %v1411_v53 = vadd.f32 %v2321_v0, %v1410_v41 }
 0x97c   :  { %v1417_v43 = vmul.f32 %v1566_v20, %v1411_v53 }
 0x97e   :  { %1541 = vst [vmem:[%s2700_s6 + $0x38] sm:$0xff] %v1417_v43 }

// kernel: _listener_forward_padded.3
= control target key start
LH: loop header
LB: loop body
LE: loop exit
PB: predicated region body
PF: predicated region fallthrough
CT: control target
= control target key end

     0   :  { %v1791_v1 = vmov 0   ;;  %v1792_v33 = vmov 0.0|0.0   ;;  %s2694_s2 = inlined_call_operand.vmem [shape: bf16[128,512], index: 2, kind: input, shape index: {}]   ;;  %s2695_s0 = inlined_call_operand.vmem [shape: f32[8,8,512], index: 0, kind: input, shape index: {}]   ;;  %s2696_s1 = inlined_call_operand.vmem [shape: f32[8,8,128], index: 1, kind: input, shape index: {}]   ;;  %s2697_s5 = inlined_call_operand.vmem [shape: s32[8,1], index: 5, kind: input, shape index: {}]   ;;  %s2698_s3 = inlined_call_operand.vmem [shape: f32[1,128], index: 3, kind: input, shape index: {}]   ;;  %s2699_s4 = inlined_call_operand.vmem [shape: f32[1,128], index: 4, kind: input, shape index: {}]   ;;  %s2700_s6 = inlined_call_operand.vmem [shape: f32[8,8,128], index: 6, kind: output, shape index: {}]  }
   0x1   :  { %v1832_v0 = vld [vmem:[%s2694_s2 + $0x4] ss:$16 sps:$4 sm:$0xff]   ;;  %265 = vmatprep.mubr.bf16.mxu0 %v1791_v1  ;;  %306 = vmatprep.mubr.bf16.mxu1 %v1791_v1  ;;  %v1839_v2 = vld [vmem:[%s2694_s2] ss:$16 sps:$4 sm:$0xff]   ;;  %v1864_v6 = vld [vmem:[%s2694_s2 + $0xc] ss:$16 sps:$4 sm:$0xff]  }
   0x2   :  { %1545 = vset.pattern.permute.xlu0 %v1791_v1  ;;  %1551 = vset.pattern.permute.xlu1 %v1791_v1  ;;  %v1847_v3 = vld [vmem:[%s2694_s2 + $0x24] ss:$16 sps:$4 sm:$0xff]   ;;  %v1853_v4 = vld [vmem:[%s2694_s2 + $0x20] ss:$16 sps:$4 sm:$0xff]   ;;  %v1869_v7 = vld [vmem:[%s2694_s2 + $0x8] ss:$16 sps:$4 sm:$0xff]  }
   0x3   :  { %233 = vmatprep.subr.bf16.mxu0 %v1832_v0  ;;  %v1859_v5 = vld [vmem:[%s2694_s2 + $0x44] ss:$16 sps:$4 sm:$0xff]   ;;  %v1875_v8 = vld [vmem:[%s2694_s2 + $0x40] ss:$16 sps:$4 sm:$0xff]   ;;  %274 = vmatprep.subr.bf16.mxu1 %v1864_v6  ;;  %v1888_v10 = vld [vmem:[%s2694_s2 + $0x2c] ss:$16 sps:$4 sm:$0xff]  }
   0x4   :  { %234 = vmatpush1.bf16.msra.mxu0 %v1839_v2  ;;  %v1882_v9 = vld [vmem:[%s2694_s2 + $0x64] ss:$16 sps:$4 sm:$0xff]   ;;  %275 = vmatpush1.bf16.msra.mxu1 %v1869_v7  ;;  %v1893_v11 = vld [vmem:[%s2694_s2 + $0x28] ss:$16 sps:$4 sm:$0xff]   ;;  %v1900_v12 = vld [vmem:[%s2694_s2 + $0x60] ss:$16 sps:$4 sm:$0xff]  }
   0x5   :  { %235 = vmatprep.subr.bf16.mxu0 %v1847_v3  ;;  %276 = vmatprep.subr.bf16.mxu1 %v1888_v10  ;;  %v1905_v13 = vld [vmem:[%s2694_s2 + $0x84] ss:$16 sps:$4 sm:$0xff]   ;;  %v1910_v14 = vld [vmem:[%s2694_s2 + $0x4c] ss:$16 sps:$4 sm:$0xff]   ;;  %v1917_v15 = vld [vmem:[%s2694_s2 + $0x48] ss:$16 sps:$4 sm:$0xff]  }
   0x6   :  { %v1923_v16 = vld [vmem:[%s2694_s2 + $0x6c] ss:$16 sps:$4 sm:$0xff]   ;;  %v1929_v17 = vld [vmem:[%s2694_s2 + $0x80] ss:$16 sps:$4 sm:$0xff]   ;;  %v1935_v18 = vld [vmem:[%s2694_s2 + $0xa4] ss:$16 sps:$4 sm:$0xff]  }
   0x7   :  { %v1941_v19 = vld [vmem:[%s2694_s2 + $0x68] ss:$16 sps:$4 sm:$0xff]   ;;  %v1947_v20 = vld [vmem:[%s2694_s2 + $0x8c] ss:$16 sps:$4 sm:$0xff]   ;;  %v1953_v21 = vld [vmem:[%s2694_s2 + $0xa0] ss:$16 sps:$4 sm:$0xff]  }
   0x8   :  { %236 = vmatpush1.bf16.msra.mxu0 %v1853_v4  ;;  %277 = vmatpush1.bf16.msra.mxu1 %v1893_v11  ;;  %v1958_v22 = vld [vmem:[%s2694_s2 + $0xc4] ss:$16 sps:$4 sm:$0xff]   ;;  %v1965_v23 = vld [vmem:[%s2694_s2 + $0x88] ss:$16 sps:$4 sm:$0xff]   ;;  %v1971_v24 = vld [vmem:[%s2694_s2 + $0xac] ss:$16 sps:$4 sm:$0xff]  }
   0x9   :  { %237 = vmatprep.subr.bf16.mxu0 %v1859_v5  ;;  %278 = vmatprep.subr.bf16.mxu1 %v1910_v14  ;;  %v1977_v25 = vld [vmem:[%s2694_s2 + $0xc0] ss:$16 sps:$4 sm:$0xff]   ;;  %v1983_v26 = vld [vmem:[%s2694_s2 + $0xe4] ss:$16 sps:$4 sm:$0xff]   ;;  %v1989_v27 = vld [vmem:[%s2694_s2 + $0xa8] ss:$16 sps:$4 sm:$0xff]  }
   0xa   :  { %v1995_v28 = vld [vmem:[%s2694_s2 + $0xcc] ss:$16 sps:$4 sm:$0xff]   ;;  %v2001_v29 = vld [vmem:[%s2694_s2 + $0xe0] ss:$16 sps:$4 sm:$0xff]   ;;  %v2008_v30 = vld [vmem:[%s2694_s2 + $0xc8] ss:$16 sps:$4 sm:$0xff]  }
   0xb   :  { %v2014_v31 = vld [vmem:[%s2694_s2 + $0xec] ss:$16 sps:$4 sm:$0xff]   ;;  %v2021_v32 = vld [vmem:[%s2694_s2 + $0xe8] ss:$16 sps:$4 sm:$0xff]   ;;  %v68_v34 = vld [vmem:[%s2695_s0] sm:$0xff] }
   0xc   :  { %238 = vmatpush1.bf16.msra.mxu0 %v1875_v8  ;;  %279 = vmatpush1.bf16.msra.mxu1 %v1917_v15  ;;  %v69_v35 = vld [vmem:[%s2695_s0 + $0x8] sm:$0xff]  ;;  %v71_v44 = vld [vmem:[%s2695_s0 + $0x18] sm:$0xff]  ;;  %v70_v50 = vld [vmem:[%s2695_s0 + $0x10] sm:$0xff] }
   0xd   :  { %239 = vmatprep.subr.bf16.mxu0 %v1882_v9  ;;  %280 = vmatprep.subr.bf16.mxu1 %v1923_v16 }
  0x10   :  { %240 = vmatpush1.bf16.msra.mxu0 %v1900_v12  ;;  %281 = vmatpush1.bf16.msra.mxu1 %v1941_v19 }
  0x11   :  { %241 = vmatprep.subr.bf16.mxu0 %v1905_v13  ;;  %282 = vmatprep.subr.bf16.mxu1 %v1947_v20 }
  0x14   :  { %242 = vmatpush1.bf16.msra.mxu0 %v1929_v17  ;;  %283 = vmatpush1.bf16.msra.mxu1 %v1965_v23 }
  0x15   :  { %243 = vmatprep.subr.bf16.mxu0 %v1935_v18  ;;  %284 = vmatprep.subr.bf16.mxu1 %v1971_v24 }
  0x18   :  { %244 = vmatpush1.bf16.msra.mxu0 %v1953_v21  ;;  %285 = vmatpush1.bf16.msra.mxu1 %v1989_v27 }
  0x19   :  { %245 = vmatprep.subr.bf16.mxu0 %v1958_v22  ;;  %286 = vmatprep.subr.bf16.mxu1 %v1995_v28 }
  0x1c   :  { %246 = vmatpush1.bf16.msra.mxu0 %v1977_v25  ;;  %287 = vmatpush1.bf16.msra.mxu1 %v2008_v30 }
  0x1d   :  { %247 = vmatprep.subr.bf16.mxu0 %v1983_v26  ;;  %288 = vmatprep.subr.bf16.mxu1 %v2014_v31 }
  0x20   :  { %248 = vmatpush1.bf16.msra.mxu0 %v2001_v29  ;;  %289 = vmatpush1.bf16.msra.mxu1 %v2021_v32 }
  0x21   :  { %390 = vmatprep.subr.bf16.mxu0 %v1832_v0  ;;  %431 = vmatprep.subr.bf16.mxu1 %v1864_v6 }
  0x23   :  { %266 = vmatmul.mubr.bf16.vlgmr.msra.gmra.mrb[0].mxu0 %v1792_v33  ;;  %307 = vmatmul.mubr.bf16.vlgmr.msra.gmra.mrb[0].mxu1 %v1792_v33 }
  0x24   :  { %391 = vmatpush1.bf16.msra.mxu0 %v1839_v2  ;;  %422 = vmatprep.mubr.bf16.mxu0 %v1791_v1 }
  0x25   :  { %392 = vmatprep.subr.bf16.mxu0 %v1847_v3  ;;  %432 = vmatpush1.bf16.msra.mxu1 %v1869_v7 }
  0x26   :  { %433 = vmatprep.subr.bf16.mxu1 %v1888_v10  ;;  %463 = vmatprep.mubr.bf16.mxu1 %v1791_v1 }
  0x28   :  { %393 = vmatpush1.bf16.msra.mxu0 %v1853_v4 }
  0x29   :  { %394 = vmatprep.subr.bf16.mxu0 %v1859_v5  ;;  %434 = vmatpush1.bf16.msra.mxu1 %v1893_v11 }
  0x2a   :  { %435 = vmatprep.subr.bf16.mxu1 %v1910_v14 }
  0x2c   :  { %395 = vmatpush1.bf16.msra.mxu0 %v1875_v8 }
  0x2d   :  { %396 = vmatprep.subr.bf16.mxu0 %v1882_v9  ;;  %436 = vmatpush1.bf16.msra.mxu1 %v1917_v15 }
  0x2e   :  { %437 = vmatprep.subr.bf16.mxu1 %v1923_v16 }
  0x30   :  { %397 = vmatpush1.bf16.msra.mxu0 %v1900_v12 }
  0x31   :  { %398 = vmatprep.subr.bf16.mxu0 %v1905_v13  ;;  %438 = vmatpush1.bf16.msra.mxu1 %v1941_v19 }
  0x32   :  { %439 = vmatprep.subr.bf16.mxu1 %v1947_v20 }
  0x34   :  { %399 = vmatpush1.bf16.msra.mxu0 %v1929_v17 }
  0x35   :  { %400 = vmatprep.subr.bf16.mxu0 %v1935_v18  ;;  %440 = vmatpush1.bf16.msra.mxu1 %v1965_v23 }
  0x36   :  { %441 = vmatprep.subr.bf16.mxu1 %v1971_v24 }
  0x38   :  { %401 = vmatpush1.bf16.msra.mxu0 %v1953_v21 }
  0x39   :  { %402 = vmatprep.subr.bf16.mxu0 %v1958_v22  ;;  %442 = vmatpush1.bf16.msra.mxu1 %v1989_v27 }
  0x3a   :  { %443 = vmatprep.subr.bf16.mxu1 %v1995_v28 }
  0x3c   :  { %403 = vmatpush1.bf16.msra.mxu0 %v1977_v25 }
  0x3d   :  { %404 = vmatprep.subr.bf16.mxu0 %v1983_v26  ;;  %444 = vmatpush1.bf16.msra.mxu1 %v2008_v30 }
  0x3e   :  { %445 = vmatprep.subr.bf16.mxu1 %v2014_v31 }
  0x40   :  { %405 = vmatpush1.bf16.msra.mxu0 %v2001_v29 }
  0x41   :  { %538 = vmatprep.subr.bf16.mxu0 %v1832_v0  ;;  %446 = vmatpush1.bf16.msra.mxu1 %v2021_v32 }
  0x42   :  { %579 = vmatprep.subr.bf16.mxu1 %v1864_v6 }
  0xf6   :  { %v267_v36 = vpop.f32.mrb[0].mxu0  ;;  %v308_v45 = vpop.f32.mrb[0].mxu1 }
  0xf7   :  { %v315_v37 = vadd.f32 %v267_v36, %v68_v34  ;;  %v269_v38 = vpop.f32.mrb[1].mxu0  ;;  %v310_v46 = vpop.f32.mrb[1].mxu1  ;;  %v317_v52 = vadd.f32 %v308_v45, %v70_v50  ;;  %v343_v36 = vld [vmem:[%s2696_s1] sm:$0xff]  ;;  %v1466_v45 = vld [vmem:[%s2695_s0 + $0x28] sm:$0xff] }
  0xf8   :  { %v316_v39 = vadd.f32 %v269_v38, %v69_v35  ;;  %v271_v40 = vpop.f32.mrb[2].mxu0  ;;  %v318_v47 = vadd.f32 %v310_v46, %v71_v44  ;;  %v312_v48 = vpop.f32.mrb[2].mxu1  ;;  %v1465_v44 = vld [vmem:[%s2695_s0 + $0x20] sm:$0xff] }
  0xf9   :  { %v1458_v41 = vmul.f32 -1.442695, %v315_v37  ;;  %v272_v42 = vpop.f32.mrb[3].mxu0  ;;  %v313_v49 = vpop.f32.mrb[3].mxu1 }
  0xfa   :  { %v1459_v43 = vmul.f32 -1.442695, %v316_v39  ;;  %v1460_v51 = vmul.f32 -1.442695, %v318_v47 }
  0xfb   :  { %1615 = vpow2.f32 %v1458_v41 }
  0xfc   :  { %1617 = vpow2.f32 %v1459_v43 }
  0xfd   :  { %1619 = vpow2.f32 %v1460_v51 }
  0xfe   :  { %1621 = vtanh.f32 %v317_v52 }
 0x105   :  { %v1616_v53 = vpop.eup %1615 }
 0x106   :  { %v1618_v54 = vpop.eup %1617  ;;  %v322_v55 = vadd.f32 1.0, %v1616_v53 }
 0x107   :  { %v328_v56 = vadd.f32 1.0, %v1618_v54  ;;  %v1620_v57 = vpop.eup %1619 }
 0x108   :  { %1623 = vrcp.f32 %v322_v55  ;;  %v1622_v58 = vpop.eup %1621  ;;  %v335_v60 = vadd.f32 1.0, %v1620_v57 }
 0x109   :  { %1625 = vrcp.f32 %v328_v56 }
 0x10a   :  { %1627 = vrcp.f32 %v335_v60  ;;  %v1467_v60 = vld [vmem:[%s2695_s0 + $0x30] sm:$0xff] }
 0x112   :  { %v1624_v59 = vpop.eup %1623 }
 0x113   :  { %v1626_v61 = vpop.eup %1625  ;;  %v339_v62 = vmul.f32 %v1624_v59, %v1622_v58  ;;  %v1468_v58 = vld [vmem:[%s2695_s0 + $0x38] sm:$0xff] }
 0x114   :  { %v338_v63 = vmul.f32 0.0, %v1626_v61  ;;  %v1628_v34 = vpop.eup %1627 }
 0x116   :  { %v2073_v33 = vadd.f32 %v339_v62, %v338_v63 }
 0x118   :  { %1629 = vtanh.f32 %v2073_v33 }
 0x122   :  { %v1630_v35 = vpop.eup %1629 }
 0x123   :  { %v342_v37 = vmul.f32 %v1630_v35, %v1628_v34 }
 0x125   :  { %v389_v38 = vpack.c.bf16 %v342_v37, %v342_v37  ;;  %v344_v39 = vadd.f32 %v343_v36, %v342_v37 }
 0x127   :  { %423 = vmatmul.mubr.bf16.vlgmr.msra.gmra.mrb[4].mxu0 %v389_v38  ;;  %464 = vmatmul.mubr.bf16.vlgmr.msra.gmra.mrb[4].mxu1 %v389_v38 }
 0x128   :  { %345 = vadd.xlane.f32.xlu0 %v344_v39  ;;  %539 = vmatpush1.bf16.msra.mxu0 %v1839_v2 }
 0x129   :  { %580 = vmatpush1.bf16.msra.mxu1 %v1869_v7  ;;  %540 = vmatprep.subr.bf16.mxu0 %v1847_v3 }
 0x12a   :  { %581 = vmatprep.subr.bf16.mxu1 %v1888_v10  ;;  %570 = vmatprep.mubr.bf16.mxu0 %v1791_v1 }
 0x12b   :  { %611 = vmatprep.mubr.bf16.mxu1 %v1791_v1 }
 0x12c   :  { %541 = vmatpush1.bf16.msra.mxu0 %v1853_v4 }
 0x12d   :  { %582 = vmatpush1.bf16.msra.mxu1 %v1893_v11  ;;  %542 = vmatprep.subr.bf16.mxu0 %v1859_v5 }
 0x12e   :  { %583 = vmatprep.subr.bf16.mxu1 %v1910_v14 }
 0x130   :  { %543 = vmatpush1.bf16.msra.mxu0 %v1875_v8 }
 0x131   :  { %584 = vmatpush1.bf16.msra.mxu1 %v1917_v15  ;;  %544 = vmatprep.subr.bf16.mxu0 %v1882_v9 }
 0x132   :  { %585 = vmatprep.subr.bf16.mxu1 %v1923_v16 }
 0x134   :  { %545 = vmatpush1.bf16.msra.mxu0 %v1900_v12 }
 0x135   :  { %586 = vmatpush1.bf16.msra.mxu1 %v1941_v19  ;;  %546 = vmatprep.subr.bf16.mxu0 %v1905_v13 }
 0x136   :  { %587 = vmatprep.subr.bf16.mxu1 %v1947_v20 }
 0x138   :  { %547 = vmatpush1.bf16.msra.mxu0 %v1929_v17 }
 0x139   :  { %588 = vmatpush1.bf16.msra.mxu1 %v1965_v23  ;;  %548 = vmatprep.subr.bf16.mxu0 %v1935_v18 }
 0x13a   :  { %589 = vmatprep.subr.bf16.mxu1 %v1971_v24 }
 0x13c   :  { %549 = vmatpush1.bf16.msra.mxu0 %v1953_v21 }
 0x13d   :  { %590 = vmatpush1.bf16.msra.mxu1 %v1989_v27  ;;  %550 = vmatprep.subr.bf16.mxu0 %v1958_v22 }
 0x13e   :  { %591 = vmatprep.subr.bf16.mxu1 %v1995_v28 }
 0x140   :  { %551 = vmatpush1.bf16.msra.mxu0 %v1977_v25 }
 0x141   :  { %592 = vmatpush1.bf16.msra.mxu1 %v2008_v30  ;;  %552 = vmatprep.subr.bf16.mxu0 %v1983_v26 }
 0x142   :  { %593 = vmatprep.subr.bf16.mxu1 %v2014_v31 }
 0x144   :  { %553 = vmatpush1.bf16.msra.mxu0 %v2001_v29 }
 0x145   :  { %594 = vmatpush1.bf16.msra.mxu1 %v2021_v32  ;;  %686 = vmatprep.subr.bf16.mxu0 %v1832_v0 }
 0x146   :  { %727 = vmatprep.subr.bf16.mxu1 %v1864_v6 }
 0x1b5   :  { %v346_v40 = vpop.xlane.xlu0 %345 }
 0x1b6   :  { %v2113_v41 = vmul.f32 0.03125, %v346_v40 }
 0x1b8   :  { %v2116_v42 = vsub.f32 %v344_v39, %v2113_v41 }
 0x1ba   :  { %v349_v43 = vmul.f32 %v2116_v42, %v2116_v42 }
 0x1bc   :  { %350 = vadd.xlane.f32.xlu0 %v349_v43 }
 0x1fa   :  { %v424_v46 = vpop.f32.mrb[4].mxu0  ;;  %v465_v47 = vpop.f32.mrb[4].mxu1 }
 0x1fb   :  { %v472_v48 = vadd.f32 %v1465_v44, %v424_v46  ;;  %v426_v49 = vpop.f32.mrb[5].mxu0  ;;  %v467_v50 = vpop.f32.mrb[5].mxu1  ;;  %v474_v62 = vadd.f32 %v1467_v60, %v465_v47 }
 0x1fc   :  { %v473_v51 = vadd.f32 %v1466_v45, %v426_v49  ;;  %v428_v52 = vpop.f32.mrb[6].mxu0  ;;  %v469_v53 = vpop.f32.mrb[6].mxu1  ;;  %v475_v59 = vadd.f32 %v1468_v58, %v467_v50  ;;  %v1472_v49 = vld [vmem:[%s2696_s1 + $0x8] sm:$0xff] }
 0x1fd   :  { %v1469_v54 = vmul.f32 -1.442695, %v472_v48  ;;  %v429_v55 = vpop.f32.mrb[7].mxu0  ;;  %v470_v56 = vpop.f32.mrb[7].mxu1 }
 0x1fe   :  { %v1470_v57 = vmul.f32 -1.442695, %v473_v51  ;;  %v1471_v61 = vmul.f32 -1.442695, %v475_v59  ;;  %v1476_v56 = vld [vmem:[%s2695_s0 + $0x40] sm:$0xff] }
 0x1ff   :  { %1631 = vpow2.f32 %v1469_v54 }
 0x200   :  { %1633 = vpow2.f32 %v1470_v57  ;;  %v1477_v57 = vld [vmem:[%s2695_s0 + $0x48] sm:$0xff] }
 0x201   :  { %1635 = vpow2.f32 %v1471_v61 }
 0x202   :  { %1637 = vtanh.f32 %v474_v62 }
 0x209   :  { %v1632_v63 = vpop.eup %1631 }
 0x20a   :  { %v1634_v34 = vpop.eup %1633  ;;  %v479_v35 = vadd.f32 1.0, %v1632_v63 }
 0x20b   :  { %v485_v36 = vadd.f32 1.0, %v1634_v34  ;;  %v1636_v37 = vpop.eup %1635 }
 0x20c   :  { %1639 = vrcp.f32 %v479_v35  ;;  %v1638_v38 = vpop.eup %1637  ;;  %v492_v44 = vadd.f32 1.0, %v1636_v37 }
 0x20d   :  { %1641 = vrcp.f32 %v485_v36 }
 0x20e   :  { %1643 = vrcp.f32 %v492_v44  ;;  %v1478_v44 = vld [vmem:[%s2695_s0 + $0x50] sm:$0xff] }
 0x216   :  { %v1640_v39 = vpop.eup %1639 }
 0x217   :  { %v1642_v40 = vpop.eup %1641  ;;  %v496_v43 = vmul.f32 %v1640_v39, %v1638_v38 }
 0x218   :  { %v495_v45 = vmul.f32 %v1642_v40, %v2073_v33  ;;  %v1644_v47 = vpop.eup %1643  ;;  %v1479_v40 = vld [vmem:[%s2695_s0 + $0x58] sm:$0xff] }
 0x21a   :  { %v2133_v46 = vadd.f32 %v496_v43, %v495_v45 }
 0x21c   :  { %1645 = vtanh.f32 %v2133_v46 }
 0x226   :  { %v1646_v48 = vpop.eup %1645 }
 0x227   :  { %v499_v50 = vmul.f32 %v1646_v48, %v1644_v47 }
 0x229   :  { %v537_v51 = vpack.c.bf16 %v499_v50, %v499_v50  ;;  %v502_v52 = vadd.f32 %v1472_v49, %v499_v50 }
 0x22b   :  { %571 = vmatmul.mubr.bf16.vlgmr.msra.gmra.mrb[8].mxu0 %v537_v51  ;;  %612 = vmatmul.mubr.bf16.vlgmr.msra.gmra.mrb[8].mxu1 %v537_v51 }
 0x22c   :  { %503 = vadd.xlane.f32.xlu1 %v502_v52  ;;  %687 = vmatpush1.bf16.msra.mxu0 %v1839_v2 }
 0x22d   :  { %728 = vmatpush1.bf16.msra.mxu1 %v1869_v7  ;;  %688 = vmatprep.subr.bf16.mxu0 %v1847_v3 }
 0x22e   :  { %729 = vmatprep.subr.bf16.mxu1 %v1888_v10  ;;  %718 = vmatprep.mubr.bf16.mxu0 %v1791_v1 }
 0x22f   :  { %759 = vmatprep.mubr.bf16.mxu1 %v1791_v1 }
 0x230   :  { %689 = vmatpush1.bf16.msra.mxu0 %v1853_v4 }
 0x231   :  { %730 = vmatpush1.bf16.msra.mxu1 %v1893_v11  ;;  %690 = vmatprep.subr.bf16.mxu0 %v1859_v5 }
 0x232   :  { %731 = vmatprep.subr.bf16.mxu1 %v1910_v14 }
 0x234   :  { %691 = vmatpush1.bf16.msra.mxu0 %v1875_v8 }
 0x235   :  { %732 = vmatpush1.bf16.msra.mxu1 %v1917_v15  ;;  %692 = vmatprep.subr.bf16.mxu0 %v1882_v9 }
 0x236   :  { %733 = vmatprep.subr.bf16.mxu1 %v1923_v16 }
 0x238   :  { %693 = vmatpush1.bf16.msra.mxu0 %v1900_v12 }
 0x239   :  { %734 = vmatpush1.bf16.msra.mxu1 %v1941_v19  ;;  %694 = vmatprep.subr.bf16.mxu0 %v1905_v13 }
 0x23a   :  { %735 = vmatprep.subr.bf16.mxu1 %v1947_v20 }
 0x23c   :  { %695 = vmatpush1.bf16.msra.mxu0 %v1929_v17 }
 0x23d   :  { %736 = vmatpush1.bf16.msra.mxu1 %v1965_v23  ;;  %696 = vmatprep.subr.bf16.mxu0 %v1935_v18 }
 0x23e   :  { %737 = vmatprep.subr.bf16.mxu1 %v1971_v24 }
 0x240   :  { %697 = vmatpush1.bf16.msra.mxu0 %v1953_v21 }
 0x241   :  { %738 = vmatpush1.bf16.msra.mxu1 %v1989_v27  ;;  %698 = vmatprep.subr.bf16.mxu0 %v1958_v22 }
 0x242   :  { %739 = vmatprep.subr.bf16.mxu1 %v1995_v28 }
 0x244   :  { %699 = vmatpush1.bf16.msra.mxu0 %v1977_v25 }
 0x245   :  { %740 = vmatpush1.bf16.msra.mxu1 %v2008_v30  ;;  %700 = vmatprep.subr.bf16.mxu0 %v1983_v26 }
 0x246   :  { %741 = vmatprep.subr.bf16.mxu1 %v2014_v31 }
 0x248   :  { %701 = vmatpush1.bf16.msra.mxu0 %v2001_v29 }
 0x249   :  { %742 = vmatpush1.bf16.msra.mxu1 %v2021_v32  ;;  %834 = vmatprep.subr.bf16.mxu0 %v1832_v0 }
 0x24a   :  { %875 = vmatprep.subr.bf16.mxu1 %v1864_v6 }
 0x2b9   :  { %v504_v33 = vpop.xlane.xlu1 %503 }
 0x2ba   :  { %v2173_v53 = vmul.f32 0.03125, %v504_v33 }
 0x2bc   :  { %v2176_v54 = vsub.f32 %v502_v52, %v2173_v53 }
 0x2be   :  { %v507_v55 = vmul.f32 %v2176_v54, %v2176_v54 }
 0x2c0   :  { %508 = vadd.xlane.f32.xlu0 %v507_v55 }
 0x2fe   :  { %v572_v58 = vpop.f32.mrb[8].mxu0  ;;  %v613_v59 = vpop.f32.mrb[8].mxu1 }
 0x2ff   :  { %v620_v60 = vadd.f32 %v1476_v56, %v572_v58  ;;  %v574_v61 = vpop.f32.mrb[9].mxu0  ;;  %v615_v62 = vpop.f32.mrb[9].mxu1  ;;  %v622_v47 = vadd.f32 %v1478_v44, %v613_v59 }
 0x300   :  { %v621_v63 = vadd.f32 %v1477_v57, %v574_v61  ;;  %v576_v34 = vpop.f32.mrb[10].mxu0  ;;  %v617_v35 = vpop.f32.mrb[10].mxu1  ;;  %v623_v43 = vadd.f32 %v1479_v40, %v615_v62 }
 0x301   :  { %v1480_v36 = vmul.f32 -1.442695, %v620_v60  ;;  %v577_v37 = vpop.f32.mrb[11].mxu0  ;;  %v618_v38 = vpop.f32.mrb[11].mxu1 }
 0x302   :  { %v1481_v39 = vmul.f32 -1.442695, %v621_v63  ;;  %v1482_v45 = vmul.f32 -1.442695, %v623_v43  ;;  %v1483_v63 = vld [vmem:[%s2696_s1 + $0x10] sm:$0xff]  ;;  %v1793_v37 = vmov 0.0   ;;  %v2242_v43 = vpop.xlane.xlu0 %350 }
 0x303   :  { %1647 = vpow2.f32 %v1480_v36 }
 0x304   :  { %1649 = vpow2.f32 %v1481_v39 }
 0x305   :  { %1651 = vpow2.f32 %v1482_v45 }
 0x306   :  { %1653 = vtanh.f32 %v622_v47 }
 0x30d   :  { %v1648_v48 = vpop.eup %1647 }
 0x30e   :  { %v1650_v49 = vpop.eup %1649  ;;  %v627_v50 = vadd.f32 1.0, %v1648_v48 }
 0x30f   :  { %v633_v51 = vadd.f32 1.0, %v1650_v49  ;;  %v1652_v52 = vpop.eup %1651 }
 0x310   :  { %1655 = vrcp.f32 %v627_v50  ;;  %v1654_v33 = vpop.eup %1653  ;;  %v640_v58 = vadd.f32 1.0, %v1652_v52  ;;  %v1487_v50 = vld [vmem:[%s2695_s0 + $0x60] sm:$0xff] }
 0x311   :  { %1657 = vrcp.f32 %v633_v51  ;;  %v1488_v51 = vld [vmem:[%s2695_s0 + $0x68] sm:$0xff] }
 0x312   :  { %1659 = vrcp.f32 %v640_v58 }
 0x31a   :  { %v1656_v55 = vpop.eup %1655 }
 0x31b   :  { %v1658_v56 = vpop.eup %1657  ;;  %v644_v57 = vmul.f32 %v1656_v55, %v1654_v33 }
 0x31c   :  { %v643_v60 = vmul.f32 %v1658_v56, %v2133_v46  ;;  %v1660_v59 = vpop.eup %1659  ;;  %v2213_v46 = vld [vmem:[%s2697_s5] sm:$0xff] }
 0x31d   :  { %vm1484_vm0 = vcmp.gt.s32.totalorder %v2213_v46, 2  ;;  %vm1495_vm1 = vcmp.gt.s32.totalorder %v2213_v46, 3  ;;  %vm1462_vm2 = vcmp.gt.s32.totalorder %v2213_v46, 0  ;;  %vm1473_vm3 = vcmp.gt.s32.totalorder %v2213_v46, 1 }
 0x31e   :  { %v2193_v61 = vadd.f32 %v644_v57, %v643_v60  ;;  %v1485_v38 = vsel %vm1484_vm0, 1.0, %v1793_v37  ;;  %v1496_v39 = vsel %vm1495_vm1, 1.0, %v1793_v37  ;;  %vm1506_vm4 = vcmp.gt.s32.totalorder %v2213_v46, 4 }
 0x31f   :  { %v1546_v40 = vpack.i.bf16 %v1496_v39, %v1485_v38  ;;  %v1489_v39 = vld [vmem:[%s2695_s0 + $0x70] sm:$0xff]  ;;  %vm1517_vm5 = vcmp.gt.s32.totalorder %v2213_v46, 5  ;;  %vm1528_vm6 = vcmp.gt.s32.totalorder %v2213_v46, 6  ;;  %vm1539_vm7 = vcmp.gt.s32.totalorder %v2213_v46, 7 }
 0x320   :  { %1661 = vtanh.f32 %v2193_v61 }
 0x32a   :  { %v1662_v62 = vpop.eup %1661 }
 0x32b   :  { %v647_v34 = vmul.f32 %v1662_v62, %v1660_v59 }
 0x32d   :  { %v685_v35 = vpack.c.bf16 %v647_v34, %v647_v34  ;;  %v650_v36 = vadd.f32 %v1483_v63, %v647_v34 }
 0x32f   :  { %719 = vmatmul.mubr.bf16.vlgmr.msra.gmra.mrb[12].mxu0 %v685_v35  ;;  %760 = vmatmul.mubr.bf16.vlgmr.msra.gmra.mrb[12].mxu1 %v685_v35 }
 0x330   :  { %651 = vadd.xlane.f32.xlu0 %v650_v36  ;;  %835 = vmatpush1.bf16.msra.mxu0 %v1839_v2 }
 0x331   :  { %876 = vmatpush1.bf16.msra.mxu1 %v1869_v7  ;;  %836 = vmatprep.subr.bf16.mxu0 %v1847_v3 }
 0x332   :  { %877 = vmatprep.subr.bf16.mxu1 %v1888_v10  ;;  %866 = vmatprep.mubr.bf16.mxu0 %v1791_v1 }
 0x333   :  { %907 = vmatprep.mubr.bf16.mxu1 %v1791_v1 }
 0x334   :  { %837 = vmatpush1.bf16.msra.mxu0 %v1853_v4 }
 0x335   :  { %878 = vmatpush1.bf16.msra.mxu1 %v1893_v11  ;;  %838 = vmatprep.subr.bf16.mxu0 %v1859_v5 }
 0x336   :  { %879 = vmatprep.subr.bf16.mxu1 %v1910_v14 }
 0x338   :  { %839 = vmatpush1.bf16.msra.mxu0 %v1875_v8 }
 0x339   :  { %880 = vmatpush1.bf16.msra.mxu1 %v1917_v15  ;;  %840 = vmatprep.subr.bf16.mxu0 %v1882_v9 }
 0x33a   :  { %881 = vmatprep.subr.bf16.mxu1 %v1923_v16 }
 0x33c   :  { %841 = vmatpush1.bf16.msra.mxu0 %v1900_v12 }
 0x33d   :  { %882 = vmatpush1.bf16.msra.mxu1 %v1941_v19  ;;  %842 = vmatprep.subr.bf16.mxu0 %v1905_v13 }
 0x33e   :  { %883 = vmatprep.subr.bf16.mxu1 %v1947_v20 }
 0x340   :  { %843 = vmatpush1.bf16.msra.mxu0 %v1929_v17 }
 0x341   :  { %884 = vmatpush1.bf16.msra.mxu1 %v1965_v23  ;;  %844 = vmatprep.subr.bf16.mxu0 %v1935_v18 }
 0x342   :  { %885 = vmatprep.subr.bf16.mxu1 %v1971_v24 }
 0x344   :  { %845 = vmatpush1.bf16.msra.mxu0 %v1953_v21 }
 0x345   :  { %886 = vmatpush1.bf16.msra.mxu1 %v1989_v27  ;;  %846 = vmatprep.subr.bf16.mxu0 %v1958_v22 }
 0x346   :  { %1547 = vperm.xlu0 %1545, %v1546_v40   ;;  %887 = vmatprep.subr.bf16.mxu1 %v1995_v28 }
 0x348   :  { %847 = vmatpush1.bf16.msra.mxu0 %v1977_v25 }
 0x349   :  { %888 = vmatpush1.bf16.msra.mxu1 %v2008_v30  ;;  %848 = vmatprep.subr.bf16.mxu0 %v1983_v26 }
 0x34a   :  { %889 = vmatprep.subr.bf16.mxu1 %v2014_v31 }
 0x34c   :  { %849 = vmatpush1.bf16.msra.mxu0 %v2001_v29 }
 0x34d   :  { %890 = vmatpush1.bf16.msra.mxu1 %v2021_v32  ;;  %982 = vmatprep.subr.bf16.mxu0 %v1832_v0  ;;  %v2244_v44 = vpop.xlane.xlu0 %508 }
 0x34e   :  { %1023 = vmatprep.subr.bf16.mxu1 %v1864_v6 }
 0x3bd   :  { %v652_v45 = vpop.xlane.xlu0 %651 }
 0x3be   :  { %v2246_v47 = vmul.f32 0.03125, %v652_v45 }
 0x3c0   :  { %v2249_v48 = vsub.f32 %v650_v36, %v2246_v47  ;;  %v1490_v36 = vld [vmem:[%s2695_s0 + $0x78] sm:$0xff] }
 0x3c2   :  { %v655_v49 = vmul.f32 %v2249_v48, %v2249_v48 }
 0x3c4   :  { %656 = vadd.xlane.f32.xlu0 %v655_v49 }
 0x402   :  { %v720_v52 = vpop.f32.mrb[12].mxu0  ;;  %v761_v33 = vpop.f32.mrb[12].mxu1 }
 0x403   :  { %v768_v55 = vadd.f32 %v1487_v50, %v720_v52  ;;  %v722_v56 = vpop.f32.mrb[13].mxu0  ;;  %v763_v57 = vpop.f32.mrb[13].mxu1  ;;  %v770_v45 = vadd.f32 %v1489_v39, %v761_v33 }
 0x404   :  { %v769_v58 = vadd.f32 %v1488_v51, %v722_v56  ;;  %v724_v60 = vpop.f32.mrb[14].mxu0  ;;  %v765_v59 = vpop.f32.mrb[14].mxu1  ;;  %v771_v38 = vadd.f32 %v1490_v36, %v763_v57 }
 0x405   :  { %v1491_v62 = vmul.f32 -1.442695, %v768_v55  ;;  %v725_v63 = vpop.f32.mrb[15].mxu0  ;;  %v766_v34 = vpop.f32.mrb[15].mxu1 }
 0x406   :  { %v1492_v35 = vmul.f32 -1.442695, %v769_v58  ;;  %v1493_v40 = vmul.f32 -1.442695, %v771_v38 }
 0x407   :  { %1663 = vpow2.f32 %v1491_v62 }
 0x408   :  { %1665 = vpow2.f32 %v1492_v35  ;;  %v1494_v35 = vld [vmem:[%s2696_s1 + $0x18] sm:$0xff] }
 0x409   :  { %1667 = vpow2.f32 %v1493_v40 }
 0x40a   :  { %1669 = vtanh.f32 %v770_v45 }
 0x411   :  { %v1664_v49 = vpop.eup %1663 }
 0x412   :  { %v1666_v50 = vpop.eup %1665  ;;  %v775_v51 = vadd.f32 1.0, %v1664_v49 }
 0x413   :  { %v781_v52 = vadd.f32 1.0, %v1666_v50  ;;  %v1668_v55 = vpop.eup %1667 }
 0x414   :  { %1671 = vrcp.f32 %v775_v51  ;;  %v1670_v56 = vpop.eup %1669  ;;  %v788_v57 = vadd.f32 1.0, %v1668_v55 }
 0x415   :  { %1673 = vrcp.f32 %v781_v52  ;;  %v1501_v52 = vld [vmem:[%s2695_s0 + $0x98] sm:$0xff] }
 0x416   :  { %1675 = vrcp.f32 %v788_v57 }
 0x41e   :  { %v1672_v58 = vpop.eup %1671 }
 0x41f   :  { %v1674_v60 = vpop.eup %1673  ;;  %v792_v59 = vmul.f32 %v1672_v58, %v1670_v56  ;;  %v1500_v56 = vld [vmem:[%s2695_s0 + $0x90] sm:$0xff] }
 0x420   :  { %v791_v62 = vmul.f32 %v1674_v60, %v2193_v61  ;;  %v1676_v33 = vpop.eup %1675 }
 0x422   :  { %v2266_v63 = vadd.f32 %v792_v59, %v791_v62 }
 0x424   :  { %1677 = vtanh.f32 %v2266_v63 }
 0x42e   :  { %v1678_v34 = vpop.eup %1677 }
 0x42f   :  { %v795_v36 = vmul.f32 %v1678_v34, %v1676_v33 }
 0x431   :  { %v833_v38 = vpack.c.bf16 %v795_v36, %v795_v36  ;;  %v798_v39 = vadd.f32 %v1494_v35, %v795_v36 }
 0x433   :  { %867 = vmatmul.mubr.bf16.vlgmr.msra.gmra.mrb[16].mxu0 %v833_v38  ;;  %908 = vmatmul.mubr.bf16.vlgmr.msra.gmra.mrb[16].mxu1 %v833_v38 }
 0x434   :  { %799 = vadd.xlane.f32.xlu1 %v798_v39  ;;  %983 = vmatpush1.bf16.msra.mxu0 %v1839_v2  ;;  %v2298_v2 = vpop.permute.xlu0 %1547 }
 0x435   :  { %1024 = vmatpush1.bf16.msra.mxu1 %v1869_v7  ;;  %984 = vmatprep.subr.bf16.mxu0 %v1847_v3  ;;  %v658_v3 = vmul.f32 96.0, %v2246_v47 }
 0x436   :  { %1025 = vmatprep.subr.bf16.mxu1 %v1888_v10  ;;  %1014 = vmatprep.mubr.bf16.mxu0 %v1791_v1 }
 0x437   :  { %1055 = vmatprep.mubr.bf16.mxu1 %v1791_v1 }
 0x438   :  { %985 = vmatpush1.bf16.msra.mxu0 %v1853_v4  ;;  %v659_v4 = vmul.f32 %v658_v3, %v2246_v47 }
 0x439   :  { %1026 = vmatpush1.bf16.msra.mxu1 %v1893_v11  ;;  %986 = vmatprep.subr.bf16.mxu0 %v1859_v5  ;;  %v2313_v11 = vld [vmem:[%s2698_s3] ss:$0 sm:$0xff] }
 0x43a   :  { %1027 = vmatprep.subr.bf16.mxu1 %v1910_v14 }
 0x43c   :  { %987 = vmatpush1.bf16.msra.mxu0 %v1875_v8 }
 0x43d   :  { %1028 = vmatpush1.bf16.msra.mxu1 %v1917_v15  ;;  %988 = vmatprep.subr.bf16.mxu0 %v1882_v9 }
 0x43e   :  { %1029 = vmatprep.subr.bf16.mxu1 %v1923_v16 }
 0x440   :  { %989 = vmatpush1.bf16.msra.mxu0 %v1900_v12 }
 0x441   :  { %1030 = vmatpush1.bf16.msra.mxu1 %v1941_v19  ;;  %990 = vmatprep.subr.bf16.mxu0 %v1905_v13  ;;  %v1549_v13 = vunpack.i.l.bf16 %v2298_v2 }
 0x442   :  { %1031 = vmatprep.subr.bf16.mxu1 %v1947_v20  ;;  %v1498_v20 = vld [vmem:[%s2695_s0 + $0x80] sm:$0xff] }
 0x444   :  { %991 = vmatpush1.bf16.msra.mxu0 %v1929_v17 }
 0x445   :  { %1032 = vmatpush1.bf16.msra.mxu1 %v1965_v23  ;;  %992 = vmatprep.subr.bf16.mxu0 %v1935_v18 }
 0x446   :  { %1033 = vmatprep.subr.bf16.mxu1 %v1971_v24 }
 0x448   :  { %993 = vmatpush1.bf16.msra.mxu0 %v1953_v21  ;;  %v1499_v21 = vld [vmem:[%s2695_s0 + $0x88] sm:$0xff] }
 0x449   :  { %1034 = vmatpush1.bf16.msra.mxu1 %v1989_v27  ;;  %994 = vmatprep.subr.bf16.mxu0 %v1958_v22 }
 0x44a   :  { %1035 = vmatprep.subr.bf16.mxu1 %v1995_v28 }
 0x44c   :  { %995 = vmatpush1.bf16.msra.mxu0 %v1977_v25 }
 0x44d   :  { %1036 = vmatpush1.bf16.msra.mxu1 %v2008_v30  ;;  %996 = vmatprep.subr.bf16.mxu0 %v1983_v26 }
 0x44e   :  { %1037 = vmatprep.subr.bf16.mxu1 %v2014_v31 }
 0x450   :  { %997 = vmatpush1.bf16.msra.mxu0 %v2001_v29 }
 0x451   :  { %v657_v5 = vpop.xlane.xlu0 %656  ;;  %1038 = vmatpush1.bf16.msra.mxu1 %v2021_v32  ;;  %1130 = vmatprep.subr.bf16.mxu0 %v1832_v0  ;;  %v2321_v0 = vld [vmem:[%s2699_s4] ss:$0 sm:$0xff] }
 0x452   :  { %v660_v7 = vsub.f32 %v657_v5, %v659_v4  ;;  %1171 = vmatprep.subr.bf16.mxu1 %v1864_v6 }
 0x454   :  { %v661_v8 = vmul.f32 0.03125, %v660_v7 }
 0x456   :  { %v662_v9 = vadd.f32 1e-05, %v661_v8 }
 0x458   :  { %1679 = vrsqrt.f32 %v662_v9  ;;  %v1505_v9 = vld [vmem:[%s2696_s1 + $0x20] sm:$0xff] }
 0x462   :  { %v1680_v10 = vpop.eup %1679 }
 0x463   :  { %v664_v12 = vmul.f32 %v1680_v10, %v2313_v11 }
 0x465   :  { %v670_v14 = vmul.f32 %v664_v12, %v2249_v48 }
 0x467   :  { %v671_v6 = vadd.f32 %v2321_v0, %v670_v14  ;;  %v2365_v14 = vld [vmem:[%s2694_s2 + $0x8] ss:$16 sps:$4 sm:$0xff]  }
 0x469   :  { %v677_v15 = vmul.f32 %v1549_v13, %v671_v6  ;;  %v2371_v6 = vld [vmem:[%s2694_s2 + $0x24] ss:$16 sps:$4 sm:$0xff]  }
 0x46b   :  { %1486 = vst [vmem:[%s2700_s6 + $0x10] sm:$0xff] %v677_v15  ;;  %v2377_v15 = vld [vmem:[%s2694_s2 + $0x2c] ss:$16 sps:$4 sm:$0xff]  }
 0x4c1   :  { %v800_v16 = vpop.xlane.xlu1 %799 }
 0x4c2   :  { %v2327_v17 = vmul.f32 0.03125, %v800_v16  ;;  %v2385_v16 = vld [vmem:[%s2694_s2 + $0x20] ss:$16 sps:$4 sm:$0xff]  }
 0x4c4   :  { %v2330_v18 = vsub.f32 %v798_v39, %v2327_v17 }
 0x4c6   :  { %v803_v19 = vmul.f32 %v2330_v18, %v2330_v18 }
 0x4c8   :  { %804 = vadd.xlane.f32.xlu1 %v803_v19  ;;  %v2391_v19 = vld [vmem:[%s2694_s2 + $0x28] ss:$16 sps:$4 sm:$0xff]  }
 0x506   :  { %v868_v22 = vpop.f32.mrb[16].mxu0  ;;  %v909_v23 = vpop.f32.mrb[16].mxu1 }
 0x507   :  { %v916_v25 = vadd.f32 %v1498_v20, %v868_v22  ;;  %v870_v26 = vpop.f32.mrb[17].mxu0  ;;  %v911_v61 = vpop.f32.mrb[17].mxu1  ;;  %v918_v60 = vadd.f32 %v1500_v56, %v909_v23  ;;  %v2397_v20 = vld [vmem:[%s2694_s2 + $0x44] ss:$16 sps:$4 sm:$0xff]   ;;  %v2409_v22 = vld [vmem:[%s2694_s2 + $0x40] ss:$16 sps:$4 sm:$0xff]  }
 0x508   :  { %v917_v47 = vadd.f32 %v1499_v21, %v870_v26  ;;  %v872_v48 = vpop.f32.mrb[18].mxu0  ;;  %v913_v40 = vpop.f32.mrb[18].mxu1  ;;  %v919_v55 = vadd.f32 %v1501_v52, %v911_v61  ;;  %v2403_v21 = vld [vmem:[%s2694_s2 + $0x4c] ss:$16 sps:$4 sm:$0xff]   ;;  %v2415_v23 = vld [vmem:[%s2694_s2 + $0x48] ss:$16 sps:$4 sm:$0xff]  }
 0x509   :  { %v1502_v45 = vmul.f32 -1.442695, %v916_v25  ;;  %v873_v49 = vpop.f32.mrb[19].mxu0  ;;  %v914_v50 = vpop.f32.mrb[19].mxu1  ;;  %v2421_v25 = vld [vmem:[%s2694_s2 + $0x64] ss:$16 sps:$4 sm:$0xff]  }
 0x50a   :  { %v1503_v51 = vmul.f32 -1.442695, %v917_v47  ;;  %v1504_v58 = vmul.f32 -1.442695, %v919_v55  ;;  %v2427_v26 = vld [vmem:[%s2694_s2 + $0x6c] ss:$16 sps:$4 sm:$0xff]  }
 0x50b   :  { %1681 = vpow2.f32 %v1502_v45  ;;  %v2433_v61 = vld [vmem:[%s2694_s2 + $0x60] ss:$16 sps:$4 sm:$0xff]   ;;  %v2439_v47 = vld [vmem:[%s2694_s2 + $0x68] ss:$16 sps:$4 sm:$0xff]   ;;  %v2445_v48 = vld [vmem:[%s2694_s2 + $0x84] ss:$16 sps:$4 sm:$0xff]  }
 0x50c   :  { %1683 = vpow2.f32 %v1503_v51  ;;  %v2451_v40 = vld [vmem:[%s2694_s2 + $0x8c] ss:$16 sps:$4 sm:$0xff]   ;;  %v2457_v45 = vld [vmem:[%s2694_s2 + $0x80] ss:$16 sps:$4 sm:$0xff]   ;;  %v2463_v49 = vld [vmem:[%s2694_s2 + $0x88] ss:$16 sps:$4 sm:$0xff]  }
 0x50d   :  { %1685 = vpow2.f32 %v1504_v58  ;;  %v2469_v50 = vld [vmem:[%s2694_s2 + $0xa4] ss:$16 sps:$4 sm:$0xff]   ;;  %v2476_v51 = vld [vmem:[%s2694_s2 + $0xa0] ss:$16 sps:$4 sm:$0xff]  }
 0x50e   :  { %1687 = vtanh.f32 %v918_v60  ;;  %v2483_v52 = vld [vmem:[%s2694_s2 + $0xc4] ss:$16 sps:$4 sm:$0xff]   ;;  %v2491_v55 = vld [vmem:[%s2694_s2 + $0xc0] ss:$16 sps:$4 sm:$0xff]   ;;  %v1783_v60 = vld [vmem:[%s2694_s2 + $0xc] ss:$16 sps:$4 sm:$0xff]  }
 0x515   :  { %v1682_v59 = vpop.eup %1681 }
 0x516   :  { %v1684_v57 = vpop.eup %1683  ;;  %v923_v62 = vadd.f32 1.0, %v1682_v59 }
 0x517   :  { %v929_v33 = vadd.f32 1.0, %v1684_v57  ;;  %v1686_v34 = vpop.eup %1685  ;;  %v1550_v57 = vunpack.i.h.bf16 %v2298_v2  ;;  %v1509_v2 = vld [vmem:[%s2695_s0 + $0xa0] sm:$0xff] }
 0x518   :  { %1689 = vrcp.f32 %v923_v62  ;;  %v1688_v35 = vpop.eup %1687  ;;  %v936_v3 = vadd.f32 1.0, %v1686_v34 }
 0x519   :  { %1691 = vrcp.f32 %v929_v33 }
 0x51a   :  { %1693 = vrcp.f32 %v936_v3 }
 0x522   :  { %v1690_v36 = vpop.eup %1689 }
 0x523   :  { %v1692_v38 = vpop.eup %1691  ;;  %v940_v39 = vmul.f32 %v1690_v36, %v1688_v35 }
 0x524   :  { %v939_v4 = vmul.f32 %v1692_v38, %v2266_v63  ;;  %v1694_v7 = vpop.eup %1693  ;;  %v2359_v63 = vld [vmem:[%s2694_s2] ss:$16 sps:$4 sm:$0xff]  }
 0x526   :  { %v2347_v5 = vadd.f32 %v940_v39, %v939_v4 }
 0x528   :  { %1695 = vtanh.f32 %v2347_v5 }
 0x532   :  { %v1696_v8 = vpop.eup %1695 }
 0x533   :  { %v943_v10 = vmul.f32 %v1696_v8, %v1694_v7 }
 0x535   :  { %v981_v12 = vpack.c.bf16 %v943_v10, %v943_v10  ;;  %v2353_v13 = vadd.f32 %v1505_v9, %v943_v10 }
 0x537   :  { %1015 = vmatmul.mubr.bf16.vlgmr.msra.gmra.mrb[20].mxu0 %v981_v12  ;;  %1056 = vmatmul.mubr.bf16.vlgmr.msra.gmra.mrb[20].mxu1 %v981_v12 }
 0x538   :  { %947 = vadd.xlane.f32.xlu1 %v2353_v13  ;;  %1131 = vmatpush1.bf16.msra.mxu0 %v2359_v63 }
 0x539   :  { %1172 = vmatpush1.bf16.msra.mxu1 %v2365_v14  ;;  %1132 = vmatprep.subr.bf16.mxu0 %v2371_v6 }
 0x53a   :  { %1173 = vmatprep.subr.bf16.mxu1 %v2377_v15  ;;  %1162 = vmatprep.mubr.bf16.mxu0 %v1791_v1 }
 0x53b   :  { %1203 = vmatprep.mubr.bf16.mxu1 %v1791_v1 }
 0x53c   :  { %1133 = vmatpush1.bf16.msra.mxu0 %v2385_v16 }
 0x53d   :  { %1174 = vmatpush1.bf16.msra.mxu1 %v2391_v19  ;;  %1134 = vmatprep.subr.bf16.mxu0 %v2397_v20 }
 0x53e   :  { %1175 = vmatprep.subr.bf16.mxu1 %v2403_v21 }
 0x540   :  { %1135 = vmatpush1.bf16.msra.mxu0 %v2409_v22 }
 0x541   :  { %1176 = vmatpush1.bf16.msra.mxu1 %v2415_v23  ;;  %1136 = vmatprep.subr.bf16.mxu0 %v2421_v25 }
 0x542   :  { %1177 = vmatprep.subr.bf16.mxu1 %v2427_v26 }
 0x544   :  { %1137 = vmatpush1.bf16.msra.mxu0 %v2433_v61 }
 0x545   :  { %1178 = vmatpush1.bf16.msra.mxu1 %v2439_v47  ;;  %1138 = vmatprep.subr.bf16.mxu0 %v2445_v48 }
 0x546   :  { %1179 = vmatprep.subr.bf16.mxu1 %v2451_v40 }
 0x548   :  { %1139 = vmatpush1.bf16.msra.mxu0 %v2457_v45 }
 0x549   :  { %1180 = vmatpush1.bf16.msra.mxu1 %v2463_v49  ;;  %1140 = vmatprep.subr.bf16.mxu0 %v2469_v50 }
 0x54a   :  { %1181 = vmatprep.subr.bf16.mxu1 %v1971_v24  ;;  %v806_v24 = vmul.f32 96.0, %v2327_v17 }
 0x54c   :  { %1141 = vmatpush1.bf16.msra.mxu0 %v2476_v51 }
 0x54d   :  { %1182 = vmatpush1.bf16.msra.mxu1 %v1989_v27  ;;  %1142 = vmatprep.subr.bf16.mxu0 %v2483_v52  ;;  %v2498_v27 = vld [vmem:[%s2694_s2 + $0xe4] ss:$16 sps:$4 sm:$0xff]  }
 0x54e   :  { %1183 = vmatprep.subr.bf16.mxu1 %v1995_v28  ;;  %v807_v28 = vmul.f32 %v806_v24, %v2327_v17 }
 0x550   :  { %1143 = vmatpush1.bf16.msra.mxu0 %v2491_v55 }
 0x551   :  { %1184 = vmatpush1.bf16.msra.mxu1 %v2008_v30  ;;  %1144 = vmatprep.subr.bf16.mxu0 %v2498_v27  ;;  %v1782_v30 = vld [vmem:[%s2694_s2 + $0x4] ss:$16 sps:$4 sm:$0xff]  }
 0x552   :  { %1185 = vmatprep.subr.bf16.mxu1 %v2014_v31 }
 0x554   :  { %1145 = vmatpush1.bf16.msra.mxu0 %v2001_v29 }
 0x555   :  { %v805_v56 = vpop.xlane.xlu1 %804  ;;  %1186 = vmatpush1.bf16.msra.mxu1 %v2021_v32  ;;  %1278 = vmatprep.subr.bf16.mxu0 %v1782_v30  ;;  %v1512_v30 = vld [vmem:[%s2695_s0 + $0xb8] sm:$0xff] }
 0x556   :  { %v808_v58 = vsub.f32 %v805_v56, %v807_v28  ;;  %1319 = vmatprep.subr.bf16.mxu1 %v1783_v60  ;;  %v1511_v60 = vld [vmem:[%s2695_s0 + $0xb0] sm:$0xff] }
 0x558   :  { %v809_v59 = vmul.f32 0.03125, %v808_v58 }
 0x55a   :  { %v810_v31 = vadd.f32 1e-05, %v809_v59 }
 0x55c   :  { %1697 = vrsqrt.f32 %v810_v31 }
 0x566   :  { %v1698_v17 = vpop.eup %1697 }
 0x567   :  { %v812_v29 = vmul.f32 %v1698_v17, %v2313_v11 }
 0x569   :  { %v818_v32 = vmul.f32 %v812_v29, %v2330_v18  ;;  %v1510_v18 = vld [vmem:[%s2695_s0 + $0xa8] sm:$0xff] }
 0x56b   :  { %v819_v62 = vadd.f32 %v2321_v0, %v818_v32 }
 0x56d   :  { %v825_v33 = vmul.f32 %v1550_v57, %v819_v62 }
 0x56f   :  { %1497 = vst [vmem:[%s2700_s6 + $0x18] sm:$0xff] %v825_v33 }
 0x5c5   :  { %v948_v34 = vpop.xlane.xlu1 %947 }
 0x5c6   :  { %v2518_v35 = vmul.f32 0.03125, %v948_v34 }
 0x5c8   :  { %v2522_v36 = vsub.f32 %v2353_v13, %v2518_v35 }
 0x5ca   :  { %v951_v38 = vmul.f32 %v2522_v36, %v2522_v36 }
 0x5cc   :  { %952 = vadd.xlane.f32.xlu0 %v951_v38 }
 0x60a   :  { %v1016_v39 = vpop.f32.mrb[20].mxu0  ;;  %v1057_v3 = vpop.f32.mrb[20].mxu1 }
 0x60b   :  { %v1064_v4 = vadd.f32 %v1509_v2, %v1016_v39  ;;  %v1018_v7 = vpop.f32.mrb[21].mxu0  ;;  %v1059_v8 = vpop.f32.mrb[21].mxu1  ;;  %v1066_v31 = vadd.f32 %v1511_v60, %v1057_v3 }
 0x60c   :  { %v1065_v9 = vadd.f32 %v1510_v18, %v1018_v7  ;;  %v1020_v10 = vpop.f32.mrb[22].mxu0  ;;  %v1061_v12 = vpop.f32.mrb[22].mxu1  ;;  %v1067_v58 = vadd.f32 %v1512_v30, %v1059_v8  ;;  %v1516_v8 = vld [vmem:[%s2696_s1 + $0x28] sm:$0xff] }
 0x60d   :  { %v1513_v13 = vmul.f32 -1.442695, %v1064_v4  ;;  %v1021_v24 = vpop.f32.mrb[23].mxu0  ;;  %v1062_v28 = vpop.f32.mrb[23].mxu1 }
 0x60e   :  { %v1514_v56 = vmul.f32 -1.442695, %v1065_v9  ;;  %v1515_v59 = vmul.f32 -1.442695, %v1067_v58 }
 0x60f   :  { %1699 = vpow2.f32 %v1513_v13 }
 0x610   :  { %1701 = vpow2.f32 %v1514_v56 }
 0x611   :  { %1703 = vpow2.f32 %v1515_v59 }
 0x612   :  { %1705 = vtanh.f32 %v1066_v31 }
 0x619   :  { %v1700_v17 = vpop.eup %1699 }
 0x61a   :  { %v1702_v29 = vpop.eup %1701  ;;  %v1071_v57 = vadd.f32 1.0, %v1700_v17 }
 0x61b   :  { %v1077_v32 = vadd.f32 1.0, %v1702_v29  ;;  %v1704_v62 = vpop.eup %1703 }
 0x61c   :  { %1707 = vrcp.f32 %v1071_v57  ;;  %v1706_v33 = vpop.eup %1705  ;;  %v1084_v18 = vadd.f32 1.0, %v1704_v62 }
 0x61d   :  { %1709 = vrcp.f32 %v1077_v32 }
 0x61e   :  { %1711 = vrcp.f32 %v1084_v18 }
 0x626   :  { %v1708_v34 = vpop.eup %1707 }
 0x627   :  { %v1710_v38 = vpop.eup %1709  ;;  %v1088_v2 = vmul.f32 %v1708_v34, %v1706_v33  ;;  %v1527_v34 = vld [vmem:[%s2696_s1 + $0x30] sm:$0xff] }
 0x628   :  { %v1087_v39 = vmul.f32 %v1710_v38, %v2347_v5  ;;  %v1712_v3 = vpop.eup %1711  ;;  %v1785_v5 = vld [vmem:[%s2694_s2 + $0xa8] ss:$16 sps:$4 sm:$0xff]  }
 0x62a   :  { %v2539_v4 = vadd.f32 %v1088_v2, %v1087_v39 }
 0x62c   :  { %1713 = vtanh.f32 %v2539_v4 }
 0x636   :  { %v1714_v7 = vpop.eup %1713 }
 0x637   :  { %v1091_v9 = vmul.f32 %v1714_v7, %v1712_v3 }
 0x639   :  { %v1129_v10 = vpack.c.bf16 %v1091_v9, %v1091_v9  ;;  %v2545_v12 = vadd.f32 %v1516_v8, %v1091_v9  ;;  %v1531_v9 = vld [vmem:[%s2695_s0 + $0xe0] sm:$0xff] }
 0x63b   :  { %1163 = vmatmul.mubr.bf16.vlgmr.msra.gmra.mrb[24].mxu0 %v1129_v10  ;;  %1204 = vmatmul.mubr.bf16.vlgmr.msra.gmra.mrb[24].mxu1 %v1129_v10  ;;  %v1532_v10 = vld [vmem:[%s2695_s0 + $0xe8] sm:$0xff] }
 0x63c   :  { %1095 = vadd.xlane.f32.xlu1 %v2545_v12  ;;  %1279 = vmatpush1.bf16.msra.mxu0 %v2359_v63  ;;  %v1786_v63 = vld [vmem:[%s2694_s2 + $0xcc] ss:$16 sps:$4 sm:$0xff]  }
 0x63d   :  { %1320 = vmatpush1.bf16.msra.mxu1 %v2365_v14  ;;  %1280 = vmatprep.subr.bf16.mxu0 %v2371_v6  ;;  %v1787_v14 = vld [vmem:[%s2694_s2 + $0xc8] ss:$16 sps:$4 sm:$0xff]   ;;  %v1788_v6 = vld [vmem:[%s2694_s2 + $0xec] ss:$16 sps:$4 sm:$0xff]  }
 0x63e   :  { %1321 = vmatprep.subr.bf16.mxu1 %v2377_v15  ;;  %1310 = vmatprep.mubr.bf16.mxu0 %v1791_v1  ;;  %v1789_v15 = vld [vmem:[%s2694_s2 + $0xe0] ss:$16 sps:$4 sm:$0xff]  }
 0x63f   :  { %1351 = vmatprep.mubr.bf16.mxu1 %v1791_v1  ;;  %v1784_v1 = vld [vmem:[%s2694_s2 + $0xac] ss:$16 sps:$4 sm:$0xff]  }
 0x640   :  { %1281 = vmatpush1.bf16.msra.mxu0 %v2385_v16  ;;  %v1790_v16 = vld [vmem:[%s2694_s2 + $0xe8] ss:$16 sps:$4 sm:$0xff]  }
 0x641   :  { %1322 = vmatpush1.bf16.msra.mxu1 %v2391_v19  ;;  %1282 = vmatprep.subr.bf16.mxu0 %v2397_v20  ;;  %v1520_v19 = vld [vmem:[%s2695_s0 + $0xc0] sm:$0xff]  ;;  %v1521_v20 = vld [vmem:[%s2695_s0 + $0xc8] sm:$0xff] }
 0x642   :  { %1323 = vmatprep.subr.bf16.mxu1 %v2403_v21 }
 0x644   :  { %1283 = vmatpush1.bf16.msra.mxu0 %v2409_v22 }
 0x645   :  { %1324 = vmatpush1.bf16.msra.mxu1 %v2415_v23  ;;  %1284 = vmatprep.subr.bf16.mxu0 %v2421_v25 }
 0x646   :  { %1325 = vmatprep.subr.bf16.mxu1 %v2427_v26 }
 0x648   :  { %1285 = vmatpush1.bf16.msra.mxu0 %v2433_v61 }
 0x649   :  { %1326 = vmatpush1.bf16.msra.mxu1 %v2439_v47  ;;  %1286 = vmatprep.subr.bf16.mxu0 %v2445_v48 }
 0x64a   :  { %1327 = vmatprep.subr.bf16.mxu1 %v2451_v40 }
 0x64c   :  { %1287 = vmatpush1.bf16.msra.mxu0 %v2457_v45 }
 0x64d   :  { %1328 = vmatpush1.bf16.msra.mxu1 %v2463_v49  ;;  %1288 = vmatprep.subr.bf16.mxu0 %v2469_v50 }
 0x64e   :  { %1329 = vmatprep.subr.bf16.mxu1 %v1784_v1 }
 0x650   :  { %1289 = vmatpush1.bf16.msra.mxu0 %v2476_v51  ;;  %v1523_v51 = vld [vmem:[%s2695_s0 + $0xd8] sm:$0xff] }
 0x651   :  { %1330 = vmatpush1.bf16.msra.mxu1 %v1785_v5  ;;  %1290 = vmatprep.subr.bf16.mxu0 %v2483_v52 }
 0x652   :  { %1331 = vmatprep.subr.bf16.mxu1 %v1786_v63 }
 0x654   :  { %1291 = vmatpush1.bf16.msra.mxu0 %v2491_v55  ;;  %v1522_v55 = vld [vmem:[%s2695_s0 + $0xd0] sm:$0xff] }
 0x655   :  { %1332 = vmatpush1.bf16.msra.mxu1 %v1787_v14  ;;  %1292 = vmatprep.subr.bf16.mxu0 %v2498_v27 }
 0x656   :  { %1333 = vmatprep.subr.bf16.mxu1 %v1788_v6 }
 0x658   :  { %1293 = vmatpush1.bf16.msra.mxu0 %v1789_v15 }
 0x659   :  { %1334 = vmatpush1.bf16.msra.mxu1 %v1790_v16 }
 0x6c9   :  { %v1096_v39 = vpop.xlane.xlu1 %1095 }
 0x70e   :  { %v1164_v21 = vpop.f32.mrb[24].mxu0  ;;  %v1205_v22 = vpop.f32.mrb[24].mxu1 }
 0x70f   :  { %v1212_v23 = vadd.f32 %v1520_v19, %v1164_v21  ;;  %v1166_v25 = vpop.f32.mrb[25].mxu0  ;;  %v1207_v26 = vpop.f32.mrb[25].mxu1  ;;  %v1214_v13 = vadd.f32 %v1522_v55, %v1205_v22 }
 0x710   :  { %v1213_v61 = vadd.f32 %v1521_v20, %v1166_v25  ;;  %v1168_v47 = vpop.f32.mrb[26].mxu0  ;;  %v1209_v48 = vpop.f32.mrb[26].mxu1  ;;  %v1215_v52 = vadd.f32 %v1523_v51, %v1207_v26  ;;  %v1534_v25 = vld [vmem:[%s2695_s0 + $0xf8] sm:$0xff] }
 0x711   :  { %v1524_v40 = vmul.f32 -1.442695, %v1212_v23  ;;  %v1169_v45 = vpop.f32.mrb[27].mxu0  ;;  %v1210_v49 = vpop.f32.mrb[27].mxu1 }
 0x712   :  { %v1525_v50 = vmul.f32 -1.442695, %v1213_v61  ;;  %v1526_v27 = vmul.f32 -1.442695, %v1215_v52  ;;  %v1533_v61 = vld [vmem:[%s2695_s0 + $0xf0] sm:$0xff] }
 0x713   :  { %1715 = vpow2.f32 %v1524_v40 }
 0x714   :  { %1717 = vpow2.f32 %v1525_v50 }
 0x715   :  { %1719 = vpow2.f32 %v1526_v27 }
 0x716   :  { %1721 = vtanh.f32 %v1214_v13 }
 0x71d   :  { %v1716_v24 = vpop.eup %1715 }
 0x71e   :  { %v1718_v28 = vpop.eup %1717  ;;  %v1219_v56 = vadd.f32 1.0, %v1716_v24 }
 0x71f   :  { %v1225_v30 = vadd.f32 1.0, %v1718_v28  ;;  %v1720_v58 = vpop.eup %1719 }
 0x720   :  { %1723 = vrcp.f32 %v1219_v56  ;;  %v1722_v60 = vpop.eup %1721  ;;  %v1232_v29 = vadd.f32 1.0, %v1720_v58 }
 0x721   :  { %1725 = vrcp.f32 %v1225_v30 }
 0x722   :  { %1727 = vrcp.f32 %v1232_v29  ;;  %v1474_v29 = vsel %vm1473_vm3, 1.0, %v1793_v37 }
 0x72a   :  { %v1724_v59 = vpop.eup %1723 }
 0x72b   :  { %v1726_v31 = vpop.eup %1725  ;;  %v1236_v17 = vmul.f32 %v1724_v59, %v1722_v60  ;;  %v1538_v60 = vld [vmem:[%s2696_s1 + $0x38] sm:$0xff] }
 0x72c   :  { %v1235_v57 = vmul.f32 %v1726_v31, %v2539_v4  ;;  %v1728_v62 = vpop.eup %1727 }
 0x72e   :  { %v1237_v32 = vadd.f32 %v1236_v17, %v1235_v57  ;;  %v1463_v17 = vsel %vm1462_vm2, 1.0, %v1793_v37 }
 0x72f   :  { %v1552_v57 = vpack.i.bf16 %v1474_v29, %v1463_v17 }
 0x730   :  { %1729 = vtanh.f32 %v1237_v32 }
 0x73a   :  { %v1730_v33 = vpop.eup %1729 }
 0x73b   :  { %v1239_v38 = vmul.f32 %v1730_v33, %v1728_v62  ;;  %v1518_v62 = vsel %vm1517_vm5, 1.0, %v1793_v37 }
 0x73d   :  { %v1277_v2 = vpack.c.bf16 %v1239_v38, %v1239_v38  ;;  %v1242_v18 = vadd.f32 %v1527_v34, %v1239_v38  ;;  %v1097_v34 = vmul.f32 0.03125, %v1096_v39 }
 0x73f   :  { %1311 = vmatmul.mubr.bf16.vlgmr.msra.gmra.mrb[28].mxu0 %v1277_v2  ;;  %1352 = vmatmul.mubr.bf16.vlgmr.msra.gmra.mrb[28].mxu1 %v1277_v2  ;;  %v2641_v38 = vsub.f32 %v2545_v12, %v1097_v34  ;;  %v953_v12 = vpop.xlane.xlu0 %952 }
 0x740   :  { %1243 = vadd.xlane.f32.xlu1 %v1242_v18 }
 0x741   :  { %v1099_v2 = vmul.f32 %v2641_v38, %v2641_v38 }
 0x7cd   :  { %v1244_v3 = vpop.xlane.xlu1 %1243 }
 0x7ce   :  { %v2610_v7 = vmul.f32 0.03125, %v1244_v3  ;;  %v510_v3 = vmul.f32 96.0, %v2173_v53 }
 0x7d0   :  { %v2613_v4 = vsub.f32 %v1242_v18, %v2610_v7  ;;  %v352_v18 = vmul.f32 96.0, %v2113_v41 }
 0x7d2   :  { %v1247_v8 = vmul.f32 %v2613_v4, %v2613_v4 }
 0x7d4   :  { %1248 = vadd.xlane.f32.xlu0 %v1247_v8  ;;  %v353_v8 = vmul.f32 %v352_v18, %v2113_v41 }
 0x812   :  { %v1312_v1 = vpop.f32.mrb[28].mxu0  ;;  %v1353_v5 = vpop.f32.mrb[28].mxu1 }
 0x813   :  { %v1360_v63 = vadd.f32 %v1531_v9, %v1312_v1  ;;  %v1314_v14 = vpop.f32.mrb[29].mxu0  ;;  %v1355_v6 = vpop.f32.mrb[29].mxu1  ;;  %v1362_v48 = vadd.f32 %v1533_v61, %v1353_v5  ;;  %v511_v9 = vmul.f32 %v510_v3, %v2173_v53  ;;  %v954_v1 = vmul.f32 96.0, %v2518_v35 }
 0x814   :  { %v1361_v15 = vadd.f32 %v1532_v10, %v1314_v14  ;;  %v1316_v16 = vpop.f32.mrb[30].mxu0  ;;  %v1357_v19 = vpop.f32.mrb[30].mxu1  ;;  %v1363_v26 = vadd.f32 %v1534_v25, %v1355_v6  ;;  %v354_v10 = vsub.f32 %v2242_v43, %v353_v8 }
 0x815   :  { %v1535_v20 = vmul.f32 -1.442695, %v1360_v63  ;;  %v1317_v21 = vpop.f32.mrb[31].mxu0  ;;  %v1358_v22 = vpop.f32.mrb[31].mxu1  ;;  %v512_v39 = vsub.f32 %v2244_v44, %v511_v9  ;;  %v955_v63 = vmul.f32 %v954_v1, %v2518_v35 }
 0x816   :  { %v1536_v23 = vmul.f32 -1.442695, %v1361_v15  ;;  %v1537_v47 = vmul.f32 -1.442695, %v1363_v26  ;;  %v355_v5 = vmul.f32 0.03125, %v354_v10 }
 0x817   :  { %1731 = vpow2.f32 %v1535_v20  ;;  %v513_v14 = vmul.f32 0.03125, %v512_v39  ;;  %v956_v6 = vsub.f32 %v953_v12, %v955_v63 }
 0x818   :  { %1733 = vpow2.f32 %v1536_v23  ;;  %v356_v15 = vadd.f32 1e-05, %v355_v5 }
 0x819   :  { %1735 = vpow2.f32 %v1537_v47  ;;  %v514_v16 = vadd.f32 1e-05, %v513_v14  ;;  %v957_v19 = vmul.f32 0.03125, %v956_v6 }
 0x81a   :  { %1737 = vtanh.f32 %v1362_v48 }
 0x81b   :  { %v958_v41 = vadd.f32 1e-05, %v957_v19 }
 0x821   :  { %v1732_v40 = vpop.eup %1731 }
 0x822   :  { %v1734_v45 = vpop.eup %1733  ;;  %v1367_v49 = vadd.f32 1.0, %v1732_v40 }
 0x823   :  { %v1373_v50 = vadd.f32 1.0, %v1734_v45  ;;  %v1736_v51 = vpop.eup %1735 }
 0x824   :  { %1739 = vrcp.f32 %v1367_v49  ;;  %v1738_v52 = vpop.eup %1737  ;;  %v1380_v24 = vadd.f32 1.0, %v1736_v51 }
 0x825   :  { %1741 = vrcp.f32 %v1373_v50 }
 0x826   :  { %1743 = vrcp.f32 %v1380_v24  ;;  %v1540_v24 = vsel %vm1539_vm7, 1.0, %v1793_v37 }
 0x82e   :  { %v1740_v55 = vpop.eup %1739 }
 0x82f   :  { %v1742_v27 = vpop.eup %1741  ;;  %v1384_v13 = vmul.f32 %v1740_v55, %v1738_v52 }
 0x830   :  { %v1383_v28 = vmul.f32 %v1742_v27, %v1237_v32  ;;  %v1744_v30 = vpop.eup %1743  ;;  %v1507_v32 = vsel %vm1506_vm4, 1.0, %v1793_v37 }
 0x831   :  { %v1557_v33 = vpack.i.bf16 %v1518_v62, %v1507_v32 }
 0x832   :  { %v1385_v56 = vadd.f32 %v1384_v13, %v1383_v28 }
 0x834   :  { %1745 = vtanh.f32 %v1385_v56  ;;  %v1102_v56 = vmul.f32 96.0, %v1097_v34 }
 0x835   :  { %1747 = vrsqrt.f32 %v356_v15 }
 0x836   :  { %1749 = vrsqrt.f32 %v514_v16 }
 0x837   :  { %1751 = vrsqrt.f32 %v958_v41 }
 0x83e   :  { %v1746_v58 = vpop.eup %1745 }
 0x83f   :  { %v1387_v59 = vmul.f32 %v1746_v58, %v1744_v30  ;;  %v1748_v53 = vpop.eup %1747  ;;  %v1103_v30 = vmul.f32 %v1102_v56, %v1097_v34 }
 0x840   :  { %v1750_v20 = vpop.eup %1749  ;;  %v364_v43 = vmul.f32 %v1748_v53, %v2313_v11 }
 0x841   :  { %v1390_v31 = vadd.f32 %v1538_v60, %v1387_v59  ;;  %v516_v21 = vmul.f32 %v1750_v20, %v2313_v11  ;;  %v1752_v44 = vpop.eup %1751 }
 0x842   :  { %v369_v23 = vmul.f32 %v364_v43, %v2116_v42  ;;  %v960_v26 = vmul.f32 %v1752_v44, %v2313_v11 }
 0x843   :  { %1391 = vadd.xlane.f32.xlu1 %v1390_v31  ;;  %v522_v35 = vmul.f32 %v516_v21, %v2176_v54 }
 0x844   :  { %v376_v48 = vadd.f32 %v2321_v0, %v369_v23  ;;  %v966_v51 = vmul.f32 %v960_v26, %v2522_v36  ;;  %v1529_v36 = vsel %vm1528_vm6, 1.0, %v1793_v37  ;;  %v1250_v37 = vmul.f32 96.0, %v2610_v7 }
 0x845   :  { %v523_v40 = vadd.f32 %v2321_v0, %v522_v35  ;;  %v1562_v28 = vpack.i.bf16 %v1540_v24, %v1529_v36 }
 0x846   :  { %v967_v27 = vadd.f32 %v2321_v0, %v966_v51  ;;  %v1251_v34 = vmul.f32 %v1250_v37, %v2610_v7 }
 0x854   :  { %1553 = vperm.xlu1 %1551, %v1552_v57  }
 0x858   :  { %1558 = vperm.xlu1 %1551, %v1557_v33  }
 0x861   :  { %v1249_v33 = vpop.xlane.xlu0 %1248 }
 0x87c   :  { %1100 = vadd.xlane.f32.xlu1 %v1099_v2  ;;  %v1252_v2 = vsub.f32 %v1249_v33, %v1251_v34 }
 0x87e   :  { %v1253_v18 = vmul.f32 0.03125, %v1252_v2 }
 0x880   :  { %v1254_v3 = vadd.f32 1e-05, %v1253_v18 }
 0x8d0   :  { %v1392_v22 = vpop.xlane.xlu1 %1391 }
 0x8d1   :  { %v1393_v25 = vmul.f32 0.03125, %v1392_v22 }
 0x8d3   :  { %v1394_v61 = vsub.f32 %v1390_v31, %v1393_v25  ;;  %v1398_v8 = vmul.f32 96.0, %v1393_v25 }
 0x8d4   :  { %v1554_v47 = vpop.permute.xlu1 %1553 }
 0x8d5   :  { %v1556_v45 = vunpack.i.h.bf16 %v1554_v47  ;;  %v1555_v49 = vunpack.i.l.bf16 %v1554_v47  ;;  %v1395_v50 = vmul.f32 %v1394_v61, %v1394_v61  ;;  %v1399_v10 = vmul.f32 %v1398_v8, %v1393_v25 }
 0x8d7   :  { %v382_v52 = vmul.f32 %v1555_v49, %v376_v48  ;;  %v529_v55 = vmul.f32 %v1556_v45, %v523_v40  ;;  %1396 = vadd.xlane.f32.xlu0 %v1395_v50 }
 0x8d8   :  { %v1559_v42 = vpop.permute.xlu1 %1558 }
 0x8d9   :  { %383 = vst [vmem:[%s2700_s6] sm:$0xff] %v382_v52  ;;  %1475 = vst [vmem:[%s2700_s6 + $0x8] sm:$0xff] %v529_v55  ;;  %v1560_v54 = vunpack.i.l.bf16 %v1559_v42  ;;  %v1561_v57 = vunpack.i.h.bf16 %v1559_v42 }
 0x8db   :  { %v973_v13 = vmul.f32 %v1560_v54, %v967_v27 }
 0x8dd   :  { %1508 = vst [vmem:[%s2700_s6 + $0x20] sm:$0xff] %v973_v13 }
 0x8ed   :  { %1563 = vperm.xlu0 %1545, %v1562_v28  }
 0x909   :  { %v1101_v58 = vpop.xlane.xlu1 %1100 }
 0x90a   :  { %v1104_v60 = vsub.f32 %v1101_v58, %v1103_v30 }
 0x90c   :  { %v1105_v59 = vmul.f32 0.03125, %v1104_v60 }
 0x90e   :  { %v1106_v31 = vadd.f32 1e-05, %v1105_v59 }
 0x910   :  { %1753 = vrsqrt.f32 %v1106_v31 }
 0x911   :  { %1755 = vrsqrt.f32 %v1254_v3 }
 0x91a   :  { %v1754_v17 = vpop.eup %1753 }
 0x91b   :  { %v1108_v29 = vmul.f32 %v1754_v17, %v2313_v11  ;;  %v1756_v9 = vpop.eup %1755 }
 0x91c   :  { %v1256_v39 = vmul.f32 %v1756_v9, %v2313_v11 }
 0x91d   :  { %v1114_v32 = vmul.f32 %v1108_v29, %v2641_v38 }
 0x91e   :  { %v1262_v63 = vmul.f32 %v1256_v39, %v2613_v4 }
 0x91f   :  { %v1115_v46 = vadd.f32 %v2321_v0, %v1114_v32 }
 0x920   :  { %v1263_v6 = vadd.f32 %v2321_v0, %v1262_v63 }
 0x921   :  { %v1121_v62 = vmul.f32 %v1561_v57, %v1115_v46 }
 0x923   :  { %1519 = vst [vmem:[%s2700_s6 + $0x28] sm:$0xff] %v1121_v62 }
 0x964   :  { %v1397_v38 = vpop.xlane.xlu0 %1396 }
 0x965   :  { %v1400_v1 = vsub.f32 %v1397_v38, %v1399_v10 }
 0x967   :  { %v1401_v12 = vmul.f32 0.03125, %v1400_v1 }
 0x969   :  { %v1402_v5 = vadd.f32 1e-05, %v1401_v12 }
 0x96b   :  { %1757 = vrsqrt.f32 %v1402_v5 }
 0x96c   :  { %v1564_v14 = vpop.permute.xlu0 %1563 }
 0x96d   :  { %v1565_v7 = vunpack.i.l.bf16 %v1564_v14  ;;  %v1566_v20 = vunpack.i.h.bf16 %v1564_v14 }
 0x96f   :  { %v1269_v15 = vmul.f32 %v1565_v7, %v1263_v6 }
 0x971   :  { %1530 = vst [vmem:[%s2700_s6 + $0x30] sm:$0xff] %v1269_v15 }
 0x975   :  { %v1758_v16 = vpop.eup %1757 }
 0x976   :  { %v1404_v19 = vmul.f32 %v1758_v16, %v2313_v11 }
 0x978   :  { %v1410_v41 = vmul.f32 %v1404_v19, %v1394_v61 }
 0x97a   :  { %v1411_v53 = vadd.f32 %v2321_v0, %v1410_v41 }
 0x97c   :  { %v1417_v43 = vmul.f32 %v1566_v20, %v1411_v53 }
 0x97e   :  { %1541 = vst [vmem:[%s2700_s6 + $0x38] sm:$0xff] %v1417_v43 }

</bundles_post_ra>
